<compile_context>
chip_gen: v5e
topology: v5e:2x2
jax: 0.10.0
libtpu: 0.0.40
codegen_flags: <defaults>
</compile_context>

<pallas_src>
import functools

import jax
import jax.numpy as jnp
from jax.experimental import pallas as pl
from jax.experimental.pallas import tpu as pltpu

_TILE = 128  # A-tile sublanes == B-side lane sub-slice width


def _round_up(x, m):
    return ((x + m - 1) // m) * m


def _iou_loss_kernel(conf_ref, loc_ref, tconf_a_ref, pri_a_ref,
                     tloc_ref, pri_b_ref, tconf_b_ref,
                     s_ref, na_ref,
                     a_scr, s_scr,
                     *, size_variance, n_sub):
    sv = size_variance

    # ---- A side: softmax masks + box decode, once per (batch, A-tile) step
    conf = conf_ref[0]                               # (T, C)
    loc = loc_ref[0]                                 # (T, 4)
    pa = pri_a_ref[...]                              # (T, 6): cx,cy,cv*w,cv*h,w,h

    maxv = jnp.max(conf, axis=-1, keepdims=True)     # (T, 1)
    sumexp = jnp.sum(jnp.exp(conf - maxv), axis=-1, keepdims=True)
    probs_mask = sumexp < 2.0                        # max softmax prob > 0.5
    label_mask = conf[:, 0:1] < maxv                 # argmax(softmax) > 0
    tmask_a = tconf_a_ref[0] > 0.0                   # (T, 1)
    mask_a = jnp.logical_and(jnp.logical_and(probs_mask, label_mask),
                             tmask_a).astype(jnp.float32)

    acx = pa[:, 0:1] + loc[:, 0:1] * pa[:, 2:3]
    acy = pa[:, 1:2] + loc[:, 1:2] * pa[:, 3:4]
    aw = pa[:, 4:5] * jnp.exp(jnp.clip(loc[:, 2:3] * sv, -20.0, 20.0))
    ah = pa[:, 5:6] * jnp.exp(jnp.clip(loc[:, 3:4] * sv, -20.0, 20.0))
    ax0 = acx - 0.5 * aw
    ay0 = acy - 0.5 * ah

    # Stage the per-A-tile columns in VMEM so they do not live in vregs across
    # the inner loop (keeps the pairwise working set inside the register file).
    a_scr[:, 0:1] = ax0
    a_scr[:, 1:2] = ay0
    a_scr[:, 2:3] = ax0 + aw
    a_scr[:, 3:4] = ay0 + ah
    a_scr[:, 4:5] = aw * ah
    a_scr[:, 5:6] = mask_a
    s_scr[...] = jnp.zeros_like(s_scr)

    tb = tconf_b_ref.shape[-1]
    ones_col = jnp.ones((tb, 1), jnp.float32)

    # ---- sweep 128-lane B sub-slices of the (VMEM-resident) full B side
    @pl.loop(0, n_sub)
    def _(j):
        tl = tloc_ref[0, j]                          # (4, TB) lane-dense
        pb = pri_b_ref[j]                            # (6, TB)
        mb = (tconf_b_ref[0, j] > 0.0).astype(jnp.float32)   # (1, TB)

        bcx = pb[0:1, :] + tl[0:1, :] * pb[2:3, :]
        bcy = pb[1:2, :] + tl[1:2, :] * pb[3:4, :]
        bw = pb[4:5, :] * jnp.exp(jnp.clip(tl[2:3, :] * sv, -20.0, 20.0))
        bh = pb[5:6, :] * jnp.exp(jnp.clip(tl[3:4, :] * sv, -20.0, 20.0))
        bx0 = bcx - 0.5 * bw
        by0 = bcy - 0.5 * bh
        bx1 = bx0 + bw
        by1 = by0 + bh
        area_b = bw * bh

        x0 = a_scr[:, 0:1]
        y0 = a_scr[:, 1:2]
        x1 = a_scr[:, 2:3]
        y1 = a_scr[:, 3:4]
        area_a = a_scr[:, 4:5]

        # pairwise GIoU on a (T, TB) sub-block; A on sublanes, B on lanes
        iw = jnp.maximum(jnp.minimum(x1, bx1) - jnp.maximum(x0, bx0), 0.0)
        ih = jnp.maximum(jnp.minimum(y1, by1) - jnp.maximum(y0, by0), 0.0)
        inter = iw * ih
        ew = jnp.maximum(x1, bx1) - jnp.minimum(x0, bx0)
        eh = jnp.maximum(y1, by1) - jnp.minimum(y0, by0)
        enclose = ew * eh
        union = (area_a + area_b) - inter
        #   iou - (enclose - union)/enclose
        # = [inter*enclose - (enclose - union)*union] / (union*enclose)
        num = inter * enclose - (enclose - union) * union
        den = union * enclose
        r = pl.reciprocal(den, approx=True)
        r = r * (2.0 - den * r)                      # one Newton refinement
        g = (num * r) * mb                           # fold target-positive mask

        # lane contraction on the (otherwise idle) MXU, default precision
        s_scr[...] += jnp.dot(g, ones_col, preferred_element_type=jnp.float32)

    # ---- per-(batch, A-tile) partials; edge-case finalize happens in JAX
    mask_col = a_scr[:, 5:6]
    s_val = jnp.sum(s_scr[...] * mask_col, axis=0, keepdims=True)   # (1, 1)
    na_val = jnp.sum(mask_col, axis=0, keepdims=True)               # (1, 1)
    s_ref[...] = jnp.reshape(s_val, (1, 1, 1, 1))
    na_ref[...] = jnp.reshape(na_val, (1, 1, 1, 1))


class IouLoss:
    """JAX/Pallas port of the PyTorch IouLoss module (returns the giou term)."""

    def __init__(self, priors, center_variance, size_variance):
        priors = jnp.asarray(priors, jnp.float32)        # (P, 4) center-form
        self.num_priors = int(priors.shape[0])
        self.center_variance = float(center_variance)
        self.size_variance = float(size_variance)

        self.padded = _round_up(self.num_priors, _TILE)
        self.n_sub = self.padded // _TILE
        pad = self.padded - self.num_priors
        if pad:
            # Padded priors are unit boxes so decode stays finite; they never
            # contribute because padded confidences / target labels are 0.
            filler = jnp.tile(jnp.array([[0.5, 0.5, 1.0, 1.0]], jnp.float32),
                              (pad, 1))
            priors = jnp.concatenate([priors, filler], axis=0)

        # Hoisted prior layouts with center_variance pre-folded:
        # columns/rows = [cx, cy, cv*w, cv*h, w, h]
        cv = self.center_variance
        pa = jnp.concatenate(
            [priors[:, 0:2], cv * priors[:, 2:4], priors[:, 2:4]], axis=-1)
        self.priors_a = pa                                        # (Pp, 6)
        self.priors_b = jnp.transpose(                            # (n_sub, 6, T)
            pa.reshape(self.n_sub, _TILE, 6), (0, 2, 1))

    def __call__(self, confidence, locations, target_confidence,
                 target_locations):
        conf = jnp.asarray(confidence, jnp.float32)            # (B, P, C)
        loc = jnp.asarray(locations, jnp.float32)              # (B, P, 4)
        tconf = jnp.asarray(target_confidence, jnp.float32)    # (B, P)
        tloc = jnp.asarray(target_locations, jnp.float32)      # (B, P, 4)
        B, P, C = conf.shape
        Pp, T, n_sub = self.padded, _TILE, self.n_sub
        pad = Pp - P
        if pad:
            conf = jnp.pad(conf, ((0, 0), (0, pad), (0, 0)))
            loc = jnp.pad(loc, ((0, 0), (0, pad), (0, 0)))
            tloc = jnp.pad(tloc, ((0, 0), (0, pad), (0, 0)))
            tconf_p = jnp.pad(tconf, ((0, 0), (0, pad)))
        else:
            tconf_p = tconf

        tconf_col = tconf_p.reshape(B, Pp, 1)                  # A-side columns
        tconf_b = tconf_p.reshape(B, n_sub, 1, T)              # B-side lane rows
        tloc_b = jnp.transpose(tloc.reshape(B, n_sub, T, 4), (0, 1, 3, 2))

        n_a_tiles = Pp // T
        grid = (B, n_a_tiles)
        kernel = functools.partial(_iou_loss_kernel,
                                   size_variance=self.size_variance,
                                   n_sub=n_sub)

        flops = B * Pp * Pp * 30 + B * Pp * 80
        transcendentals = B * Pp * Pp + B * Pp * (C + 4) + 2 * B * Pp * n_a_tiles
        bytes_accessed = 4 * (conf.size + loc.size + tconf_col.size
                              + tconf_b.size + tloc_b.size
                              + self.priors_a.size + self.priors_b.size
                              + 2 * B * n_a_tiles)

        s_part, na_part = pl.pallas_call(
            kernel,
            out_shape=(jax.ShapeDtypeStruct((B, n_a_tiles, 1, 1), jnp.float32),
                       jax.ShapeDtypeStruct((B, n_a_tiles, 1, 1), jnp.float32)),
            grid_spec=pltpu.PrefetchScalarGridSpec(
                num_scalar_prefetch=0,
                grid=grid,
                in_specs=[
                    pl.BlockSpec((1, T, C), lambda i, a: (i, a, 0)),        # conf
                    pl.BlockSpec((1, T, 4), lambda i, a: (i, a, 0)),        # loc
                    pl.BlockSpec((1, T, 1), lambda i, a: (i, a, 0)),        # tconf (A cols)
                    pl.BlockSpec((T, 6), lambda i, a: (a, 0)),              # priors (A tile)
                    pl.BlockSpec((1, n_sub, 4, T), lambda i, a: (i, 0, 0, 0)),  # tloc (B, lane-dense)
                    pl.BlockSpec((n_sub, 6, T), lambda i, a: (0, 0, 0)),        # priors (B, lane-dense)
                    pl.BlockSpec((1, n_sub, 1, T), lambda i, a: (i, 0, 0, 0)),  # tconf (B rows)
                ],
                out_specs=(
                    pl.BlockSpec((1, 1, 1, 1), lambda i, a: (i, a, 0, 0)),
                    pl.BlockSpec((1, 1, 1, 1), lambda i, a: (i, a, 0, 0)),
                ),
                scratch_shapes=[
                    pltpu.VMEM((T, 8), jnp.float32),   # staged A columns + mask
                    pltpu.VMEM((T, 1), jnp.float32),   # per-tile column accumulator
                ],
            ),
            compiler_params=pltpu.CompilerParams(
                dimension_semantics=("parallel", "parallel"),
                vmem_limit_bytes=16 * 1024 * 1024,
            ),
            cost_estimate=pl.CostEstimate(
                flops=int(flops),
                transcendentals=int(transcendentals),
                bytes_accessed=int(bytes_accessed)),
        )(conf, loc, tconf_col, self.priors_a, tloc_b, self.priors_b, tconf_b)

        # ---- edge-case finalize in plain JAX (keeps both grid axes parallel)
        s_b = jnp.sum(s_part, axis=(1, 2, 3))                  # (B,)
        n_a = jnp.sum(na_part, axis=(1, 2, 3))                 # (B,)
        n_t = jnp.sum((tconf > 0.0).astype(jnp.float32), axis=1)

        both_pos = jnp.logical_and(n_t > 0.0, n_a > 0.0)
        both_zero = jnp.logical_and(n_t == 0.0, n_a == 0.0)
        contrib = jnp.where(both_pos, n_t - s_b / jnp.maximum(n_t, 1.0),
                            jnp.where(both_zero, 0.0, 1.0))
        # TODO(synk): the reference divides by num_boxes unguarded (NaN when the
        #             whole batch has no positive targets); clamp to 1 here.
        return jnp.sum(contrib) / jnp.maximum(jnp.sum(n_t), 1.0)


if __name__ == "__main__":
    B, P, C = 2, 128, 4
    key = jax.random.PRNGKey(0)
    k1, k2, k3, k4, k5, k6 = jax.random.split(key, 6)

    # deterministic synthetic priors in center-offset form (cx, cy, w, h)
    prior_centers = jax.random.uniform(k1, (P, 2), minval=0.1, maxval=0.9)
    prior_sizes = jax.random.uniform(k2, (P, 2), minval=0.05, maxval=0.3)
    priors = jnp.concatenate([prior_centers, prior_sizes], axis=-1)   # (P, 4)

    confidence = 3.0 * jax.random.normal(k3, (B, P, C), dtype=jnp.float32)
    locations = 0.5 * jax.random.normal(k4, (B, P, 4), dtype=jnp.float32)
    target_confidence = jax.random.randint(k5, (B, P), 0, C)          # labels, >0 = positive
    target_locations = 0.5 * jax.random.normal(k6, (B, P, 4), dtype=jnp.float32)

    loss_fn = IouLoss(priors, center_variance=0.1, size_variance=0.2)
    giou = loss_fn(confidence, locations, target_confidence, target_locations)
    jax.block_until_ready(giou)
    print("KERNEL_OK")
</pallas_src>

<mosaic_0001>
module attributes {stable_mosaic.version = 11 : i64} {
  func.func @_iou_loss_kernel(%arg0: i32, %arg1: i32, %arg2: memref<1x128x4xf32, #tpu.memory_space<vmem>>, %arg3: memref<1x128x4xf32, #tpu.memory_space<vmem>>, %arg4: memref<1x128x1xf32, #tpu.memory_space<vmem>>, %arg5: memref<128x6xf32, #tpu.memory_space<vmem>>, %arg6: memref<1x1x4x128xf32, #tpu.memory_space<vmem>>, %arg7: memref<1x6x128xf32, #tpu.memory_space<vmem>>, %arg8: memref<1x1x1x128xf32, #tpu.memory_space<vmem>>, %arg9: memref<1x1x1x1xf32, #tpu.memory_space<vmem>>, %arg10: memref<1x1x1x1xf32, #tpu.memory_space<vmem>>, %arg11: memref<128x8xf32, #tpu.memory_space<vmem>>, %arg12: memref<128x1xf32, #tpu.memory_space<vmem>>) attributes {dimension_semantics = [#tpu.dimension_semantics<parallel>, #tpu.dimension_semantics<parallel>], iteration_bounds = array<i64: 2, 1>, scalar_prefetch = 0 : i64, scratch_operands = 2 : i64, tpu.core_type = #tpu.core_type<tc>, window_params = [{transform_indices = @transform_0, window_bounds = array<i64: 1, 128, 4>}, {transform_indices = @transform_1, window_bounds = array<i64: 1, 128, 4>}, {transform_indices = @transform_2, window_bounds = array<i64: 1, 128, 1>}, {transform_indices = @transform_3, window_bounds = array<i64: 128, 6>}, {transform_indices = @transform_4, window_bounds = array<i64: 1, 1, 4, 128>}, {pipeline_mode = #tpu.pipeline_mode<synchronous>, transform_indices = @transform_5, window_bounds = array<i64: 1, 6, 128>}, {transform_indices = @transform_6, window_bounds = array<i64: 1, 1, 1, 128>}, {transform_indices = @transform_7, window_bounds = array<i64: 1, 1, 1, 1>}, {transform_indices = @transform_8, window_bounds = array<i64: 1, 1, 1, 1>}]} {
    %c0 = arith.constant 0 : index
    %c0_0 = arith.constant 0 : index
    %c0_1 = arith.constant 0 : index
    %0 = vector.load %arg2[%c0, %c0_0, %c0_1] : memref<1x128x4xf32, #tpu.memory_space<vmem>>, vector<1x128x4xf32>
    %1 = vector.shape_cast %0 : vector<1x128x4xf32> to vector<128x4xf32>
    %c0_2 = arith.constant 0 : index
    %c0_3 = arith.constant 0 : index
    %c0_4 = arith.constant 0 : index
    %2 = vector.load %arg3[%c0_2, %c0_3, %c0_4] : memref<1x128x4xf32, #tpu.memory_space<vmem>>, vector<1x128x4xf32>
    %3 = vector.shape_cast %2 : vector<1x128x4xf32> to vector<128x4xf32>
    %c0_5 = arith.constant 0 : index
    %c0_6 = arith.constant 0 : index
    %4 = vector.load %arg5[%c0_5, %c0_6] : memref<128x6xf32, #tpu.memory_space<vmem>>, vector<128x6xf32>
    %cst = arith.constant dense<0xFF800000> : vector<128xf32>
    %5 = vector.multi_reduction <maximumf>, %1, %cst [1] : vector<128x4xf32> to vector<128xf32>
    %6 = vector.shape_cast %5 : vector<128xf32> to vector<128x1xf32>
    %7 = vector.broadcast %6 : vector<128x1xf32> to vector<128x4xf32>
    %8 = arith.subf %1, %7 : vector<128x4xf32>
    %9 = math.exp %8 : vector<128x4xf32>
    %cst_7 = arith.constant dense<0.000000e+00> : vector<128xf32>
    %10 = vector.multi_reduction <add>, %9, %cst_7 [1] : vector<128x4xf32> to vector<128xf32>
    %11 = vector.shape_cast %10 : vector<128xf32> to vector<128x1xf32>
    %cst_8 = arith.constant 2.000000e+00 : f32
    %12 = vector.broadcast %cst_8 : f32 to vector<128x1xf32>
    %13 = arith.cmpf olt, %11, %12 : vector<128x1xf32>
    %14 = vector.extract_strided_slice %1 {offsets = [0, 0], sizes = [128, 1], strides = [1, 1]} : vector<128x4xf32> to vector<128x1xf32>
    %15 = arith.cmpf olt, %14, %6 : vector<128x1xf32>
    %c0_9 = arith.constant 0 : index
    %c0_10 = arith.constant 0 : index
    %c0_11 = arith.constant 0 : index
    %16 = vector.load %arg4[%c0_9, %c0_10, %c0_11] : memref<1x128x1xf32, #tpu.memory_space<vmem>>, vector<1x128x1xf32>
    %17 = vector.shape_cast %16 : vector<1x128x1xf32> to vector<128x1xf32>
    %cst_12 = arith.constant 0.000000e+00 : f32
    %18 = vector.broadcast %cst_12 : f32 to vector<128x1xf32>
    %19 = arith.cmpf ogt, %17, %18 : vector<128x1xf32>
    %20 = arith.andi %13, %15 : vector<128x1xi1>
    %21 = arith.andi %20, %19 : vector<128x1xi1>
    %22 = arith.extui %21 : vector<128x1xi1> to vector<128x1xi32>
    %23 = arith.sitofp %22 : vector<128x1xi32> to vector<128x1xf32>
    %24 = vector.extract_strided_slice %4 {offsets = [0, 0], sizes = [128, 1], strides = [1, 1]} : vector<128x6xf32> to vector<128x1xf32>
    %25 = vector.extract_strided_slice %3 {offsets = [0, 0], sizes = [128, 1], strides = [1, 1]} : vector<128x4xf32> to vector<128x1xf32>
    %26 = vector.extract_strided_slice %4 {offsets = [0, 2], sizes = [128, 1], strides = [1, 1]} : vector<128x6xf32> to vector<128x1xf32>
    %27 = arith.mulf %25, %26 : vector<128x1xf32>
    %28 = arith.addf %24, %27 : vector<128x1xf32>
    %29 = vector.extract_strided_slice %4 {offsets = [0, 1], sizes = [128, 1], strides = [1, 1]} : vector<128x6xf32> to vector<128x1xf32>
    %30 = vector.extract_strided_slice %3 {offsets = [0, 1], sizes = [128, 1], strides = [1, 1]} : vector<128x4xf32> to vector<128x1xf32>
    %31 = vector.extract_strided_slice %4 {offsets = [0, 3], sizes = [128, 1], strides = [1, 1]} : vector<128x6xf32> to vector<128x1xf32>
    %32 = arith.mulf %30, %31 : vector<128x1xf32>
    %33 = arith.addf %29, %32 : vector<128x1xf32>
    %34 = vector.extract_strided_slice %4 {offsets = [0, 4], sizes = [128, 1], strides = [1, 1]} : vector<128x6xf32> to vector<128x1xf32>
    %35 = vector.extract_strided_slice %3 {offsets = [0, 2], sizes = [128, 1], strides = [1, 1]} : vector<128x4xf32> to vector<128x1xf32>
    %cst_13 = arith.constant 2.000000e-01 : f32
    %36 = vector.broadcast %cst_13 : f32 to vector<128x1xf32>
    %37 = arith.mulf %35, %36 : vector<128x1xf32>
    %cst_14 = arith.constant -2.000000e+01 : f32
    %cst_15 = arith.constant 2.000000e+01 : f32
    %38 = vector.broadcast %cst_14 : f32 to vector<128x1xf32>
    %39 = arith.maximumf %38, %37 : vector<128x1xf32>
    %40 = vector.broadcast %cst_15 : f32 to vector<128x1xf32>
    %41 = arith.minimumf %40, %39 : vector<128x1xf32>
    %42 = math.exp %41 : vector<128x1xf32>
    %43 = arith.mulf %34, %42 : vector<128x1xf32>
    %44 = vector.extract_strided_slice %4 {offsets = [0, 5], sizes = [128, 1], strides = [1, 1]} : vector<128x6xf32> to vector<128x1xf32>
    %45 = vector.extract_strided_slice %3 {offsets = [0, 3], sizes = [128, 1], strides = [1, 1]} : vector<128x4xf32> to vector<128x1xf32>
    %cst_16 = arith.constant 2.000000e-01 : f32
    %46 = vector.broadcast %cst_16 : f32 to vector<128x1xf32>
    %47 = arith.mulf %45, %46 : vector<128x1xf32>
    %cst_17 = arith.constant -2.000000e+01 : f32
    %cst_18 = arith.constant 2.000000e+01 : f32
    %48 = vector.broadcast %cst_17 : f32 to vector<128x1xf32>
    %49 = arith.maximumf %48, %47 : vector<128x1xf32>
    %50 = vector.broadcast %cst_18 : f32 to vector<128x1xf32>
    %51 = arith.minimumf %50, %49 : vector<128x1xf32>
    %52 = math.exp %51 : vector<128x1xf32>
    %53 = arith.mulf %44, %52 : vector<128x1xf32>
    %cst_19 = arith.constant 5.000000e-01 : f32
    %54 = vector.broadcast %cst_19 : f32 to vector<128x1xf32>
    %55 = arith.mulf %54, %43 : vector<128x1xf32>
    %56 = arith.subf %28, %55 : vector<128x1xf32>
    %cst_20 = arith.constant 5.000000e-01 : f32
    %57 = vector.broadcast %cst_20 : f32 to vector<128x1xf32>
    %58 = arith.mulf %57, %53 : vector<128x1xf32>
    %59 = arith.subf %33, %58 : vector<128x1xf32>
    %c0_21 = arith.constant 0 : index
    %c0_22 = arith.constant 0 : index
    %60 = vector.load %arg11[%c0_21, %c0_22] : memref<128x8xf32, #tpu.memory_space<vmem>>, vector<128x1xf32>
    tpu.vector_store %arg11[%c0_21, %c0_22], %56 {strides = array<i32>} : memref<128x8xf32, #tpu.memory_space<vmem>>, vector<128x1xf32>,
    %c0_23 = arith.constant 0 : index
    %c1 = arith.constant 1 : index
    %61 = vector.load %arg11[%c0_23, %c1] : memref<128x8xf32, #tpu.memory_space<vmem>>, vector<128x1xf32>
    tpu.vector_store %arg11[%c0_23, %c1], %59 {strides = array<i32>} : memref<128x8xf32, #tpu.memory_space<vmem>>, vector<128x1xf32>,
    %62 = arith.addf %56, %43 : vector<128x1xf32>
    %c0_24 = arith.constant 0 : index
    %c2 = arith.constant 2 : index
    %63 = vector.load %arg11[%c0_24, %c2] : memref<128x8xf32, #tpu.memory_space<vmem>>, vector<128x1xf32>
    tpu.vector_store %arg11[%c0_24, %c2], %62 {strides = array<i32>} : memref<128x8xf32, #tpu.memory_space<vmem>>, vector<128x1xf32>,
    %64 = arith.addf %59, %53 : vector<128x1xf32>
    %c0_25 = arith.constant 0 : index
    %c3 = arith.constant 3 : index
    %65 = vector.load %arg11[%c0_25, %c3] : memref<128x8xf32, #tpu.memory_space<vmem>>, vector<128x1xf32>
    tpu.vector_store %arg11[%c0_25, %c3], %64 {strides = array<i32>} : memref<128x8xf32, #tpu.memory_space<vmem>>, vector<128x1xf32>,
    %66 = arith.mulf %43, %53 : vector<128x1xf32>
    %c0_26 = arith.constant 0 : index
    %c4 = arith.constant 4 : index
    %67 = vector.load %arg11[%c0_26, %c4] : memref<128x8xf32, #tpu.memory_space<vmem>>, vector<128x1xf32>
    tpu.vector_store %arg11[%c0_26, %c4], %66 {strides = array<i32>} : memref<128x8xf32, #tpu.memory_space<vmem>>, vector<128x1xf32>,
    %c0_27 = arith.constant 0 : index
    %c5 = arith.constant 5 : index
    %68 = vector.load %arg11[%c0_27, %c5] : memref<128x8xf32, #tpu.memory_space<vmem>>, vector<128x1xf32>
    tpu.vector_store %arg11[%c0_27, %c5], %23 {strides = array<i32>} : memref<128x8xf32, #tpu.memory_space<vmem>>, vector<128x1xf32>,
    %cst_28 = arith.constant 0.000000e+00 : f32
    %69 = vector.broadcast %cst_28 : f32 to vector<128x1xf32>
    %c0_29 = arith.constant 0 : index
    %c0_30 = arith.constant 0 : index
    %70 = vector.load %arg12[%c0_29, %c0_30] : memref<128x1xf32, #tpu.memory_space<vmem>>, vector<128x1xf32>
    tpu.vector_store %arg12[%c0_29, %c0_30], %69 {strides = array<i32>} : memref<128x1xf32, #tpu.memory_space<vmem>>, vector<128x1xf32>,
    %cst_31 = arith.constant 1.000000e+00 : f32
    %71 = vector.broadcast %cst_31 : f32 to vector<128x1xf32>
    %c0_i32 = arith.constant 0 : i32
    %c1_i32 = arith.constant 1 : i32
    %72 = arith.muli %c0_i32, %c1_i32 : i32
    %c0_i32_32 = arith.constant 0 : i32
    %73 = arith.addi %c0_i32_32, %72 : i32
    %c0_33 = arith.constant 0 : index
    %74 = arith.index_cast %73 : i32 to index
    %c0_34 = arith.constant 0 : index
    %c0_35 = arith.constant 0 : index
    %75 = vector.load %arg6[%c0_33, %74, %c0_34, %c0_35] : memref<1x1x4x128xf32, #tpu.memory_space<vmem>>, vector<1x1x4x128xf32>
    %76 = vector.shape_cast %75 : vector<1x1x4x128xf32> to vector<4x128xf32>
    %77 = arith.index_cast %73 : i32 to index
    %c0_36 = arith.constant 0 : index
    %c0_37 = arith.constant 0 : index
    %78 = vector.load %arg7[%77, %c0_36, %c0_37] : memref<1x6x128xf32, #tpu.memory_space<vmem>>, vector<1x6x128xf32>
    %79 = vector.shape_cast %78 : vector<1x6x128xf32> to vector<6x128xf32>
    %c0_38 = arith.constant 0 : index
    %80 = arith.index_cast %73 : i32 to index
    %c0_39 = arith.constant 0 : index
    %c0_40 = arith.constant 0 : index
    %81 = vector.load %arg8[%c0_38, %80, %c0_39, %c0_40] : memref<1x1x1x128xf32, #tpu.memory_space<vmem>>, vector<1x1x1x128xf32>
    %82 = vector.shape_cast %81 : vector<1x1x1x128xf32> to vector<1x128xf32>
    %cst_41 = arith.constant 0.000000e+00 : f32
    %83 = vector.broadcast %cst_41 : f32 to vector<1x128xf32>
    %84 = arith.cmpf ogt, %82, %83 : vector<1x128xf32>
    %85 = arith.extui %84 : vector<1x128xi1> to vector<1x128xi32>
    %86 = arith.sitofp %85 : vector<1x128xi32> to vector<1x128xf32>
    %87 = vector.extract_strided_slice %79 {offsets = [0, 0], sizes = [1, 128], strides = [1, 1]} : vector<6x128xf32> to vector<1x128xf32>
    %88 = vector.extract_strided_slice %76 {offsets = [0, 0], sizes = [1, 128], strides = [1, 1]} : vector<4x128xf32> to vector<1x128xf32>
    %89 = vector.extract_strided_slice %79 {offsets = [2, 0], sizes = [1, 128], strides = [1, 1]} : vector<6x128xf32> to vector<1x128xf32>
    %90 = arith.mulf %88, %89 : vector<1x128xf32>
    %91 = arith.addf %87, %90 : vector<1x128xf32>
    %92 = vector.extract_strided_slice %79 {offsets = [1, 0], sizes = [1, 128], strides = [1, 1]} : vector<6x128xf32> to vector<1x128xf32>
    %93 = vector.extract_strided_slice %76 {offsets = [1, 0], sizes = [1, 128], strides = [1, 1]} : vector<4x128xf32> to vector<1x128xf32>
    %94 = vector.extract_strided_slice %79 {offsets = [3, 0], sizes = [1, 128], strides = [1, 1]} : vector<6x128xf32> to vector<1x128xf32>
    %95 = arith.mulf %93, %94 : vector<1x128xf32>
    %96 = arith.addf %92, %95 : vector<1x128xf32>
    %97 = vector.extract_strided_slice %79 {offsets = [4, 0], sizes = [1, 128], strides = [1, 1]} : vector<6x128xf32> to vector<1x128xf32>
    %98 = vector.extract_strided_slice %76 {offsets = [2, 0], sizes = [1, 128], strides = [1, 1]} : vector<4x128xf32> to vector<1x128xf32>
    %cst_42 = arith.constant 2.000000e-01 : f32
    %99 = vector.broadcast %cst_42 : f32 to vector<1x128xf32>
    %100 = arith.mulf %98, %99 : vector<1x128xf32>
    %cst_43 = arith.constant -2.000000e+01 : f32
    %cst_44 = arith.constant 2.000000e+01 : f32
    %101 = vector.broadcast %cst_43 : f32 to vector<1x128xf32>
    %102 = arith.maximumf %101, %100 : vector<1x128xf32>
    %103 = vector.broadcast %cst_44 : f32 to vector<1x128xf32>
    %104 = arith.minimumf %103, %102 : vector<1x128xf32>
    %105 = math.exp %104 : vector<1x128xf32>
    %106 = arith.mulf %97, %105 : vector<1x128xf32>
    %107 = vector.extract_strided_slice %79 {offsets = [5, 0], sizes = [1, 128], strides = [1, 1]} : vector<6x128xf32> to vector<1x128xf32>
    %108 = vector.extract_strided_slice %76 {offsets = [3, 0], sizes = [1, 128], strides = [1, 1]} : vector<4x128xf32> to vector<1x128xf32>
    %cst_45 = arith.constant 2.000000e-01 : f32
    %109 = vector.broadcast %cst_45 : f32 to vector<1x128xf32>
    %110 = arith.mulf %108, %109 : vector<1x128xf32>
    %cst_46 = arith.constant -2.000000e+01 : f32
    %cst_47 = arith.constant 2.000000e+01 : f32
    %111 = vector.broadcast %cst_46 : f32 to vector<1x128xf32>
    %112 = arith.maximumf %111, %110 : vector<1x128xf32>
    %113 = vector.broadcast %cst_47 : f32 to vector<1x128xf32>
    %114 = arith.minimumf %113, %112 : vector<1x128xf32>
    %115 = math.exp %114 : vector<1x128xf32>
    %116 = arith.mulf %107, %115 : vector<1x128xf32>
    %cst_48 = arith.constant 5.000000e-01 : f32
    %117 = vector.broadcast %cst_48 : f32 to vector<1x128xf32>
    %118 = arith.mulf %117, %106 : vector<1x128xf32>
    %119 = arith.subf %91, %118 : vector<1x128xf32>
    %cst_49 = arith.constant 5.000000e-01 : f32
    %120 = vector.broadcast %cst_49 : f32 to vector<1x128xf32>
    %121 = arith.mulf %120, %116 : vector<1x128xf32>
    %122 = arith.subf %96, %121 : vector<1x128xf32>
    %123 = arith.addf %119, %106 : vector<1x128xf32>
    %124 = arith.addf %122, %116 : vector<1x128xf32>
    %125 = arith.mulf %106, %116 : vector<1x128xf32>
    %c0_50 = arith.constant 0 : index
    %c0_51 = arith.constant 0 : index
    %126 = vector.load %arg11[%c0_50, %c0_51] : memref<128x8xf32, #tpu.memory_space<vmem>>, vector<128x1xf32>
    %c0_52 = arith.constant 0 : index
    %c1_53 = arith.constant 1 : index
    %127 = vector.load %arg11[%c0_52, %c1_53] : memref<128x8xf32, #tpu.memory_space<vmem>>, vector<128x1xf32>
    %c0_54 = arith.constant 0 : index
    %c2_55 = arith.constant 2 : index
    %128 = vector.load %arg11[%c0_54, %c2_55] : memref<128x8xf32, #tpu.memory_space<vmem>>, vector<128x1xf32>
    %c0_56 = arith.constant 0 : index
    %c3_57 = arith.constant 3 : index
    %129 = vector.load %arg11[%c0_56, %c3_57] : memref<128x8xf32, #tpu.memory_space<vmem>>, vector<128x1xf32>
    %c0_58 = arith.constant 0 : index
    %c4_59 = arith.constant 4 : index
    %130 = vector.load %arg11[%c0_58, %c4_59] : memref<128x8xf32, #tpu.memory_space<vmem>>, vector<128x1xf32>
    %131 = vector.broadcast %128 : vector<128x1xf32> to vector<128x128xf32>
    %132 = vector.broadcast %123 : vector<1x128xf32> to vector<128x128xf32>
    %133 = arith.minimumf %131, %132 : vector<128x128xf32>
    %134 = vector.broadcast %126 : vector<128x1xf32> to vector<128x128xf32>
    %135 = vector.broadcast %119 : vector<1x128xf32> to vector<128x128xf32>
    %136 = arith.maximumf %134, %135 : vector<128x128xf32>
    %137 = arith.subf %133, %136 : vector<128x128xf32>
    %cst_60 = arith.constant 0.000000e+00 : f32
    %138 = vector.broadcast %cst_60 : f32 to vector<128x128xf32>
    %139 = arith.maximumf %137, %138 : vector<128x128xf32>
    %140 = vector.broadcast %129 : vector<128x1xf32> to vector<128x128xf32>
    %141 = vector.broadcast %124 : vector<1x128xf32> to vector<128x128xf32>
    %142 = arith.minimumf %140, %141 : vector<128x128xf32>
    %143 = vector.broadcast %127 : vector<128x1xf32> to vector<128x128xf32>
    %144 = vector.broadcast %122 : vector<1x128xf32> to vector<128x128xf32>
    %145 = arith.maximumf %143, %144 : vector<128x128xf32>
    %146 = arith.subf %142, %145 : vector<128x128xf32>
    %cst_61 = arith.constant 0.000000e+00 : f32
    %147 = vector.broadcast %cst_61 : f32 to vector<128x128xf32>
    %148 = arith.maximumf %146, %147 : vector<128x128xf32>
    %149 = arith.mulf %139, %148 : vector<128x128xf32>
    %150 = vector.broadcast %128 : vector<128x1xf32> to vector<128x128xf32>
    %151 = vector.broadcast %123 : vector<1x128xf32> to vector<128x128xf32>
    %152 = arith.maximumf %150, %151 : vector<128x128xf32>
    %153 = vector.broadcast %126 : vector<128x1xf32> to vector<128x128xf32>
    %154 = vector.broadcast %119 : vector<1x128xf32> to vector<128x128xf32>
    %155 = arith.minimumf %153, %154 : vector<128x128xf32>
    %156 = arith.subf %152, %155 : vector<128x128xf32>
    %157 = vector.broadcast %129 : vector<128x1xf32> to vector<128x128xf32>
    %158 = vector.broadcast %124 : vector<1x128xf32> to vector<128x128xf32>
    %159 = arith.maximumf %157, %158 : vector<128x128xf32>
    %160 = vector.broadcast %127 : vector<128x1xf32> to vector<128x128xf32>
    %161 = vector.broadcast %122 : vector<1x128xf32> to vector<128x128xf32>
    %162 = arith.minimumf %160, %161 : vector<128x128xf32>
    %163 = arith.subf %159, %162 : vector<128x128xf32>
    %164 = arith.mulf %156, %163 : vector<128x128xf32>
    %165 = vector.broadcast %130 : vector<128x1xf32> to vector<128x128xf32>
    %166 = vector.broadcast %125 : vector<1x128xf32> to vector<128x128xf32>
    %167 = arith.addf %165, %166 : vector<128x128xf32>
    %168 = arith.subf %167, %149 : vector<128x128xf32>
    %169 = arith.mulf %149, %164 : vector<128x128xf32>
    %170 = arith.subf %164, %168 : vector<128x128xf32>
    %171 = arith.mulf %170, %168 : vector<128x128xf32>
    %172 = arith.subf %169, %171 : vector<128x128xf32>
    %173 = arith.mulf %168, %164 : vector<128x128xf32>
    %174 = tpu.reciprocal %173 {approx = true} : vector<128x128xf32> -> vector<128x128xf32>
    %175 = arith.mulf %173, %174 : vector<128x128xf32>
    %cst_62 = arith.constant 2.000000e+00 : f32
    %176 = vector.broadcast %cst_62 : f32 to vector<128x128xf32>
    %177 = arith.subf %176, %175 : vector<128x128xf32>
    %178 = arith.mulf %174, %177 : vector<128x128xf32>
    %179 = arith.mulf %172, %178 : vector<128x128xf32>
    %180 = vector.broadcast %86 : vector<1x128xf32> to vector<128x128xf32>
    %181 = arith.mulf %179, %180 : vector<128x128xf32>
    %c0_63 = arith.constant 0 : index
    %c0_64 = arith.constant 0 : index
    %182 = vector.load %arg12[%c0_63, %c0_64] : memref<128x1xf32, #tpu.memory_space<vmem>>, vector<128x1xf32>
    %cst_65 = arith.constant dense<0.000000e+00> : vector<128x1xf32>
    %183 = tpu.matmul %181, %71, %cst_65 {dimension_numbers = #tpu.dot_dimension_numbers<[1], [0], [0], [1], [0, 0, 1, 1], [], []>} : vector<128x128xf32>, vector<128x1xf32>, vector<128x1xf32> -> vector<128x1xf32>
    %184 = arith.addf %182, %183 : vector<128x1xf32>
    %c0_66 = arith.constant 0 : index
    %c0_67 = arith.constant 0 : index
    %185 = vector.load %arg12[%c0_66, %c0_67] : memref<128x1xf32, #tpu.memory_space<vmem>>, vector<128x1xf32>
    tpu.vector_store %arg12[%c0_66, %c0_67], %184 {strides = array<i32>} : memref<128x1xf32, #tpu.memory_space<vmem>>, vector<128x1xf32>,
    %c1_i32_68 = arith.constant 1 : i32
    %c0_69 = arith.constant 0 : index
    %c5_70 = arith.constant 5 : index
    %186 = vector.load %arg11[%c0_69, %c5_70] : memref<128x8xf32, #tpu.memory_space<vmem>>, vector<128x1xf32>
    %c0_71 = arith.constant 0 : index
    %c0_72 = arith.constant 0 : index
    %187 = vector.load %arg12[%c0_71, %c0_72] : memref<128x1xf32, #tpu.memory_space<vmem>>, vector<128x1xf32>
    %188 = arith.mulf %187, %186 : vector<128x1xf32>
    %cst_73 = arith.constant dense<0.000000e+00> : vector<1xf32>
    %189 = vector.multi_reduction <add>, %188, %cst_73 [0] : vector<128x1xf32> to vector<1xf32>
    %190 = vector.shape_cast %189 : vector<1xf32> to vector<1x1xf32>
    %cst_74 = arith.constant dense<0.000000e+00> : vector<1xf32>
    %191 = vector.multi_reduction <add>, %186, %cst_74 [0] : vector<128x1xf32> to vector<1xf32>
    %192 = vector.shape_cast %191 : vector<1xf32> to vector<1x1xf32>
    %193 = vector.shape_cast %190 : vector<1x1xf32> to vector<1x1x1x1xf32>
    %c0_75 = arith.constant 0 : index
    %c0_76 = arith.constant 0 : index
    %c0_77 = arith.constant 0 : index
    %c0_78 = arith.constant 0 : index
    %194 = vector.load %arg9[%c0_75, %c0_76, %c0_77, %c0_78] : memref<1x1x1x1xf32, #tpu.memory_space<vmem>>, vector<1x1x1x1xf32>
    tpu.vector_store %arg9[%c0_75, %c0_76, %c0_77, %c0_78], %193 {strides = array<i32>} : memref<1x1x1x1xf32, #tpu.memory_space<vmem>>, vector<1x1x1x1xf32>,
    %195 = vector.shape_cast %192 : vector<1x1xf32> to vector<1x1x1x1xf32>
    %c0_79 = arith.constant 0 : index
    %c0_80 = arith.constant 0 : index
    %c0_81 = arith.constant 0 : index
    %c0_82 = arith.constant 0 : index
    %196 = vector.load %arg10[%c0_79, %c0_80, %c0_81, %c0_82] : memref<1x1x1x1xf32, #tpu.memory_space<vmem>>, vector<1x1x1x1xf32>
    tpu.vector_store %arg10[%c0_79, %c0_80, %c0_81, %c0_82], %195 {strides = array<i32>} : memref<1x1x1x1xf32, #tpu.memory_space<vmem>>, vector<1x1x1x1xf32>,
    return
  }
  func.func @transform_0(%arg0: i32, %arg1: i32) -> (i32, i32, i32) {
    %c0_i32 = arith.constant 0 : i32
    %c0_i32_0 = arith.constant 0 : i32
    return %arg0, %arg1, %c0_i32 : i32, i32, i32
  }
  func.func @transform_1(%arg0: i32, %arg1: i32) -> (i32, i32, i32) {
    %c0_i32 = arith.constant 0 : i32
    %c0_i32_0 = arith.constant 0 : i32
    return %arg0, %arg1, %c0_i32 : i32, i32, i32
  }
  func.func @transform_2(%arg0: i32, %arg1: i32) -> (i32, i32, i32) {
    %c0_i32 = arith.constant 0 : i32
    %c0_i32_0 = arith.constant 0 : i32
    return %arg0, %arg1, %c0_i32 : i32, i32, i32
  }
  func.func @transform_3(%arg0: i32, %arg1: i32) -> (i32, i32) {
    %c0_i32 = arith.constant 0 : i32
    %c0_i32_0 = arith.constant 0 : i32
    return %arg1, %c0_i32 : i32, i32
  }
  func.func @transform_4(%arg0: i32, %arg1: i32) -> (i32, i32, i32, i32) {
    %c0_i32 = arith.constant 0 : i32
    %c0_i32_0 = arith.constant 0 : i32
    %c0_i32_1 = arith.constant 0 : i32
    %c0_i32_2 = arith.constant 0 : i32
    return %arg0, %c0_i32, %c0_i32_0, %c0_i32_1 : i32, i32, i32, i32
  }
  func.func @transform_5(%arg0: i32, %arg1: i32) -> (i32, i32, i32) {
    %c0_i32 = arith.constant 0 : i32
    %c0_i32_0 = arith.constant 0 : i32
    %c0_i32_1 = arith.constant 0 : i32
    %c0_i32_2 = arith.constant 0 : i32
    return %c0_i32, %c0_i32_0, %c0_i32_1 : i32, i32, i32
  }
  func.func @transform_6(%arg0: i32, %arg1: i32) -> (i32, i32, i32, i32) {
    %c0_i32 = arith.constant 0 : i32
    %c0_i32_0 = arith.constant 0 : i32
    %c0_i32_1 = arith.constant 0 : i32
    %c0_i32_2 = arith.constant 0 : i32
    return %arg0, %c0_i32, %c0_i32_0, %c0_i32_1 : i32, i32, i32, i32
  }
  func.func @transform_7(%arg0: i32, %arg1: i32) -> (i32, i32, i32, i32) {
    %c0_i32 = arith.constant 0 : i32
    %c0_i32_0 = arith.constant 0 : i32
    %c0_i32_1 = arith.constant 0 : i32
    return %arg0, %arg1, %c0_i32, %c0_i32_0 : i32, i32, i32, i32
  }
  func.func @transform_8(%arg0: i32, %arg1: i32) -> (i32, i32, i32, i32) {
    %c0_i32 = arith.constant 0 : i32
    %c0_i32_0 = arith.constant 0 : i32
    %c0_i32_1 = arith.constant 0 : i32
    return %arg0, %arg1, %c0_i32, %c0_i32_0 : i32, i32, i32, i32
  }
}

</mosaic_0001>

<bundles_post_ra>
// kernel: tpu_custom_call.1
= control target key start
LH: loop header
LB: loop body
LE: loop exit
PB: predicated region body
PF: predicated region fallthrough
CT: control target
= control target key end

     0   :  { %s3296_s27 = smov 0   ;;  %s3298_s28 = smov 0   ;;  %s5110_s0 = inlined_call_operand.vmem [shape: f32[2,128,4], index: 0, kind: input, shape index: {}]   ;;  %s5111_s1 = inlined_call_operand.vmem [shape: f32[2,128,4], index: 1, kind: input, shape index: {}]   ;;  %s5112_s2 = inlined_call_operand.vmem [shape: f32[2,128,1], index: 2, kind: input, shape index: {}]   ;;  %s5113_s3 = inlined_call_operand.vmem [shape: f32[128,6], index: 3, kind: input, shape index: {}]   ;;  %s5114_s4 = inlined_call_operand.vmem [shape: f32[2,1,4,128], index: 4, kind: input, shape index: {}]   ;;  %s5115_s5 = inlined_call_operand.vmem [shape: f32[1,6,128], index: 5, kind: input, shape index: {}]   ;;  %s5116_s6 = inlined_call_operand.vmem [shape: f32[2,1,1,128], index: 6, kind: input, shape index: {}]   ;;  %s5117_s7 = inlined_call_operand.vmem [shape: f32[2,1,1,1], index: 7, kind: output, shape index: {0}]   ;;  %s5118_s8 = inlined_call_operand.vmem [shape: f32[2,1,1,1], index: 8, kind: output, shape index: {1}]  }
   0x1   :  { %s3300_s29 = smov 0  }
   0x2 LB: > { %s31_s30 = sadd.s32 1, %s3232_s28  ;;  %p2889_p0 = scmp.ge.s32.totalorder %s3236_s29, 1  ;;  %s3236_s29 = sphi %s3300_s29, %s19_s29   ;;  %s3232_s28 = sphi %s3298_s28, %s5261_s28   ;;  %s3228_s27 = sphi %s3296_s27, %s5260_s27  }
   0x3   : > { %p33_p1 = scmp.ge.s32.totalorder %s31_s30, 2  ;;  %p350_p2 = scmp.lt.s32.totalorder %s3236_s29, 3 }
   0x5   : > { %s5263_s30 = smov (%p33_p1, %s31_s30), 0  ;;  %p351_p3 = pnand %p2889_p0, %p350_p2 }
   0x7   : > { %354 = sbr.rel (%p351_p3) target bundleno = 1218 (0x4c2), region = 48 }
   0xc   : > { %p426_p4 = scmp.lt.s32.totalorder %s3228_s27, 1  ;;  %vm528_vm0 = vcmask 31744   ;;  %v3408_v32 = vld [vmem:[%s5113_s3] sm:$0xff]  ;;  %v3413_v33 = vld [vmem:[%s5113_s3 + $0x10] sm:$0xff]  ;;  %s3238_s17 = smov 126   ;;  %v3422_v34 = vld [vmem:[%s5113_s3 + $0x8] sm:$0xff] }
   0xd   : > { %v3427_v35 = vld [vmem:[%s5113_s3 + $0x18] sm:$0xff]  ;;  %v3434_v36 = vld [vmem:[%s5113_s3 + $0x30] sm:$0xff]  ;;  %v3443_v37 = vld [vmem:[%s5113_s3 + $0x20] sm:$0xff]  ;;  %s3239_s16 = smov 2   ;;  %vm1153_vm1 = vcmask 7168   ;;  %vm1170_vm2 = vcmask 15368  }
   0xe   : > { %s5265_s27 = smov (!%p426_p4, %s3228_s27), 1  ;;  %v3448_v38 = vld [vmem:[%s5113_s3 + $0x28] sm:$0xff]  ;;  %v3464_v40 = vld [vmem:[%s5113_s3 + $0x38] sm:$0xff]  ;;  %v3469_v41 = vld [vmem:[%s5113_s3 + $0x40] sm:$0xff]  ;;  %s3242_s20 = smov 127  }
   0xf   : > { %s3317_s9 = sshll.u32 %s5265_s27, 7  ;;  %v3455_v39 = vld [vmem:[%s5113_s3 + $0x48] sm:$0xff]  ;;  %5150 = vst [vmem:[#allocation4_spill] sm:$0xff] %v3469_v41  ;;  %v3476_v42 = vld [vmem:[%s5113_s3 + $0x60] sm:$0xff]  ;;  %v3485_v43 = vld [vmem:[%s5113_s3 + $0x50] sm:$0xff]  ;;  %s3249_s13 = smov 123  }
  0x10   : > { %s3323_s12 = scalar_lea.vmem %s5110_s0, %s3317_s9  ;;  %v3490_v44 = vld [vmem:[%s5113_s3 + $0x58] sm:$0xff]  ;;  %v3499_v45 = vld [vmem:[%s5113_s3 + $0x68] sm:$0xff]  ;;  %v3504_v46 = vld [vmem:[%s5113_s3 + $0x70] sm:$0xff]  ;;  %s3591_s15 = scalar_lea.vmem %s5111_s1, %s3317_s9 }
  0x11   : > { %v3326_v0 = vld [vmem:[%s3323_s12 + $0x20] sm:$0xff]  ;;  %v3329_v1 = vld [vmem:[%s3323_s12 + $0x10] sm:$0xff]  ;;  %v3341_v6 = vld [vmem:[%s3323_s12 + $0x28] sm:$0xff]  ;;  %s4058_s23 = scalar_lea.vmem %s5112_s2, %s3317_s9  ;;  %s3243_s9 = smov 5  }
  0x12   : > { %v541_v2 = vsel %vm528_vm0, %v3326_v0, -inf  ;;  %v535_v3 = vsel %vm528_vm0, %v3329_v1, -inf  ;;  %v3336_v4 = vld [vmem:[%s3323_s12] sm:$0xff]  ;;  %v3344_v7 = vld [vmem:[%s3323_s12 + $0x18] sm:$0xff]  ;;  %v3347_v8 = vld [vmem:[%s3323_s12 + $0x8] sm:$0xff]  ;;  %v544_v9 = vsel %vm528_vm0, %v3341_v6, -inf  ;;  %s473_s22 = scalar_lea.vmem %s5117_s7, %s5265_s27 }
  0x13   : > { %542 = vmax.xlane.f32.xlu2 %v541_v2  ;;  %536 = vmax.xlane.f32.xlu1 %v535_v3  ;;  %v529_v5 = vsel %vm528_vm0, %v3336_v4, -inf  ;;  %v538_v10 = vsel %vm528_vm0, %v3344_v7, -inf  ;;  %v532_v11 = vsel %vm528_vm0, %v3347_v8, -inf  ;;  %v3356_v12 = vld [vmem:[%s3323_s12 + $0x40] sm:$0xff]  ;;  %v3359_v13 = vld [vmem:[%s3323_s12 + $0x38] sm:$0xff]  ;;  %v3362_v14 = vld [vmem:[%s3323_s12 + $0x30] sm:$0xff] }
  0x14   : > { %530 = vmax.xlane.f32.xlu0 %v529_v5  ;;  %v553_v15 = vsel %vm528_vm0, %v3356_v12, -inf  ;;  %v550_v16 = vsel %vm528_vm0, %v3359_v13, -inf  ;;  %v547_v17 = vsel %vm528_vm0, %v3362_v14, -inf  ;;  %v3371_v18 = vld [vmem:[%s3323_s12 + $0x58] sm:$0xff]  ;;  %v3374_v19 = vld [vmem:[%s3323_s12 + $0x50] sm:$0xff]  ;;  %v3377_v20 = vld [vmem:[%s3323_s12 + $0x48] sm:$0xff] }
  0x15   : > { %v562_v21 = vsel %vm528_vm0, %v3371_v18, -inf  ;;  %v559_v22 = vsel %vm528_vm0, %v3374_v19, -inf  ;;  %v556_v23 = vsel %vm528_vm0, %v3377_v20, -inf  ;;  %v3386_v24 = vld [vmem:[%s3323_s12 + $0x70] sm:$0xff]  ;;  %v3389_v25 = vld [vmem:[%s3323_s12 + $0x68] sm:$0xff]  ;;  %v3392_v26 = vld [vmem:[%s3323_s12 + $0x60] sm:$0xff] }
  0x16   : > { %v571_v27 = vsel %vm528_vm0, %v3386_v24, -inf  ;;  %v568_v28 = vsel %vm528_vm0, %v3389_v25, -inf  ;;  %v565_v29 = vsel %vm528_vm0, %v3392_v26, -inf  ;;  %v3401_v30 = vld [vmem:[%s3323_s12 + $0x78] sm:$0xff] }
  0x17   : > { %v574_v31 = vsel %vm528_vm0, %v3401_v30, -inf }
  0x1b   : > { %545 = vmax.xlane.f32.xlu2 %v544_v9  ;;  %539 = vmax.xlane.f32.xlu1 %v538_v10 }
  0x1c   : > { %533 = vmax.xlane.f32.xlu0 %v532_v11 }
  0x23   : > { %554 = vmax.xlane.f32.xlu2 %v553_v15  ;;  %551 = vmax.xlane.f32.xlu1 %v550_v16 }
  0x24   : > { %548 = vmax.xlane.f32.xlu0 %v547_v17 }
  0x2b   : > { %563 = vmax.xlane.f32.xlu2 %v562_v21  ;;  %560 = vmax.xlane.f32.xlu1 %v559_v22 }
  0x2c   : > { %557 = vmax.xlane.f32.xlu0 %v556_v23 }
  0x33   : > { %572 = vmax.xlane.f32.xlu2 %v571_v27  ;;  %569 = vmax.xlane.f32.xlu1 %v568_v28 }
  0x34   : > { %566 = vmax.xlane.f32.xlu0 %v565_v29 }
  0x3c   : > { %575 = vmax.xlane.f32.xlu0 %v574_v31 }
  0x4b   : > { %817 = vrot.lane.b32.xlu2 %v3408_v32, %s3238_s17 }
  0x4c   : > { %821 = vrot.lane.b32.xlu1 %v3413_v33, %s3238_s17 }
  0x50   : > { %819 = vrot.lane.b32.xlu0 %v3422_v34, %s3238_s17 }
  0x53   : > { %823 = vrot.lane.b32.xlu2 %v3427_v35, %s3238_s17 }
  0x54   : > { %829 = vrot.lane.b32.xlu1 %v3434_v36, %s3238_s17 }
  0x58   : > { %825 = vrot.lane.b32.xlu0 %v3443_v37, %s3238_s17 }
  0x5b   : > { %827 = vrot.lane.b32.xlu2 %v3448_v38, %s3238_s17 }
  0x5c   : > { %835 = vrot.lane.b32.xlu1 %v3455_v39, %s3238_s17 }
  0x60   : > { %831 = vrot.lane.b32.xlu0 %v3464_v40, %s3238_s17 }
  0x63   : > { %833 = vrot.lane.b32.xlu2 %v3469_v41, %s3238_s17 }
  0x64   : > { %841 = vrot.lane.b32.xlu1 %v3476_v42, %s3238_s17 }
  0x68   : > { %837 = vrot.lane.b32.xlu0 %v3485_v43, %s3238_s17 }
  0x6b   : > { %839 = vrot.lane.b32.xlu2 %v3490_v44, %s3238_s17 }
  0x70   : > { %843 = vrot.lane.b32.xlu0 %v3499_v45, %s3238_s17 }
  0x73   : > { %845 = vrot.lane.b32.xlu2 %v3504_v46, %s3238_s17 }
  0x86   : > { %v3510_v47 = vpop.xlane.xlu2 %542  ;;  %v3512_v48 = vpop.xlane.xlu1 %536 }
  0x87   : > { %5151 = vst [vmem:[#allocation5_spill] sm:$0xff] %v3510_v47  ;;  %v3514_v49 = vpop.xlane.xlu0 %530  ;;  %v579_v50 = vsub.f32 %v3329_v1, %v3512_v48  ;;  %v581_v61 = vsub.f32 %v3326_v0, %v3510_v47 }
  0x88   : > { %5152 = vst [vmem:[#allocation6_spill] sm:$0xff] %v3512_v48  ;;  %v577_v51 = vsub.f32 %v3336_v4, %v3514_v49 }
  0x89   : > { %5153 = vst [vmem:[#allocation7_spill] sm:$0xff] %v3514_v49  ;;  %v597_v53 = vmul.f32 1.442695, %v579_v50  ;;  %v601_v3 = vmul.f32 1.442695, %v581_v61 }
  0x8a   : > { %v593_v52 = vmul.f32 1.442695, %v577_v51 }
  0x8c   : > { %3095 = vpow2.f32 %v593_v52 }
  0x8d   : > { %3097 = vpow2.f32 %v597_v53 }
  0x8e   : > { %v3520_v54 = vpop.xlane.xlu2 %545  ;;  %v3522_v55 = vpop.xlane.xlu1 %539 }
  0x8f   : > { %5154 = vst [vmem:[#allocation8_spill] sm:$0xff] %v3520_v54  ;;  %v582_v56 = vsub.f32 %v3341_v6, %v3520_v54  ;;  %v580_v57 = vsub.f32 %v3344_v7, %v3522_v55  ;;  %v3528_v58 = vpop.xlane.xlu0 %533 }
  0x90   : > { %5155 = vst [vmem:[#allocation9_spill] sm:$0xff] %v3522_v55  ;;  %v578_v60 = vsub.f32 %v3347_v8, %v3528_v58 }
  0x91   : > { %5156 = vst [vmem:[#allocation10_spill] sm:$0xff] %v3528_v58  ;;  %v599_v59 = vmul.f32 1.442695, %v580_v57  ;;  %v603_v63 = vmul.f32 1.442695, %v582_v56 }
  0x92   : > { %v3096_v62 = vpop.eup %3095  ;;  %v595_v1 = vmul.f32 1.442695, %v578_v60 }
  0x93   : > { %3099 = vpow2.f32 %v599_v59  ;;  %v625_v2 = vsel %vm528_vm0, %v3096_v62, 0.0  ;;  %v3098_v6 = vpop.eup %3097 }
  0x94   : > { %3101 = vpow2.f32 %v595_v1  ;;  %626 = vadd.xlane.f32.xlu1 %v625_v2  ;;  %v631_v10 = vsel %vm528_vm0, %v3098_v6, 0.0 }
  0x95   : > { %3103 = vpow2.f32 %v603_v63 }
  0x96   : > { %v3535_v4 = vpop.xlane.xlu2 %554  ;;  %v3537_v5 = vpop.xlane.xlu1 %551  ;;  %3105 = vpow2.f32 %v601_v3 }
  0x97   : > { %5157 = vst [vmem:[#allocation11_spill] sm:$0xff] %v3535_v4  ;;  %v585_v7 = vsub.f32 %v3356_v12, %v3535_v4  ;;  %v3541_v8 = vpop.xlane.xlu0 %548  ;;  %v584_v17 = vsub.f32 %v3359_v13, %v3537_v5 }
  0x98   : > { %5158 = vst [vmem:[#allocation12_spill] sm:$0xff] %v3537_v5  ;;  %v583_v0 = vsub.f32 %v3362_v14, %v3541_v8 }
  0x99   : > { %5159 = vst [vmem:[#allocation13_spill] sm:$0xff] %v3541_v8  ;;  %v3100_v9 = vpop.eup %3099  ;;  %v609_v15 = vmul.f32 1.442695, %v585_v7  ;;  %v607_v27 = vmul.f32 1.442695, %v584_v17 }
  0x9a   : > { %v3102_v11 = vpop.eup %3101  ;;  %v605_v16 = vmul.f32 1.442695, %v583_v0  ;;  %632 = vadd.xlane.f32.xlu0 %v631_v10  ;;  %v634_v21 = vsel %vm528_vm0, %v3100_v9, 0.0 }
  0x9b   : > { %v628_v12 = vsel %vm528_vm0, %v3102_v11, 0.0  ;;  %v3104_v22 = vpop.eup %3103 }
  0x9c   : > { %3107 = vpow2.f32 %v605_v16  ;;  %635 = vadd.xlane.f32.xlu1 %v634_v21  ;;  %629 = vadd.xlane.f32.xlu2 %v628_v12  ;;  %v3106_v29 = vpop.eup %3105  ;;  %v640_v13 = vsel %vm528_vm0, %v3104_v22, 0.0 }
  0x9d   : > { %3109 = vpow2.f32 %v609_v15 }
  0x9e   : > { %v3550_v14 = vpop.xlane.xlu2 %563  ;;  %v3552_v23 = vpop.xlane.xlu1 %560  ;;  %3111 = vpow2.f32 %v607_v27 }
  0x9f   : > { %5160 = vst [vmem:[#allocation14_spill] sm:$0xff] %v3550_v14  ;;  %v588_v28 = vsub.f32 %v3371_v18, %v3550_v14  ;;  %v3556_v31 = vpop.xlane.xlu0 %557  ;;  %v587_v56 = vsub.f32 %v3374_v19, %v3552_v23  ;;  %v637_v18 = vsel %vm528_vm0, %v3106_v29, 0.0  ;;  %v3595_v29 = vld [vmem:[%s3591_s15] sm:$0xff]  ;;  %v3681_v14 = vld [vmem:[%s3591_s15 + $0x70] sm:$0xff] }
  0xa0   : > { %5161 = vst [vmem:[#allocation15_spill] sm:$0xff] %v3552_v23  ;;  %v586_v50 = vsub.f32 %v3377_v20, %v3556_v31  ;;  %v911_v54 = vmul.f32 0.2, %v3681_v14 }
  0xa1   : > { %5162 = vst [vmem:[#allocation16_spill] sm:$0xff] %v3556_v31  ;;  %v615_v52 = vmul.f32 1.442695, %v588_v28  ;;  %v613_v20 = vmul.f32 1.442695, %v587_v56  ;;  %v3601_v56 = vld [vmem:[%s3591_s15 + $0x8] sm:$0xff] }
  0xa2   : > { %v3108_v51 = vpop.eup %3107  ;;  %v611_v53 = vmul.f32 1.442695, %v586_v50  ;;  %641 = vadd.xlane.f32.xlu0 %v640_v13  ;;  %v897_v13 = vmul.f32 0.2, %v3595_v29  ;;  %5168 = vst [vmem:[#allocation22_spill] sm:$0xff] %v3681_v14 }
  0xa3   : > { %v643_v57 = vsel %vm528_vm0, %v3108_v51, 0.0  ;;  %v3110_v59 = vpop.eup %3109 }
  0xa4   : > { %3113 = vpow2.f32 %v611_v53  ;;  %644 = vadd.xlane.f32.xlu1 %v643_v57  ;;  %638 = vadd.xlane.f32.xlu2 %v637_v18  ;;  %v649_v63 = vsel %vm528_vm0, %v3110_v59, 0.0  ;;  %v3112_v1 = vpop.eup %3111  ;;  %v2913_v53 = vclamps-f32 %v897_v13, 20.0  ;;  %v898_v57 = vmul.f32 0.2, %v3601_v56  ;;  %v3605_v18 = vld [vmem:[%s3591_s15 + $0x18] sm:$0xff] }
  0xa5   : > { %3115 = vpow2.f32 %v615_v52  ;;  %v646_v9 = vsel %vm528_vm0, %v3112_v1, 0.0  ;;  %v3609_v1 = vld [vmem:[%s3591_s15 + $0x20] sm:$0xff] }
  0xa6   : > { %v3565_v60 = vpop.xlane.xlu2 %572  ;;  %v3572_v19 = vpop.xlane.xlu1 %569  ;;  %3117 = vpow2.f32 %v613_v20  ;;  %v945_v59 = vmul.f32 1.442695, %v2913_v53  ;;  %v900_v20 = vmul.f32 0.2, %v3605_v18 }
  0xa7   : > { %5163 = vst [vmem:[#allocation17_spill] sm:$0xff] %v3565_v60  ;;  %v591_v61 = vsub.f32 %v3386_v24, %v3565_v60  ;;  %v3569_v62 = vpop.xlane.xlu0 %566  ;;  %v590_v0 = vsub.f32 %v3389_v25, %v3572_v19 }
  0xa8   : > { %5164 = vst [vmem:[#allocation18_spill] sm:$0xff] %v3569_v62  ;;  %v589_v2 = vsub.f32 %v3392_v26, %v3569_v62 }
  0xa9   : > { %5165 = vst [vmem:[#allocation19_spill] sm:$0xff] %v3572_v19  ;;  %v621_v6 = vmul.f32 1.442695, %v591_v61  ;;  %v619_v11 = vmul.f32 1.442695, %v590_v0  ;;  %v2914_v61 = vclamps-f32 %v898_v57, 20.0 }
  0xaa   : > { %v3114_v3 = vpop.eup %3113  ;;  %v617_v7 = vmul.f32 1.442695, %v589_v2  ;;  %650 = vadd.xlane.f32.xlu0 %v649_v63  ;;  %v2916_v63 = vclamps-f32 %v900_v20, 20.0  ;;  %v3612_v2 = vld [vmem:[%s3591_s15 + $0x10] sm:$0xff] }
  0xab   : > { %v652_v24 = vsel %vm528_vm0, %v3114_v3, 0.0  ;;  %v3116_v10 = vpop.eup %3115  ;;  %v947_v3 = vmul.f32 1.442695, %v2914_v61  ;;  %v3617_v0 = vld [vmem:[%s3591_s15 + $0x30] sm:$0xff] }
  0xac   : > { %3119 = vpow2.f32 %v617_v7  ;;  %653 = vadd.xlane.f32.xlu1 %v652_v24  ;;  %647 = vadd.xlane.f32.xlu2 %v646_v9  ;;  %v658_v15 = vsel %vm528_vm0, %v3116_v10, 0.0  ;;  %v3118_v16 = vpop.eup %3117  ;;  %v899_v7 = vmul.f32 0.2, %v3612_v2  ;;  %v951_v24 = vmul.f32 1.442695, %v2916_v63  ;;  %v3645_v61 = vld [vmem:[%s3591_s15 + $0x50] sm:$0xff] }
  0xad   : > { %3121 = vpow2.f32 %v621_v6  ;;  %v655_v22 = vsel %vm528_vm0, %v3118_v16, 0.0  ;;  %v901_v6 = vmul.f32 0.2, %v3609_v1  ;;  %v903_v9 = vmul.f32 0.2, %v3617_v0  ;;  %v3648_v63 = vld [vmem:[%s3591_s15 + $0x40] sm:$0xff] }
  0xae   : > { %3123 = vpow2.f32 %v619_v11 }
  0xaf   : > { %v3580_v26 = vpop.xlane.xlu0 %575  ;;  %v2917_v11 = vclamps-f32 %v901_v6, 20.0  ;;  %v2919_v16 = vclamps-f32 %v903_v9, 20.0  ;;  %v907_v6 = vmul.f32 0.2, %v3645_v61  ;;  %v3653_v9 = vld [vmem:[%s3591_s15 + $0x60] sm:$0xff] }
  0xb0   : > { %5166 = vst [vmem:[#allocation20_spill] sm:$0xff] %v3580_v26  ;;  %v592_v17 = vsub.f32 %v3401_v30, %v3580_v26 }
  0xb1   : > { %v957_v13 = vmul.f32 1.442695, %v2919_v16 }
  0xb2   : > { %v3120_v25 = vpop.eup %3119  ;;  %v623_v21 = vmul.f32 1.442695, %v592_v17  ;;  %659 = vadd.xlane.f32.xlu0 %v658_v15  ;;  %v2915_v15 = vclamps-f32 %v899_v7, 20.0  ;;  %v3622_v17 = vld [vmem:[%s3591_s15 + $0x38] sm:$0xff] }
  0xb3   : > { %v661_v12 = vsel %vm528_vm0, %v3120_v25, 0.0  ;;  %v3122_v27 = vpop.eup %3121  ;;  %v3625_v25 = vld [vmem:[%s3591_s15 + $0x28] sm:$0xff] }
  0xb4   : > { %3125 = vpow2.f32 %v623_v21  ;;  %662 = vadd.xlane.f32.xlu1 %v661_v12  ;;  %656 = vadd.xlane.f32.xlu2 %v655_v22  ;;  %v667_v30 = vsel %vm528_vm0, %v3122_v27, 0.0  ;;  %v3124_v28 = vpop.eup %3123  ;;  %v953_v21 = vmul.f32 1.442695, %v2917_v11  ;;  %v904_v12 = vmul.f32 0.2, %v3622_v17 }
  0xb5   : > { %v664_v52 = vsel %vm528_vm0, %v3124_v28, 0.0  ;;  %3127 = vpow2.f32 %v945_v59  ;;  %v902_v22 = vmul.f32 0.2, %v3625_v25  ;;  %v949_v27 = vmul.f32 1.442695, %v2915_v15  ;;  %v3639_v59 = vpop.permute.xlu2 %817 }
  0xb6   : > { %3129 = vpow2.f32 %v947_v3  ;;  %v2920_v53 = vclamps-f32 %v904_v12, 20.0  ;;  %v909_v15 = vmul.f32 0.2, %v3653_v9  ;;  %v2923_v12 = vclamps-f32 %v907_v6, 20.0 }
  0xb7   : > { %3131 = vpow2.f32 %v951_v24  ;;  %v2918_v57 = vclamps-f32 %v902_v22, 20.0  ;;  %v905_v24 = vmul.f32 0.2, %v3648_v63 }
  0xb8   : > { %3133 = vpow2.f32 %v953_v21  ;;  %v959_v3 = vmul.f32 1.442695, %v2920_v53  ;;  %v965_v53 = vmul.f32 1.442695, %v2923_v12 }
  0xb9   : > { %3135 = vpow2.f32 %v949_v27  ;;  %v955_v7 = vmul.f32 1.442695, %v2918_v57  ;;  %v2921_v22 = vclamps-f32 %v905_v24, 20.0  ;;  %v2925_v27 = vclamps-f32 %v909_v15, 20.0 }
  0xba   : > { %v3126_v50 = vpop.eup %3125  ;;  %668 = vadd.xlane.f32.xlu0 %v667_v30  ;;  %v3630_v30 = vld [vmem:[%s3591_s15 + $0x48] sm:$0xff]  ;;  %3137 = vpow2.f32 %v957_v13  ;;  %v3663_v13 = vld [vmem:[%s3591_s15 + $0x78] sm:$0xff] }
  0xbb   : > { %v670_v51 = vsel %vm528_vm0, %v3126_v50, 0.0  ;;  %v3128_v10 = vpop.eup %3127  ;;  %v906_v50 = vmul.f32 0.2, %v3630_v30  ;;  %3139 = vpow2.f32 %v959_v3  ;;  %v969_v24 = vmul.f32 1.442695, %v2925_v27 }
  0xbc   : > { %671 = vadd.xlane.f32.xlu1 %v670_v51  ;;  %665 = vadd.xlane.f32.xlu2 %v664_v52  ;;  %v3130_v28 = vpop.eup %3129  ;;  %v3636_v51 = vld [vmem:[%s5113_s3 + $0x78] sm:$0xff]  ;;  %3141 = vpow2.f32 %v955_v7 }
  0xbd   : > { %v3132_v52 = vpop.eup %3131  ;;  %v2922_v20 = vclamps-f32 %v906_v50, 20.0  ;;  %v3665_v50 = vpop.permute.xlu2 %823 }
  0xbf   : > { %v963_v11 = vmul.f32 1.442695, %v2922_v20  ;;  %v961_v20 = vmul.f32 1.442695, %v2921_v22  ;;  %v3678_v22 = vpop.permute.xlu1 %821 }
  0xc1   : > { %3143 = vpow2.f32 %v963_v11 }
  0xc2   : > { %v3671_v3 = vpop.permute.xlu0 %819  ;;  %3145 = vpow2.f32 %v965_v53 }
  0xc3   : > { %3147 = vpow2.f32 %v961_v20 }
  0xc4   : > { %3149 = vpow2.f32 %v969_v24 }
  0xce   : > { %993 = vrot.lane.b32.xlu0 %v3128_v10, %s3239_s16  ;;  %v3134_v10 = vpop.eup %3133 }
  0xcf   : > { %v3136_v16 = vpop.eup %3135 }
  0xd0   : > { %v3138_v21 = vpop.eup %3137 }
  0xd1   : > { %v3140_v7 = vpop.eup %3139 }
  0xd2   : > { %v3142_v11 = vpop.eup %3141 }
  0xd3   : > { %v3144_v15 = vpop.eup %3143 }
  0xd4   : > { %995 = vrot.lane.b32.xlu2 %v3130_v28, %s3239_s16  ;;  %v3660_v28 = vld [vmem:[%s3591_s15 + $0x68] sm:$0xff]  ;;  %v3146_v53 = vpop.eup %3145 }
  0xd5   : > { %847 = vrot.lane.b32.xlu1 %v3636_v51, %s3238_s17  ;;  %v910_v57 = vmul.f32 0.2, %v3660_v28  ;;  %s3240_s17 = smov 124  }
  0xd6   : > { %999 = vrot.lane.b32.xlu0 %v3132_v52, %s3239_s16  ;;  %v3668_v52 = vld [vmem:[%s3591_s15 + $0x58] sm:$0xff] }
  0xd7   : > { %5167 = vst [vmem:[#allocation21_spill] sm:$0xff] %v3668_v52  ;;  %v908_v6 = vmul.f32 0.2, %v3668_v52 }
  0xdc   : > { %1001 = vrot.lane.b32.xlu2 %v3134_v10, %s3239_s16  ;;  %v912_v10 = vmul.f32 0.2, %v3663_v13 }
  0xdd   : > { %997 = vrot.lane.b32.xlu1 %v3136_v16, %s3239_s16  ;;  %v2926_v16 = vclamps-f32 %v910_v57, 20.0  ;;  %v3684_v57 = vpop.permute.xlu2 %827 }
  0xde   : > { %1005 = vrot.lane.b32.xlu0 %v3138_v21, %s3239_s16  ;;  %v2924_v21 = vclamps-f32 %v908_v6, 20.0  ;;  %v2928_v12 = vclamps-f32 %v912_v10, 20.0  ;;  %v3148_v6 = vpop.eup %3147  ;;  %v2927_v10 = vclamps-f32 %v911_v54, 20.0 }
  0xdf   : > { %v971_v27 = vmul.f32 1.442695, %v2926_v16  ;;  %v3150_v24 = vpop.eup %3149  ;;  %v3691_v16 = vpop.permute.xlu1 %829 }
  0xe0   : > { %v967_v23 = vmul.f32 1.442695, %v2924_v21  ;;  %v975_v20 = vmul.f32 1.442695, %v2928_v12 }
  0xe1   : > { %3151 = vpow2.f32 %v971_v27 }
  0xe2   : > { %3153 = vpow2.f32 %v967_v23 }
  0xe3   : > { %3155 = vpow2.f32 %v975_v20 }
  0xe4   : > { %1007 = vrot.lane.b32.xlu2 %v3140_v7, %s3239_s16  ;;  %v3686_v7 = vpop.permute.xlu0 %825 }
  0xe5   : > { %1003 = vrot.lane.b32.xlu1 %v3142_v11, %s3239_s16  ;;  %v973_v11 = vmul.f32 1.442695, %v2927_v10  ;;  %v3693_v47 = vpop.permute.xlu2 %833 }
  0xe6   : > { %1011 = vrot.lane.b32.xlu0 %v3144_v15, %s3239_s16 }
  0xe7   : > { %v3152_v15 = vpop.eup %3151  ;;  %3157 = vpow2.f32 %v973_v11  ;;  %v3700_v23 = vpop.permute.xlu1 %835 }
  0xe8   : > { %v3154_v21 = vpop.eup %3153 }
  0xe9   : > { %v3156_v12 = vpop.eup %3155 }
  0xec   : > { %1013 = vrot.lane.b32.xlu2 %v3146_v53, %s3239_s16  ;;  %v3695_v60 = vpop.permute.xlu0 %831 }
  0xed   : > { %1009 = vrot.lane.b32.xlu1 %v3148_v6, %s3239_s16  ;;  %v3158_v54 = vpop.eup %3157  ;;  %v3702_v27 = vpop.permute.xlu2 %839 }
  0xee   : > { %1017 = vrot.lane.b32.xlu0 %v3150_v24, %s3239_s16  ;;  %5169 = vst [vmem:[#allocation23_spill] sm:$0xff] %v3702_v27 }
  0xef   : > { %v3707_v20 = vpop.permute.xlu1 %841 }
  0xf4   : > { %1019 = vrot.lane.b32.xlu2 %v3152_v15, %s3239_s16  ;;  %v3705_v53 = vpop.permute.xlu0 %837 }
  0xf5   : > { %1015 = vrot.lane.b32.xlu1 %v3154_v21, %s3239_s16  ;;  %v3709_v6 = vpop.permute.xlu2 %845 }
  0xf6   : > { %1023 = vrot.lane.b32.xlu0 %v3156_v12, %s3239_s16  ;;  %5170 = vst [vmem:[#allocation24_spill] sm:$0xff] %v3709_v6 }
  0xfc   : > { %v3711_v24 = vpop.permute.xlu0 %843 }
  0xfd   : > { %1021 = vrot.lane.b32.xlu1 %v3158_v54, %s3239_s16 }
 0x107   : > { %v3713_v10 = vpop.xlane.xlu1 %626 }
 0x108   : > { %5171 = vst [vmem:[#allocation25_spill] sm:$0xff] %v3713_v10 }
 0x10d   : > { %v3717_v15 = vpop.xlane.xlu0 %632 }
 0x10e   : > { %5173 = vst [vmem:[#allocation27_spill] sm:$0xff] %v3717_v15 }
 0x10f   : > { %v3715_v11 = vpop.xlane.xlu2 %629  ;;  %v3719_v21 = vpop.xlane.xlu1 %635 }
 0x110   : > { %5172 = vst [vmem:[#allocation26_spill] sm:$0xff] %v3715_v11 }
 0x111   : > { %5174 = vst [vmem:[#allocation28_spill] sm:$0xff] %v3719_v21 }
 0x115   : > { %v3723_v26 = vpop.xlane.xlu0 %641 }
 0x116   : > { %5176 = vst [vmem:[#allocation30_spill] sm:$0xff] %v3723_v26 }
 0x117   : > { %v3721_v12 = vpop.xlane.xlu2 %638  ;;  %v3727_v4 = vpop.xlane.xlu1 %644 }
 0x118   : > { %5175 = vst [vmem:[#allocation29_spill] sm:$0xff] %v3721_v12 }
 0x119   : > { %5178 = vst [vmem:[#allocation32_spill] sm:$0xff] %v3727_v4 }
 0x11d   : > { %v3729_v31 = vpop.xlane.xlu0 %650 }
 0x11e   : > { %5179 = vst [vmem:[#allocation33_spill] sm:$0xff] %v3729_v31 }
 0x11f   : > { %v3725_v54 = vpop.xlane.xlu2 %647  ;;  %v3733_v19 = vpop.xlane.xlu1 %653 }
 0x120   : > { %5177 = vst [vmem:[#allocation31_spill] sm:$0xff] %v3725_v54 }
 0x121   : > { %5181 = vst [vmem:[#allocation35_spill] sm:$0xff] %v3733_v19 }
 0x125   : > { %v3735_v48 = vpop.xlane.xlu0 %659 }
 0x126   : > { %5182 = vst [vmem:[#allocation36_spill] sm:$0xff] %v3735_v48 }
 0x127   : > { %v3731_v62 = vpop.xlane.xlu2 %656  ;;  %v3739_v15 = vpop.xlane.xlu1 %662 }
 0x128   : > { %5180 = vst [vmem:[#allocation34_spill] sm:$0xff] %v3731_v62 }
 0x129   : > { %5184 = vst [vmem:[#allocation38_spill] sm:$0xff] %v3739_v15 }
 0x12d   : > { %v3741_v12 = vpop.xlane.xlu0 %668 }
 0x12e   : > { %5185 = vst [vmem:[#allocation39_spill] sm:$0xff] %v3741_v12 }
 0x12f   : > { %v3737_v55 = vpop.xlane.xlu2 %665  ;;  %v3748_v62 = vpop.xlane.xlu1 %671 }
 0x130   : > { %5183 = vst [vmem:[#allocation37_spill] sm:$0xff] %v3737_v55 }
 0x131   : > { %5186 = vst [vmem:[#allocation40_spill] sm:$0xff] %v3748_v62 }
 0x137   : > { %v996_v21 = vpop.permute.xlu2 %995 }
 0x138   : > { %v3744_v26 = vmul.f32 %v996_v21, %v3422_v34 }
 0x13a   : > { %v1058_v8 = vmul.f32 0.5, %v3744_v26 }
 0x13c   : > { %1091 = vrot.lane.b32.xlu1 %v1058_v8, %s3240_s17 }
 0x13f   : > { %v1002_v31 = vpop.permute.xlu2 %1001 }
 0x140   : > { %v3751_v48 = vmul.f32 %v1002_v31, %v3443_v37  ;;  %v994_v19 = vpop.permute.xlu0 %993 }
 0x141   : > { %v3754_v15 = vmul.f32 %v994_v19, %v3408_v32 }
 0x142   : > { %v1061_v12 = vmul.f32 0.5, %v3751_v48 }
 0x143   : > { %v1057_v21 = vmul.f32 0.5, %v3754_v15 }
 0x144   : > { %1097 = vrot.lane.b32.xlu1 %v1061_v12, %s3240_s17 }
 0x145   : > { %1089 = vrot.lane.b32.xlu2 %v1057_v21, %s3240_s17 }
 0x147   : > { %v3760_v55 = vpop.permute.xlu1 %847  ;;  %v1008_v8 = vpop.permute.xlu2 %1007 }
 0x148   : > { %v3763_v62 = vmul.f32 %v1008_v8, %v3464_v40  ;;  %v1000_v31 = vpop.permute.xlu0 %999 }
 0x149   : > { %v3766_v4 = vmul.f32 %v1000_v31, %v3427_v35 }
 0x14a   : > { %v1064_v19 = vmul.f32 0.5, %v3763_v62 }
 0x14b   : > { %v1060_v5 = vmul.f32 0.5, %v3766_v4 }
 0x14c   : > { %1103 = vrot.lane.b32.xlu1 %v1064_v19, %s3240_s17 }
 0x14d   : > { %1095 = vrot.lane.b32.xlu2 %v1060_v5, %s3240_s17 }
 0x14f   : > { %v998_v12 = vpop.permute.xlu1 %997  ;;  %v1014_v21 = vpop.permute.xlu2 %1013 }
 0x150   : > { %v3773_v54 = vmul.f32 %v998_v12, %v3413_v33  ;;  %v3776_v8 = vmul.f32 %v1014_v21, %v3485_v43  ;;  %v1006_v49 = vpop.permute.xlu0 %1005 }
 0x151   : > { %v3779_v31 = vmul.f32 %v1006_v49, %v3434_v36 }
 0x152   : > { %v1059_v10 = vmul.f32 0.5, %v3773_v54  ;;  %v1067_v58 = vmul.f32 0.5, %v3776_v8 }
 0x153   : > { %v1063_v19 = vmul.f32 0.5, %v3779_v31 }
 0x154   : > { %1093 = vrot.lane.b32.xlu0 %v1059_v10, %s3240_s17  ;;  %1109 = vrot.lane.b32.xlu1 %v1067_v58, %s3240_s17 }
 0x155   : > { %1101 = vrot.lane.b32.xlu2 %v1063_v19, %s3240_s17 }
 0x157   : > { %v1004_v5 = vpop.permute.xlu1 %1003  ;;  %v1020_v12 = vpop.permute.xlu2 %1019 }
 0x158   : > { %v3788_v21 = vmul.f32 %v1004_v5, %v3448_v38  ;;  %v3791_v49 = vmul.f32 %v1020_v12, %v3499_v45  ;;  %v1012_v11 = vpop.permute.xlu0 %1011 }
 0x159   : > { %v3794_v6 = vmul.f32 %v1012_v11, %v3455_v39 }
 0x15a   : > { %v1062_v14 = vmul.f32 0.5, %v3788_v21  ;;  %v1070_v10 = vmul.f32 0.5, %v3791_v49 }
 0x15b   : > { %v1066_v58 = vmul.f32 0.5, %v3794_v6 }
 0x15c   : > { %1099 = vrot.lane.b32.xlu0 %v1062_v14, %s3240_s17  ;;  %1115 = vrot.lane.b32.xlu1 %v1070_v10, %s3240_s17 }
 0x15d   : > { %1107 = vrot.lane.b32.xlu2 %v1066_v58, %s3240_s17 }
 0x15f   : > { %v1010_v19 = vpop.permute.xlu1 %1009 }
 0x160   : > { %v3803_v5 = vmul.f32 %v1010_v19, %v3469_v41  ;;  %v1018_v12 = vpop.permute.xlu0 %1017 }
 0x161   : > { %v3806_v11 = vmul.f32 %v1018_v12, %v3476_v42 }
 0x162   : > { %v1065_v27 = vmul.f32 0.5, %v3803_v5 }
 0x163   : > { %v1069_v52 = vmul.f32 0.5, %v3806_v11 }
 0x164   : > { %1105 = vrot.lane.b32.xlu0 %v1065_v27, %s3240_s17  ;;  %1203 = vrot.lane.b32.xlu1 %v3754_v15, %s3240_s17 }
 0x165   : > { %1113 = vrot.lane.b32.xlu2 %v1069_v52, %s3240_s17 }
 0x167   : > { %v1016_v14 = vpop.permute.xlu1 %1015 }
 0x168   : > { %v3815_v10 = vmul.f32 %v1016_v14, %v3490_v44  ;;  %v1024_v58 = vpop.permute.xlu0 %1023 }
 0x169   : > { %v3818_v19 = vmul.f32 %v1024_v58, %v3636_v51  ;;  %v865_v58 = vmul.f32 %v3639_v59, %v3595_v29 }
 0x16a   : > { %v1068_v12 = vmul.f32 0.5, %v3815_v10 }
 0x16b   : > { %5187 = vst [vmem:[#allocation41_spill] sm:$0xff] %v3818_v19  ;;  %v1072_v41 = vmul.f32 0.5, %v3818_v19 }
 0x16c   : > { %1111 = vrot.lane.b32.xlu0 %v1068_v12, %s3240_s17  ;;  %1209 = vrot.lane.b32.xlu1 %v3766_v4, %s3240_s17  ;;  %v881_v12 = vadd.f32 %v865_v58, %v3408_v32  ;;  %v866_v32 = vmul.f32 %v3671_v3, %v3601_v56  ;;  %v871_v58 = vmul.f32 %v3691_v16, %v3617_v0 }
 0x16d   : > { %1119 = vrot.lane.b32.xlu2 %v1072_v41, %s3240_s17  ;;  %v5138_v41 = vmov 0.0   ;;  %v869_v56 = vmul.f32 %v3686_v7, %v3609_v1  ;;  %v874_v0 = vmul.f32 %v3700_v23, %v3630_v30  ;;  %v872_v30 = vmul.f32 %v3695_v60, %v3622_v17 }
 0x16e   : > { %1527 = vst.msk [vmem:[#allocation3] sm:$0xff] %vm1153_vm1, %v5138_v41  ;;  %v877_v23 = vmul.f32 %v3707_v20, %v3653_v9  ;;  %v867_v9 = vmul.f32 %v3678_v22, %v3612_v2  ;;  %v875_v20 = vmul.f32 %v3705_v53, %v3645_v61 }
 0x16f   : > { %v1022_v52 = vpop.permute.xlu1 %1021  ;;  %1528 = vst.msk [vmem:[#allocation3 + $0x8] sm:$0xff] %vm1153_vm1, %v5138_v41  ;;  %v890_v1 = vadd.f32 %v874_v0, %v3455_v39 }
 0x170   : > { %v3827_v27 = vmul.f32 %v1022_v52, %v3504_v46  ;;  %1529 = vst.msk [vmem:[#allocation3 + $0x10] sm:$0xff] %vm1153_vm1, %v5138_v41  ;;  %v893_v60 = vadd.f32 %v877_v23, %v3476_v42  ;;  %v883_v42 = vadd.f32 %v867_v9, %v3413_v33  ;;  %v891_v2 = vadd.f32 %v875_v20, %v3485_v43  ;;  %v5191_v20 = vld [vmem:[#allocation22_spill] sm:$0xff] }
 0x171   : > { %1530 = vst.msk [vmem:[#allocation3 + $0x18] sm:$0xff] %vm1153_vm1, %v5138_v41 }
 0x172   : > { %v1071_v14 = vmul.f32 0.5, %v3827_v27  ;;  %1531 = vst.msk [vmem:[#allocation3 + $0x20] sm:$0xff] %vm1153_vm1, %v5138_v41 }
 0x173   : > { %1532 = vst.msk [vmem:[#allocation3 + $0x28] sm:$0xff] %vm1153_vm1, %v5138_v41 }
 0x174   : > { %1117 = vrot.lane.b32.xlu0 %v1071_v14, %s3240_s17  ;;  %1215 = vrot.lane.b32.xlu1 %v3779_v31, %s3240_s17  ;;  %1533 = vst.msk [vmem:[#allocation3 + $0x30] sm:$0xff] %vm1153_vm1, %v5138_v41 }
 0x175   : > { %1207 = vrot.lane.b32.xlu2 %v3773_v54, %s3240_s17  ;;  %1534 = vst.msk [vmem:[#allocation3 + $0x38] sm:$0xff] %vm1153_vm1, %v5138_v41 }
 0x176   : > { %1535 = vst.msk [vmem:[#allocation3 + $0x40] sm:$0xff] %vm1153_vm1, %v5138_v41 }
 0x177   : > { %1536 = vst.msk [vmem:[#allocation3 + $0x48] sm:$0xff] %vm1153_vm1, %v5138_v41 }
 0x178   : > { %1537 = vst.msk [vmem:[#allocation3 + $0x50] sm:$0xff] %vm1153_vm1, %v5138_v41 }
 0x179   : > { %1538 = vst.msk [vmem:[#allocation3 + $0x58] sm:$0xff] %vm1153_vm1, %v5138_v41 }
 0x17a   : > { %1539 = vst.msk [vmem:[#allocation3 + $0x60] sm:$0xff] %vm1153_vm1, %v5138_v41 }
 0x17b   : > { %1540 = vst.msk [vmem:[#allocation3 + $0x68] sm:$0xff] %vm1153_vm1, %v5138_v41 }
 0x17c   : > { %1205 = vrot.lane.b32.xlu0 %v3744_v26, %s3240_s17  ;;  %1221 = vrot.lane.b32.xlu1 %v3794_v6, %s3240_s17  ;;  %1541 = vst.msk [vmem:[#allocation3 + $0x70] sm:$0xff] %vm1153_vm1, %v5138_v41 }
 0x17d   : > { %1213 = vrot.lane.b32.xlu2 %v3788_v21, %s3240_s17  ;;  %1542 = vst.msk [vmem:[#allocation3 + $0x78] sm:$0xff] %vm1153_vm1, %v5138_v41  ;;  %v868_v41 = vmul.f32 %v3665_v50, %v3605_v18  ;;  %v882_v18 = vadd.f32 %v866_v32, %v3422_v34  ;;  %v885_v34 = vadd.f32 %v869_v56, %v3443_v37 }
 0x17e   : > { %v888_v37 = vadd.f32 %v872_v30, %v3464_v40  ;;  %v880_v40 = vmul.f32 %v3760_v55, %v3663_v13 }
 0x17f   : > { %v884_v29 = vadd.f32 %v868_v41, %v3427_v35  ;;  %v887_v35 = vadd.f32 %v871_v58, %v3434_v36 }
 0x180   : > { %v896_v53 = vadd.f32 %v880_v40, %v3636_v51  ;;  %v5192_v40 = vld [vmem:[#allocation24_spill] sm:$0xff] }
 0x184   : > { %1211 = vrot.lane.b32.xlu0 %v3751_v48, %s3240_s17  ;;  %1227 = vrot.lane.b32.xlu1 %v3806_v11, %s3240_s17 }
 0x185   : > { %1219 = vrot.lane.b32.xlu2 %v3803_v5, %s3240_s17 }
 0x18c   : > { %1217 = vrot.lane.b32.xlu0 %v3763_v62, %s3240_s17  ;;  %1233 = vrot.lane.b32.xlu1 %v3818_v19, %s3240_s17 }
 0x18d   : > { %1225 = vrot.lane.b32.xlu2 %v3815_v10, %s3240_s17 }
 0x194   : > { %1223 = vrot.lane.b32.xlu0 %v3776_v8, %s3240_s17 }
 0x195   : > { %1231 = vrot.lane.b32.xlu2 %v3827_v27, %s3240_s17 }
 0x19c   : > { %1229 = vrot.lane.b32.xlu0 %v3791_v49, %s3240_s17  ;;  %s479_s17 = scalar_lea.vmem %s5118_s8, %s5265_s27 }
 0x19f   : > { %v1090_v52 = vpop.permute.xlu2 %1089 }
 0x1a0   : > { %v3894_v14 = vsub.f32 %v881_v12, %v1090_v52 }
 0x1a2   : > { %1154 = vst.msk [vmem:[#allocation2] sm:$0xff] %vm1153_vm1, %v3894_v14 }
 0x1a3   : > { %1171 = vst.msk [vmem:[#allocation2] sm:$0xff] %vm1170_vm2, %v3894_v14 }
 0x1a7   : > { %v1096_v59 = vpop.permute.xlu2 %1095 }
 0x1a8   : > { %v3903_v19 = vsub.f32 %v884_v29, %v1096_v59 }
 0x1aa   : > { %1157 = vst.msk [vmem:[#allocation2 + $0x18] sm:$0xff] %vm1153_vm1, %v3903_v19 }
 0x1ab   : > { %1174 = vst.msk [vmem:[#allocation2 + $0x18] sm:$0xff] %vm1170_vm2, %v3903_v19 }
 0x1ae   : > { %v1092_v50 = vpop.permute.xlu1 %1091 }
 0x1af   : > { %v3915_v41 = vsub.f32 %v882_v18, %v1092_v50  ;;  %v1102_v12 = vpop.permute.xlu2 %1101  ;;  %v870_v18 = vmul.f32 %v3684_v57, %v3625_v25  ;;  %v878_v50 = vmul.f32 %v3711_v24, %v3660_v28 }
 0x1b0   : > { %v3917_v52 = vsub.f32 %v887_v35, %v1102_v12  ;;  %v873_v12 = vmul.f32 %v3693_v47, %v3648_v63 }
 0x1b1   : > { %1155 = vst.msk [vmem:[#allocation2 + $0x8] sm:$0xff] %vm1153_vm1, %v3915_v41  ;;  %v886_v33 = vadd.f32 %v870_v18, %v3448_v38  ;;  %v894_v43 = vadd.f32 %v878_v50, %v3499_v45  ;;  %v5188_v38 = vld [vmem:[#allocation4_spill] sm:$0xff] }
 0x1b2   : > { %1160 = vst.msk [vmem:[#allocation2 + $0x30] sm:$0xff] %vm1153_vm1, %v3917_v52  ;;  %v889_v45 = vadd.f32 %v873_v12, %v5188_v38  ;;  %v5193_v12 = vld [vmem:[#allocation26_spill] sm:$0xff] }
 0x1b3   : > { %1172 = vst.msk [vmem:[#allocation2 + $0x8] sm:$0xff] %vm1170_vm2, %v3915_v41  ;;  %vm674_vm3 = vcmp.lt.f32.partialorder %v5193_v12, 2.0  ;;  %v5194_v38 = vld [vmem:[#allocation10_spill] sm:$0xff]  ;;  %v5215_v12 = vld [vmem:[#allocation11_spill] sm:$0xff] }
 0x1b4   : > { %1177 = vst.msk [vmem:[#allocation2 + $0x30] sm:$0xff] %vm1170_vm2, %v3917_v52 }
 0x1b6   : > { %v1098_v36 = vpop.permute.xlu1 %1097 }
 0x1b7   : > { %v3933_v3 = vsub.f32 %v885_v34, %v1098_v36  ;;  %v1108_v7 = vpop.permute.xlu2 %1107 }
 0x1b8   : > { %v3935_v16 = vsub.f32 %v890_v1, %v1108_v7  ;;  %v5189_v1 = vld [vmem:[#allocation21_spill] sm:$0xff]  ;;  %v5190_v7 = vld [vmem:[#allocation23_spill] sm:$0xff] }
 0x1b9   : > { %1158 = vst.msk [vmem:[#allocation2 + $0x20] sm:$0xff] %vm1153_vm1, %v3933_v3  ;;  %v876_v30 = vmul.f32 %v5190_v7, %v5189_v1  ;;  %v3195_v7 = vld [vmem:[%s3323_s12 + $0x38] sm:$0xff] }
 0x1ba   : > { %1163 = vst.msk [vmem:[#allocation2 + $0x48] sm:$0xff] %vm1153_vm1, %v3935_v16 }
 0x1bb   : > { %1175 = vst.msk [vmem:[#allocation2 + $0x20] sm:$0xff] %vm1170_vm2, %v3933_v3  ;;  %v892_v23 = vadd.f32 %v876_v30, %v3490_v44  ;;  %v5199_v30 = vld [vmem:[#allocation12_spill] sm:$0xff] }
 0x1bc   : > { %1180 = vst.msk [vmem:[#allocation2 + $0x48] sm:$0xff] %vm1170_vm2, %v3935_v16  ;;  %vm696_vm14 = vcmp.lt.f32.partialorder %v3195_v7, %v5199_v30  ;;  %v5218_v7 = vld [vmem:[#allocation39_spill] sm:$0xff] }
 0x1be   : > { %v1104_v39 = vpop.permute.xlu1 %1103 }
 0x1bf   : > { %v3951_v17 = vsub.f32 %v888_v37, %v1104_v39  ;;  %v1114_v29 = vpop.permute.xlu2 %1113 }
 0x1c0   : > { %v3953_v59 = vsub.f32 %v893_v60, %v1114_v29 }
 0x1c1   : > { %1161 = vst.msk [vmem:[#allocation2 + $0x38] sm:$0xff] %vm1153_vm1, %v3951_v17 }
 0x1c2   : > { %1166 = vst.msk [vmem:[#allocation2 + $0x60] sm:$0xff] %vm1153_vm1, %v3953_v59 }
 0x1c3   : > { %1178 = vst.msk [vmem:[#allocation2 + $0x38] sm:$0xff] %vm1170_vm2, %v3951_v17 }
 0x1c4   : > { %1183 = vst.msk [vmem:[#allocation2 + $0x60] sm:$0xff] %vm1170_vm2, %v3953_v59 }
 0x1c6   : > { %v1094_v61 = vpop.permute.xlu0 %1093  ;;  %v1110_v22 = vpop.permute.xlu1 %1109 }
 0x1c7   : > { %v1139_v32 = vsub.f32 %v883_v42, %v1094_v61  ;;  %v3972_v58 = vsub.f32 %v891_v2, %v1110_v22  ;;  %v1120_v55 = vpop.permute.xlu2 %1119  ;;  %v879_v42 = vmul.f32 %v5192_v40, %v5191_v20  ;;  %v5202_v20 = vld [vmem:[#allocation28_spill] sm:$0xff]  ;;  %v5203_v40 = vld [vmem:[#allocation27_spill] sm:$0xff] }
 0x1c8   : > { %v3974_v13 = vsub.f32 %v896_v53, %v1120_v55 }
 0x1c9   : > { %1156 = vst.msk [vmem:[#allocation2 + $0x10] sm:$0xff] %vm1153_vm1, %v1139_v32  ;;  %v895_v44 = vadd.f32 %v879_v42, %v3504_v46  ;;  %v3197_v42 = vld [vmem:[%s3323_s12 + $0x18] sm:$0xff] }
 0x1ca   : > { %1164 = vst.msk [vmem:[#allocation2 + $0x50] sm:$0xff] %vm1153_vm1, %v3972_v58 }
 0x1cb   : > { %1169 = vst.msk [vmem:[#allocation2 + $0x78] sm:$0xff] %vm1153_vm1, %v3974_v13 }
 0x1cc   : > { %1173 = vst.msk [vmem:[#allocation2 + $0x10] sm:$0xff] %vm1170_vm2, %v1139_v32 }
 0x1cd   : > { %1181 = vst.msk [vmem:[#allocation2 + $0x50] sm:$0xff] %vm1170_vm2, %v3972_v58 }
 0x1ce   : > { %v1100_v25 = vpop.permute.xlu0 %1099  ;;  %v1116_v51 = vpop.permute.xlu1 %1115  ;;  %1186 = vst.msk [vmem:[#allocation2 + $0x78] sm:$0xff] %vm1170_vm2, %v3974_v13 }
 0x1cf   : > { %v1142_v28 = vsub.f32 %v886_v33, %v1100_v25  ;;  %v3992_v57 = vsub.f32 %v894_v43, %v1116_v51  ;;  %v1208_v24 = vpop.permute.xlu2 %1207 }
 0x1d0   : > { %v1253_v35 = vadd.f32 %v1208_v24, %v1139_v32 }
 0x1d1   : > { %1159 = vst.msk [vmem:[#allocation2 + $0x28] sm:$0xff] %vm1153_vm1, %v1142_v28 }
 0x1d2   : > { %1167 = vst.msk [vmem:[#allocation2 + $0x68] sm:$0xff] %vm1153_vm1, %v3992_v57  ;;  %1287 = vrot.lane.b32.xlu1 %v1253_v35, %s3239_s16 }
 0x1d3   : > { %1176 = vst.msk [vmem:[#allocation2 + $0x28] sm:$0xff] %vm1170_vm2, %v1142_v28 }
 0x1d4   : > { %1184 = vst.msk [vmem:[#allocation2 + $0x68] sm:$0xff] %vm1170_vm2, %v3992_v57 }
 0x1d6   : > { %v1106_v56 = vpop.permute.xlu0 %1105  ;;  %v1204_v0 = vpop.permute.xlu1 %1203 }
 0x1d7   : > { %v1145_v34 = vsub.f32 %v889_v45, %v1106_v56  ;;  %v1251_v36 = vadd.f32 %v1204_v0, %v3894_v14  ;;  %v1214_v47 = vpop.permute.xlu2 %1213  ;;  %v705_v45 = vld [vmem:[%s4058_s23] sm:$0xff]  ;;  %v5195_v56 = vld [vmem:[#allocation25_spill] sm:$0xff] }
 0x1d8   : > { %v1256_v63 = vadd.f32 %v1214_v47, %v1142_v28  ;;  %vm673_vm5 = vcmp.lt.f32.partialorder %v5195_v56, 2.0  ;;  %v3194_v0 = vld [vmem:[%s3323_s12] sm:$0xff]  ;;  %vm721_vm9 = vcmp.gt.f32.partialorder %v705_v45, 0.0  ;;  %v5197_v47 = vld [vmem:[#allocation31_spill] sm:$0xff] }
 0x1d9   : > { %1162 = vst.msk [vmem:[#allocation2 + $0x40] sm:$0xff] %vm1153_vm1, %v1145_v34  ;;  %1283 = vrot.lane.b32.xlu0 %v1251_v36, %s3239_s16  ;;  %v712_v36 = vld [vmem:[%s4058_s23 + $0x38] sm:$0xff]  ;;  %vm680_vm13 = vcmp.lt.f32.partialorder %v5197_v47, 2.0  ;;  %v5217_v47 = vld [vmem:[#allocation20_spill] sm:$0xff] }
 0x1da   : > { %1293 = vrot.lane.b32.xlu1 %v1256_v63, %s3239_s16  ;;  %1179 = vst.msk [vmem:[#allocation2 + $0x40] sm:$0xff] %vm1170_vm2, %v1145_v34  ;;  %v5198_v63 = vmov 0.0   ;;  %vm728_vm0 = vcmp.gt.f32.partialorder %v712_v36, 0.0  ;;  %v720_v56 = vld [vmem:[%s4058_s23 + $0x78] sm:$0xff] }
 0x1db   : > { %v3203_v36 = vld [vmem:[%s3323_s12 + $0x78] sm:$0xff] }
 0x1de   : > { %v1112_v37 = vpop.permute.xlu0 %1111  ;;  %v1210_v39 = vpop.permute.xlu1 %1209 }
 0x1df   : > { %v1148_v60 = vsub.f32 %v892_v23, %v1112_v37  ;;  %v1254_v14 = vadd.f32 %v1210_v39, %v3903_v19  ;;  %v1220_v29 = vpop.permute.xlu2 %1219  ;;  %v711_v23 = vld [vmem:[%s4058_s23 + $0x30] sm:$0xff]  ;;  %v5200_v37 = vld [vmem:[#allocation32_spill] sm:$0xff] }
 0x1e0   : > { %v1259_v9 = vadd.f32 %v1220_v29, %v1145_v34  ;;  %v5196_v34 = vld [vmem:[#allocation7_spill] sm:$0xff]  ;;  %vm679_vm15 = vcmp.lt.f32.partialorder %v5200_v37, 2.0  ;;  %v5219_v37 = vld [vmem:[#allocation17_spill] sm:$0xff] }
 0x1e1   : > { %1165 = vst.msk [vmem:[#allocation2 + $0x58] sm:$0xff] %vm1153_vm1, %v1148_v60  ;;  %1289 = vrot.lane.b32.xlu0 %v1254_v14, %s3239_s16  ;;  %vm689_vm8 = vcmp.lt.f32.partialorder %v3194_v0, %v5196_v34  ;;  %v5201_v14 = vld [vmem:[#allocation13_spill] sm:$0xff]  ;;  %v5216_v0 = vld [vmem:[#allocation40_spill] sm:$0xff] }
 0x1e2   : > { %1299 = vrot.lane.b32.xlu1 %v1259_v9, %s3239_s16  ;;  %1182 = vst.msk [vmem:[#allocation2 + $0x58] sm:$0xff] %vm1170_vm2, %v1148_v60  ;;  %vm737_vm10 = vmand %vm673_vm5, %vm689_vm8  ;;  %v708_v9 = vld [vmem:[%s4058_s23 + $0x18] sm:$0xff]  ;;  %vm675_vm8 = vcmp.lt.f32.partialorder %v5203_v40, 2.0  ;;  %v710_v40 = vld [vmem:[%s4058_s23 + $0x28] sm:$0xff] }
 0x1e3   : > { %vm753_vm12 = vmand %vm737_vm10, %vm721_vm9 }
 0x1e4   : > { %v2897_v39 = vsel %vm753_vm12, 1.0, %v5198_v63 }
 0x1e6   : > { %v1118_v2 = vpop.permute.xlu0 %1117  ;;  %v1216_v61 = vpop.permute.xlu1 %1215 }
 0x1e7   : > { %v1151_v22 = vsub.f32 %v895_v44, %v1118_v2  ;;  %v1257_v19 = vadd.f32 %v1216_v61, %v3917_v52  ;;  %v1226_v53 = vpop.permute.xlu2 %1225  ;;  %v5204_v44 = vld [vmem:[#allocation9_spill] sm:$0xff] }
 0x1e8   : > { %v1262_v32 = vadd.f32 %v1226_v53, %v1148_v60  ;;  %v3196_v60 = vld [vmem:[%s3323_s12 + $0x30] sm:$0xff]  ;;  %vm692_vm9 = vcmp.lt.f32.partialorder %v3197_v42, %v5204_v44  ;;  %v718_v2 = vld [vmem:[%s4058_s23 + $0x68] sm:$0xff] }
 0x1e9   : > { %1168 = vst.msk [vmem:[#allocation2 + $0x70] sm:$0xff] %vm1153_vm1, %v1151_v22  ;;  %1295 = vrot.lane.b32.xlu0 %v1257_v19, %s3239_s16  ;;  %v5205_v61 = vld [vmem:[#allocation37_spill] sm:$0xff]  ;;  %v5206_v19 = vld [vmem:[#allocation6_spill] sm:$0xff] }
 0x1ea   : > { %1305 = vrot.lane.b32.xlu1 %v1262_v32, %s3239_s16  ;;  %1185 = vst.msk [vmem:[#allocation2 + $0x70] sm:$0xff] %vm1170_vm2, %v1151_v22  ;;  %vm744_vm2 = vmand %vm680_vm13, %vm696_vm14  ;;  %v707_v53 = vld [vmem:[%s4058_s23 + $0x10] sm:$0xff]  ;;  %vm724_vm13 = vcmp.gt.f32.partialorder %v708_v9, 0.0  ;;  %v3205_v9 = vld [vmem:[%s3323_s12 + $0x20] sm:$0xff] }
 0x1eb   : > { %v5222_v42 = vld [vmem:[#allocation30_spill] sm:$0xff] }
 0x1ee   : > { %v1206_v55 = vpop.permute.xlu0 %1205  ;;  %v1222_v18 = vpop.permute.xlu1 %1221 }
 0x1ef   : > { %v1252_v50 = vadd.f32 %v1206_v55, %v3915_v41  ;;  %v1260_v46 = vadd.f32 %v1222_v18, %v3935_v16  ;;  %v1232_v33 = vpop.permute.xlu2 %1231  ;;  %v3199_v55 = vld [vmem:[%s3323_s12 + $0x68] sm:$0xff]  ;;  %v5207_v18 = vld [vmem:[#allocation19_spill] sm:$0xff] }
 0x1f0   : > { %v1265_v43 = vadd.f32 %v1232_v33, %v1151_v22  ;;  %v3198_v22 = vld [vmem:[%s3323_s12 + $0x10] sm:$0xff] }
 0x1f1   : > { %1285 = vrot.lane.b32.xlu2 %v1252_v50, %s3239_s16  ;;  %1301 = vrot.lane.b32.xlu0 %v1260_v46, %s3239_s16  ;;  %vm691_vm12 = vcmp.lt.f32.partialorder %v3198_v22, %v5206_v19  ;;  %v717_v46 = vld [vmem:[%s4058_s23 + $0x60] sm:$0xff]  ;;  %v5210_v33 = vld [vmem:[#allocation38_spill] sm:$0xff]  ;;  %v5224_v19 = vld [vmem:[#allocation41_spill] sm:$0xff] }
 0x1f2   : > { %1311 = vrot.lane.b32.xlu1 %v1265_v43, %s3239_s16  ;;  %v3207_v50 = vld [vmem:[%s3323_s12 + $0x50] sm:$0xff] }
 0x1f6   : > { %v1212_v52 = vpop.permute.xlu0 %1211  ;;  %v1228_v25 = vpop.permute.xlu1 %1227 }
 0x1f7   : > { %v1255_v51 = vadd.f32 %v1212_v52, %v3933_v3  ;;  %v1263_v28 = vadd.f32 %v1228_v25, %v3953_v59  ;;  %v3200_v52 = vld [vmem:[%s3323_s12 + $0x60] sm:$0xff]  ;;  %v5211_v25 = vld [vmem:[#allocation18_spill] sm:$0xff] }
 0x1f9   : > { %1291 = vrot.lane.b32.xlu2 %v1255_v51, %s3239_s16  ;;  %1307 = vrot.lane.b32.xlu0 %v1263_v28, %s3239_s16  ;;  %v714_v28 = vld [vmem:[%s4058_s23 + $0x48] sm:$0xff] }
 0x1fa   : > { %1367 = vrot.lane.b32.xlu1 %v3744_v26, %s3242_s20 }
 0x1fe   : > { %v1218_v41 = vpop.permute.xlu0 %1217  ;;  %v1234_v16 = vpop.permute.xlu1 %1233 }
 0x1ff   : > { %v1258_v24 = vadd.f32 %v1218_v41, %v3951_v17  ;;  %v1266_v35 = vadd.f32 %v1234_v16, %v3974_v13  ;;  %v5212_v41 = vld [vmem:[#allocation35_spill] sm:$0xff] }
 0x201   : > { %1297 = vrot.lane.b32.xlu2 %v1258_v24, %s3239_s16  ;;  %1313 = vrot.lane.b32.xlu0 %v1266_v35, %s3239_s16  ;;  %v3201_v24 = vld [vmem:[%s3323_s12 + $0x48] sm:$0xff]  ;;  %v5213_v35 = vld [vmem:[#allocation16_spill] sm:$0xff] }
 0x202   : > { %1373 = vrot.lane.b32.xlu1 %v3751_v48, %s3242_s20 }
 0x206   : > { %v1224_v3 = vpop.permute.xlu0 %1223 }
 0x207   : > { %v1261_v59 = vadd.f32 %v1224_v3, %v3972_v58  ;;  %v706_v58 = vld [vmem:[%s4058_s23 + $0x8] sm:$0xff]  ;;  %v713_v3 = vld [vmem:[%s4058_s23 + $0x40] sm:$0xff] }
 0x208   : > { %vm722_vm6 = vcmp.gt.f32.partialorder %v706_v58, 0.0  ;;  %v3202_v58 = vld [vmem:[%s3323_s12 + $0x40] sm:$0xff] }
 0x209   : > { %1303 = vrot.lane.b32.xlu2 %v1261_v59, %s3239_s16  ;;  %1369 = vrot.lane.b32.xlu0 %v3773_v54, %s3242_s20  ;;  %v5214_v59 = vld [vmem:[#allocation33_spill] sm:$0xff] }
 0x20a   : > { %1379 = vrot.lane.b32.xlu1 %v3763_v62, %s3242_s20 }
 0x20e   : > { %v1230_v17 = vpop.permute.xlu0 %1229 }
 0x20f   : > { %v1264_v13 = vadd.f32 %v1230_v17, %v3992_v57  ;;  %v3193_v57 = vld [vmem:[%s3323_s12 + $0x8] sm:$0xff] }
 0x210   : > { %vm690_vm4 = vcmp.lt.f32.partialorder %v3193_v57, %v5194_v38 }
 0x211   : > { %1309 = vrot.lane.b32.xlu2 %v1264_v13, %s3239_s16  ;;  %1375 = vrot.lane.b32.xlu0 %v3788_v21, %s3242_s20  ;;  %vm738_vm7 = vmand %vm674_vm3, %vm690_vm4  ;;  %vm695_vm3 = vcmp.lt.f32.partialorder %v3196_v60, %v5201_v14  ;;  %vm727_vm4 = vcmp.gt.f32.partialorder %v711_v23, 0.0  ;;  %v3204_v23 = vld [vmem:[%s3323_s12 + $0x70] sm:$0xff]  ;;  %v709_v60 = vld [vmem:[%s4058_s23 + $0x20] sm:$0xff]  ;;  %s467_s16 = scalar_lea.vmem %s5116_s6, %s5265_s27 }
 0x212   : > { %1385 = vrot.lane.b32.xlu1 %v3776_v8, %s3242_s20  ;;  %vm754_vm11 = vmand %vm738_vm7, %vm722_vm6  ;;  %vm676_vm6 = vcmp.lt.f32.partialorder %v5202_v20, 2.0  ;;  %v5220_v14 = vld [vmem:[#allocation29_spill] sm:$0xff] }
 0x213   : > { %v2898_v1 = vsel %vm754_vm11, 1.0, %v5198_v63  ;;  %vm743_vm5 = vmand %vm679_vm15, %vm695_vm3  ;;  %vm686_vm11 = vcmp.lt.f32.partialorder %v5205_v61, 2.0  ;;  %vm702_vm15 = vcmp.lt.f32.partialorder %v3199_v55, %v5207_v18  ;;  %vm734_vm3 = vcmp.gt.f32.partialorder %v718_v2, 0.0  ;;  %v5221_v20 = vld [vmem:[#allocation5_spill] sm:$0xff]  ;;  %v5223_v61 = vld [vmem:[#allocation8_spill] sm:$0xff] }
 0x214   : > { %v3021_v29 = vpack.i.bf16 %v2898_v1, %v2897_v39  ;;  %vm760_vm7 = vmand %vm744_vm2, %vm728_vm0  ;;  %vm685_vm2 = vcmp.lt.f32.partialorder %v5210_v33, 2.0  ;;  %v719_v1 = vld [vmem:[%s4058_s23 + $0x70] sm:$0xff]  ;;  %v3206_v2 = vld [vmem:[%s3323_s12 + $0x28] sm:$0xff] }
 0x215   : > { %vm759_vm10 = vmand %vm743_vm5, %vm727_vm4  ;;  %v2904_v32 = vsel %vm760_vm7, 1.0, %v5198_v63  ;;  %vm701_vm5 = vcmp.lt.f32.partialorder %v3200_v52, %v5211_v25  ;;  %v716_v33 = vld [vmem:[%s4058_s23 + $0x58] sm:$0xff] }
 0x216   : > { %vm740_vm14 = vmand %vm676_vm6, %vm692_vm9  ;;  %v2903_v43 = vsel %vm759_vm10, 1.0, %v5198_v63  ;;  %vm723_vm6 = vcmp.gt.f32.partialorder %v707_v53, 0.0  ;;  %v715_v53 = vld [vmem:[%s4058_s23 + $0x50] sm:$0xff]  ;;  %v3208_v25 = vld [vmem:[%s3323_s12 + $0x58] sm:$0xff]  ;;  %s2896_s12 = sshll.u32 %s5265_s27, 2 }
 0x217   : > { %vm4102_vm0 = vmand %vm675_vm8, %vm691_vm12  ;;  %v3036_v51 = vpack.i.bf16 %v2904_v32, %v2903_v43  ;;  %vm733_vm8 = vcmp.gt.f32.partialorder %v717_v46, 0.0  ;;  %vm682_vm12 = vcmp.lt.f32.partialorder %v5212_v41, 2.0  ;;  %v5225_v32 = vld [vmem:[#allocation34_spill] sm:$0xff]  ;;  %v5226_v46 = vld [vmem:[#allocation15_spill] sm:$0xff]  ;;  %s464_s26 = scalar_lea.vmem %s5114_s4, %s2896_s12 }
 0x218   : > { %vm750_vm4 = vmand %vm686_vm11, %vm702_vm15  ;;  %vm681_vm15 = vcmp.lt.f32.partialorder %v5214_v59, 2.0  ;;  %v5227_v43 = vld [vmem:[#allocation36_spill] sm:$0xff] }
 0x219   : > { %1365 = vrot.lane.b32.xlu2 %v3754_v15, %s3242_s20  ;;  %1381 = vrot.lane.b32.xlu0 %v3803_v5, %s3242_s20  ;;  %vm756_vm7 = vmand %vm740_vm14, %vm724_vm13  ;;  %vm698_vm14 = vcmp.lt.f32.partialorder %v3201_v24, %v5213_v35 }
 0x21a   : > { %1391 = vrot.lane.b32.xlu1 %v3791_v49, %s3242_s20  ;;  %vm749_vm9 = vmand %vm685_vm2, %vm701_vm5  ;;  %v2900_v16 = vsel %vm756_vm7, 1.0, %v5198_v63  ;;  %vm730_vm2 = vcmp.gt.f32.partialorder %v714_v28, 0.0 }
 0x21b   : > { %vm766_vm10 = vmand %vm750_vm4, %vm734_vm3  ;;  %vm729_vm4 = vcmp.gt.f32.partialorder %v713_v3, 0.0 }
 0x21c   : > { %vm755_vm11 = vmand %vm4102_vm0, %vm723_vm6  ;;  %v2910_v17 = vsel %vm766_vm10, 1.0, %v5198_v63  ;;  %vm697_vm0 = vcmp.lt.f32.partialorder %v3202_v58, %v5215_v12  ;;  %vm687_vm10 = vcmp.lt.f32.partialorder %v5218_v7, 2.0 }
 0x21d   : > { %vm765_vm13 = vmand %vm749_vm9, %vm733_vm8  ;;  %v2899_v13 = vsel %vm755_vm11, 1.0, %v5198_v63  ;;  %vm688_vm8 = vcmp.lt.f32.partialorder %v5216_v0, 2.0  ;;  %vm704_vm9 = vcmp.lt.f32.partialorder %v3203_v36, %v5217_v47  ;;  %vm736_vm11 = vcmp.gt.f32.partialorder %v720_v56, 0.0 }
 0x21e   : > { %vm746_vm3 = vmand %vm682_vm12, %vm698_vm14  ;;  %v2909_v57 = vsel %vm765_vm13, 1.0, %v5198_v63  ;;  %v3026_v38 = vpack.i.bf16 %v2900_v16, %v2899_v13  ;;  %vm703_vm13 = vcmp.lt.f32.partialorder %v3204_v23, %v5219_v37  ;;  %vm735_vm14 = vcmp.gt.f32.partialorder %v719_v1, 0.0 }
 0x21f   : > { %vm745_vm5 = vmand %vm681_vm15, %vm697_vm0  ;;  %v3051_v45 = vpack.i.bf16 %v2910_v17, %v2909_v57 }
 0x220   : > { %vm762_vm6 = vmand %vm746_vm3, %vm730_vm2  ;;  %vm677_vm3 = vcmp.lt.f32.partialorder %v5220_v14, 2.0 }
 0x221   : > { %1371 = vrot.lane.b32.xlu2 %v3766_v4, %s3242_s20  ;;  %1387 = vrot.lane.b32.xlu0 %v3815_v10, %s3242_s20  ;;  %vm761_vm7 = vmand %vm745_vm5, %vm729_vm4  ;;  %v2906_v34 = vsel %vm762_vm6, 1.0, %v5198_v63  ;;  %vm693_vm4 = vcmp.lt.f32.partialorder %v3205_v9, %v5221_v20  ;;  %vm678_vm5 = vcmp.lt.f32.partialorder %v5222_v42, 2.0  ;;  %vm725_vm6 = vcmp.gt.f32.partialorder %v709_v60, 0.0 }
 0x222   : > { %3022 = vrot.lane.b32.xlu1 %v3021_v29, %s3243_s9  ;;  %v2905_v30 = vsel %vm761_vm7, 1.0, %v5198_v63  ;;  %vm752_vm12 = vmand %vm688_vm8, %vm704_vm9  ;;  %vm694_vm8 = vcmp.lt.f32.partialorder %v3206_v2, %v5223_v61  ;;  %vm726_vm9 = vcmp.gt.f32.partialorder %v710_v40, 0.0 }
 0x223   : > { %v3041_v39 = vpack.i.bf16 %v2906_v34, %v2905_v30  ;;  %vm751_vm15 = vmand %vm687_vm10, %vm703_vm13 }
 0x224   : > { %vm768_vm2 = vmand %vm752_vm12, %vm736_vm11  ;;  %vm1331_vm12 = vcmask 23568  }
 0x225   : > { %vm767_vm0 = vmand %vm751_vm15, %vm735_vm14  ;;  %v2912_v29 = vsel %vm768_vm2, 1.0, %v5198_v63  ;;  %vm683_vm14 = vcmp.lt.f32.partialorder %v5225_v32, 2.0  ;;  %vm1348_vm15 = vcmask 31768   ;;  %vm699_vm2 = vcmp.lt.f32.partialorder %v3207_v50, %v5226_v46 }
 0x226   : > { %vm741_vm7 = vmand %vm677_vm3, %vm693_vm4  ;;  %v2911_v44 = vsel %vm767_vm0, 1.0, %v5198_v63  ;;  %vm684_vm3 = vcmp.lt.f32.partialorder %v5227_v43, 2.0  ;;  %vm731_vm0 = vcmp.gt.f32.partialorder %v715_v53, 0.0 }
 0x227   : > { %v3056_v22 = vpack.i.bf16 %v2912_v29, %v2911_v44  ;;  %vm742_vm10 = vmand %vm678_vm5, %vm694_vm8 }
 0x228   : > { %vm757_vm11 = vmand %vm741_vm7, %vm725_vm6  ;;  %vm732_vm6 = vcmp.gt.f32.partialorder %v716_v33, 0.0 }
 0x229   : > { %1377 = vrot.lane.b32.xlu2 %v3779_v31, %s3242_s20  ;;  %1393 = vrot.lane.b32.xlu0 %v3827_v27, %s3242_s20  ;;  %vm758_vm13 = vmand %vm742_vm10, %vm726_vm9  ;;  %v2901_v55 = vsel %vm757_vm11, 1.0, %v5198_v63  ;;  %vm1429_vm10 = vcmask 39968   ;;  %vm1510_vm11 = vcmask 48168  }
 0x22a   : > { %3037 = vrot.lane.b32.xlu1 %v3036_v51, %s3243_s9  ;;  %v2902_v52 = vsel %vm758_vm13, 1.0, %v5198_v63  ;;  %vm747_vm4 = vmand %vm683_vm14, %vm699_vm2  ;;  %v5228_v51 = vld [vmem:[#allocation14_spill] sm:$0xff]  ;;  %vm2698_vm13 = vcmask 0  }
 0x22b   : > { %vm700_vm5 = vcmp.lt.f32.partialorder %v3208_v25, %v5228_v51  ;;  %v3031_v28 = vpack.i.bf16 %v2902_v52, %v2901_v55  ;;  %vm763_vm8 = vmand %vm747_vm4, %vm731_vm0 }
 0x22c   : > { %vm748_vm7 = vmand %vm684_vm3, %vm700_vm5  ;;  %v2907_v24 = vsel %vm763_vm8, 1.0, %v5198_v63 }
 0x22d   : > { %vm764_vm9 = vmand %vm748_vm7, %vm732_vm6 }
 0x22e   : > { %v2908_v3 = vsel %vm764_vm9, 1.0, %v5198_v63 }
 0x22f   : > { %v3046_v59 = vpack.i.bf16 %v2908_v3, %v2907_v24 }
 0x231   : > { %1383 = vrot.lane.b32.xlu2 %v3794_v6, %s3242_s20  ;;  %3027 = vrot.lane.b32.xlu0 %v3026_v38, %s3243_s9 }
 0x232   : > { %3052 = vrot.lane.b32.xlu1 %v3051_v45, %s3243_s9 }
 0x239   : > { %1389 = vrot.lane.b32.xlu2 %v3806_v11, %s3242_s20  ;;  %3042 = vrot.lane.b32.xlu0 %v3041_v39, %s3243_s9 }
 0x241   : > { %1395 = vrot.lane.b32.xlu2 %v5224_v19, %s3242_s20  ;;  %3057 = vrot.lane.b32.xlu0 %v3056_v22, %s3243_s9 }
 0x244   : > { %v1288_v18 = vpop.permute.xlu1 %1287 }
 0x245   : > { %1334 = vst.msk [vmem:[#allocation2 + $0x10] sm:$0xff] %vm1331_vm12, %v1288_v18 }
 0x246   : > { %1351 = vst.msk [vmem:[#allocation2 + $0x10] sm:$0xff] %vm1348_vm15, %v1288_v18 }
 0x249   : > { %3032 = vrot.lane.b32.xlu2 %v3031_v28, %s3243_s9 }
 0x24b   : > { %v1286_v41 = vpop.permute.xlu2 %1285  ;;  %v1284_v16 = vpop.permute.xlu0 %1283 }
 0x24c   : > { %1333 = vst.msk [vmem:[#allocation2 + $0x8] sm:$0xff] %vm1331_vm12, %v1286_v41  ;;  %v1294_v35 = vpop.permute.xlu1 %1293 }
 0x24d   : > { %1350 = vst.msk [vmem:[#allocation2 + $0x8] sm:$0xff] %vm1348_vm15, %v1286_v41 }
 0x24e   : > { %1337 = vst.msk [vmem:[#allocation2 + $0x28] sm:$0xff] %vm1331_vm12, %v1294_v35 }
 0x24f   : > { %1354 = vst.msk [vmem:[#allocation2 + $0x28] sm:$0xff] %vm1348_vm15, %v1294_v35 }
 0x250   : > { %1332 = vst.msk [vmem:[#allocation2] sm:$0xff] %vm1331_vm12, %v1284_v16 }
 0x251   : > { %1349 = vst.msk [vmem:[#allocation2] sm:$0xff] %vm1348_vm15, %v1284_v16  ;;  %3047 = vrot.lane.b32.xlu2 %v3046_v59, %s3243_s9 }
 0x253   : > { %v1292_v17 = vpop.permute.xlu2 %1291  ;;  %v1290_v13 = vpop.permute.xlu0 %1289 }
 0x254   : > { %1336 = vst.msk [vmem:[#allocation2 + $0x20] sm:$0xff] %vm1331_vm12, %v1292_v17  ;;  %v1300_v58 = vpop.permute.xlu1 %1299 }
 0x255   : > { %1353 = vst.msk [vmem:[#allocation2 + $0x20] sm:$0xff] %vm1348_vm15, %v1292_v17 }
 0x256   : > { %1340 = vst.msk [vmem:[#allocation2 + $0x40] sm:$0xff] %vm1331_vm12, %v1300_v58 }
 0x257   : > { %1357 = vst.msk [vmem:[#allocation2 + $0x40] sm:$0xff] %vm1348_vm15, %v1300_v58 }
 0x258   : > { %1335 = vst.msk [vmem:[#allocation2 + $0x18] sm:$0xff] %vm1331_vm12, %v1290_v13 }
 0x259   : > { %1352 = vst.msk [vmem:[#allocation2 + $0x18] sm:$0xff] %vm1348_vm15, %v1290_v13 }
 0x25b   : > { %v1298_v12 = vpop.permute.xlu2 %1297  ;;  %v1296_v57 = vpop.permute.xlu0 %1295 }
 0x25c   : > { %1339 = vst.msk [vmem:[#allocation2 + $0x38] sm:$0xff] %vm1331_vm12, %v1298_v12  ;;  %v1306_v38 = vpop.permute.xlu1 %1305 }
 0x25d   : > { %1356 = vst.msk [vmem:[#allocation2 + $0x38] sm:$0xff] %vm1348_vm15, %v1298_v12 }
 0x25e   : > { %1343 = vst.msk [vmem:[#allocation2 + $0x58] sm:$0xff] %vm1331_vm12, %v1306_v38 }
 0x25f   : > { %1360 = vst.msk [vmem:[#allocation2 + $0x58] sm:$0xff] %vm1348_vm15, %v1306_v38 }
 0x260   : > { %1338 = vst.msk [vmem:[#allocation2 + $0x30] sm:$0xff] %vm1331_vm12, %v1296_v57 }
 0x261   : > { %1355 = vst.msk [vmem:[#allocation2 + $0x30] sm:$0xff] %vm1348_vm15, %v1296_v57 }
 0x263   : > { %v1304_v45 = vpop.permute.xlu2 %1303  ;;  %v1302_v56 = vpop.permute.xlu0 %1301 }
 0x264   : > { %1342 = vst.msk [vmem:[#allocation2 + $0x50] sm:$0xff] %vm1331_vm12, %v1304_v45  ;;  %v1312_v0 = vpop.permute.xlu1 %1311 }
 0x265   : > { %1359 = vst.msk [vmem:[#allocation2 + $0x50] sm:$0xff] %vm1348_vm15, %v1304_v45 }
 0x266   : > { %1346 = vst.msk [vmem:[#allocation2 + $0x70] sm:$0xff] %vm1331_vm12, %v1312_v0 }
 0x267   : > { %1363 = vst.msk [vmem:[#allocation2 + $0x70] sm:$0xff] %vm1348_vm15, %v1312_v0 }
 0x268   : > { %1341 = vst.msk [vmem:[#allocation2 + $0x48] sm:$0xff] %vm1331_vm12, %v1302_v56 }
 0x269   : > { %1358 = vst.msk [vmem:[#allocation2 + $0x48] sm:$0xff] %vm1348_vm15, %v1302_v56 }
 0x26b   : > { %v1310_v34 = vpop.permute.xlu2 %1309  ;;  %v1308_v36 = vpop.permute.xlu0 %1307 }
 0x26c   : > { %1345 = vst.msk [vmem:[#allocation2 + $0x68] sm:$0xff] %vm1331_vm12, %v1310_v34  ;;  %v1368_v47 = vpop.permute.xlu1 %1367 }
 0x26d   : > { %1362 = vst.msk [vmem:[#allocation2 + $0x68] sm:$0xff] %vm1348_vm15, %v1310_v34  ;;  %v1414_v1 = vmul.f32 %v1368_v47, %v3744_v26 }
 0x26e   : > { %1344 = vst.msk [vmem:[#allocation2 + $0x60] sm:$0xff] %vm1331_vm12, %v1308_v36 }
 0x26f   : > { %1431 = vst.msk [vmem:[#allocation2 + $0x8] sm:$0xff] %vm1429_vm10, %v1414_v1 }
 0x270   : > { %1361 = vst.msk [vmem:[#allocation2 + $0x60] sm:$0xff] %vm1348_vm15, %v1308_v36 }
 0x273   : > { %v1366_v7 = vpop.permute.xlu2 %1365  ;;  %v1314_v30 = vpop.permute.xlu0 %1313 }
 0x274   : > { %v1413_v23 = vmul.f32 %v1366_v7, %v3754_v15  ;;  %v1374_v37 = vpop.permute.xlu1 %1373  ;;  %1347 = vst.msk [vmem:[#allocation2 + $0x78] sm:$0xff] %vm1331_vm12, %v1314_v30 }
 0x275   : > { %v1417_v39 = vmul.f32 %v1374_v37, %v3751_v48  ;;  %1364 = vst.msk [vmem:[#allocation2 + $0x78] sm:$0xff] %vm1348_vm15, %v1314_v30  ;;  %v3244_v48 = vmov 2  }
 0x276   : > { %1430 = vst.msk [vmem:[#allocation2] sm:$0xff] %vm1429_vm10, %v1413_v23  ;;  %3062 = vset.pattern.permute.xlu1 %v3244_v48  ;;  %3061 = vset.pattern.permute.xlu2 %v3244_v48 }
 0x277   : > { %1434 = vst.msk [vmem:[#allocation2 + $0x20] sm:$0xff] %vm1429_vm10, %v1417_v39  ;;  %3063 = vset.pattern.permute.xlu0 %v3244_v48  ;;  %v5144_v48 = vmov 3  }
 0x27b   : > { %v1372_v26 = vpop.permute.xlu2 %1371  ;;  %v1370_v60 = vpop.permute.xlu0 %1369 }
 0x27c   : > { %v1416_v14 = vmul.f32 %v1372_v26, %v3766_v4  ;;  %v1380_v29 = vpop.permute.xlu1 %1379  ;;  %v1415_v9 = vmul.f32 %v1370_v60, %v3773_v54 }
 0x27d   : > { %v1420_v15 = vmul.f32 %v1380_v29, %v3763_v62 }
 0x27e   : > { %1433 = vst.msk [vmem:[#allocation2 + $0x18] sm:$0xff] %vm1429_vm10, %v1416_v14 }
 0x27f   : > { %1437 = vst.msk [vmem:[#allocation2 + $0x38] sm:$0xff] %vm1429_vm10, %v1420_v15  ;;  %v5145_v15 = vmov 1  }
 0x280   : > { %1432 = vst.msk [vmem:[#allocation2 + $0x10] sm:$0xff] %vm1429_vm10, %v1415_v9  ;;  %v3245_v9 = vmov 0  }
 0x283   : > { %v1378_v20 = vpop.permute.xlu2 %1377  ;;  %v1376_v40 = vpop.permute.xlu0 %1375 }
 0x284   : > { %v1419_v42 = vmul.f32 %v1378_v20, %v3779_v31  ;;  %v1386_v4 = vpop.permute.xlu1 %1385  ;;  %v1418_v44 = vmul.f32 %v1376_v40, %v3788_v21  ;;  %v1543_v20 = vld [vmem:[%s464_s26] sm:$0xf] }
 0x285   : > { %v1423_v54 = vmul.f32 %v1386_v4, %v3776_v8 }
 0x286   : > { %1436 = vst.msk [vmem:[#allocation2 + $0x30] sm:$0xff] %vm1429_vm10, %v1419_v42  ;;  %v1554_v42 = vmul.f32 0.2, %v1543_v20 }
 0x287   : > { %1440 = vst.msk [vmem:[#allocation2 + $0x50] sm:$0xff] %vm1429_vm10, %v1423_v54 }
 0x288   : > { %1435 = vst.msk [vmem:[#allocation2 + $0x28] sm:$0xff] %vm1429_vm10, %v1418_v44  ;;  %v2930_v4 = vclamps-f32 %v1554_v42, 20.0 }
 0x28a   : > { %v1557_v54 = vmul.f32 1.442695, %v2930_v4 }
 0x28b   : > { %v1384_v62 = vpop.permute.xlu2 %1383  ;;  %v1382_v2 = vpop.permute.xlu0 %1381 }
 0x28c   : > { %v1422_v61 = vmul.f32 %v1384_v62, %v3794_v6  ;;  %v1392_v22 = vpop.permute.xlu1 %1391  ;;  %v1421_v53 = vmul.f32 %v1382_v2, %v3803_v5  ;;  %3159 = vpow2.f32 %v1557_v54 }
 0x28d   : > { %v1426_v31 = vmul.f32 %v1392_v22, %v3791_v49 }
 0x28e   : > { %1439 = vst.msk [vmem:[#allocation2 + $0x48] sm:$0xff] %vm1429_vm10, %v1422_v61 }
 0x28f   : > { %1443 = vst.msk [vmem:[#allocation2 + $0x68] sm:$0xff] %vm1429_vm10, %v1426_v31  ;;  %v1544_v31 = vld [vmem:[%s5115_s5] sm:$0x3f] }
 0x290   : > { %1438 = vst.msk [vmem:[#allocation2 + $0x40] sm:$0xff] %vm1429_vm10, %v1421_v53 }
 0x292   : > { %v3160_v61 = vpop.eup %3159 }
 0x293   : > { %v1390_v8 = vpop.permute.xlu2 %1389  ;;  %v1388_v21 = vpop.permute.xlu0 %1387  ;;  %v1560_v22 = vrot.slane %v3160_v61, 6 }
 0x294   : > { %v1425_v32 = vmul.f32 %v1390_v8, %v3806_v11  ;;  %v3023_v55 = vpop.permute.xlu1 %3022  ;;  %v1424_v6 = vmul.f32 %v1388_v21, %v3815_v10  ;;  %v1550_v8 = vrot.slane %v1544_v31, 2 }
 0x295   : > { %v3025_v18 = vunpack.i.h.bf16 %v3023_v55  ;;  %v3024_v50 = vunpack.i.l.bf16 %v3023_v55  ;;  %v4349_v21 = vmul.f32 %v1560_v22, %v1544_v31 }
 0x296   : > { %1442 = vst.msk [vmem:[#allocation2 + $0x60] sm:$0xff] %vm1429_vm10, %v1425_v32  ;;  %v1552_v55 = vmul.f32 %v1550_v8, %v1543_v20 }
 0x297   : > { %1511 = vst.msk [vmem:[#allocation2] sm:$0xff] %vm1510_vm11, %v3024_v50 }
 0x298   : > { %1512 = vst.msk [vmem:[#allocation2 + $0x8] sm:$0xff] %vm1510_vm11, %v3025_v18  ;;  %v1563_v18 = vmul.f32 0.5, %v4349_v21 }
 0x299   : > { %1441 = vst.msk [vmem:[#allocation2 + $0x58] sm:$0xff] %vm1429_vm10, %v1424_v6 }
 0x29b   : > { %v1396_v49 = vpop.permute.xlu2 %1395  ;;  %v1394_v5 = vpop.permute.xlu0 %1393 }
 0x29c   : > { %v1428_v46 = vmul.f32 %v1396_v49, %v5224_v19  ;;  %v3038_v33 = vpop.permute.xlu1 %3037  ;;  %v1427_v52 = vmul.f32 %v1394_v5, %v3827_v27  ;;  %v5142_v49 = vmov 4   ;;  %v1553_v5 = vadd.f32 %v1552_v55, %v1544_v31 }
 0x29d   : > { %v3040_v11 = vunpack.i.h.bf16 %v3038_v33  ;;  %v3039_v43 = vunpack.i.l.bf16 %v3038_v33 }
 0x29e   : > { %1445 = vst.msk [vmem:[#allocation2 + $0x78] sm:$0xff] %vm1429_vm10, %v1428_v46  ;;  %v4239_v10 = vld [vmem:[#allocation2] sm:$0xff]  ;;  %v1565_v46 = vrot.slane %v1563_v18, 4 }
 0x29f   : > { %1517 = vst.msk [vmem:[#allocation2 + $0x30] sm:$0xff] %vm1510_vm11, %v3039_v43  ;;  %v4242_v25 = vld [vmem:[#allocation2 + $0x8] sm:$0xff]  ;;  %1593 = vperm.xlu2 %3061, %v4239_v10   ;;  %v1569_v43 = vrot.slane %v4349_v21, 4 }
 0x2a0   : > { %1518 = vst.msk [vmem:[#allocation2 + $0x38] sm:$0xff] %vm1510_vm11, %v3040_v11  ;;  %1598 = vperm.xlu1 %3062, %v4242_v25   ;;  %v4364_v11 = vsub.f32 %v1553_v5, %v1565_v46 }
 0x2a1   : > { %1444 = vst.msk [vmem:[#allocation2 + $0x70] sm:$0xff] %vm1429_vm10, %v1427_v52 }
 0x2a3   : > { %v3033_v19 = vpop.permute.xlu2 %3032  ;;  %v3028_v51 = vpop.permute.xlu0 %3027 }
 0x2a4   : > { %v3035_v28 = vunpack.i.h.bf16 %v3033_v19  ;;  %v3034_v27 = vunpack.i.l.bf16 %v3033_v19  ;;  %v3053_v41 = vpop.permute.xlu1 %3052  ;;  %v3030_v35 = vunpack.i.h.bf16 %v3028_v51  ;;  %v3029_v3 = vunpack.i.l.bf16 %v3028_v51 }
 0x2a5   : > { %v3055_v16 = vunpack.i.h.bf16 %v3053_v41  ;;  %v3054_v24 = vunpack.i.l.bf16 %v3053_v41  ;;  %v4375_v51 = vadd.f32 %v1569_v43, %v4364_v11 }
 0x2a6   : > { %1515 = vst.msk [vmem:[#allocation2 + $0x20] sm:$0xff] %vm1510_vm11, %v3034_v27  ;;  %v4267_v47 = vld [vmem:[#allocation2 + $0x30] sm:$0xff]  ;;  %v4381_v27 = vperm.slane %v4364_v11, 0 }
 0x2a7   : > { %1516 = vst.msk [vmem:[#allocation2 + $0x28] sm:$0xff] %vm1510_vm11, %v3035_v28  ;;  %v4275_v7 = vld [vmem:[#allocation2 + $0x38] sm:$0xff]  ;;  %v4384_v41 = vperm.slane %v4375_v51, 0 }
 0x2a8   : > { %1523 = vst.msk [vmem:[#allocation2 + $0x60] sm:$0xff] %vm1510_vm11, %v3054_v24 }
 0x2a9   : > { %1524 = vst.msk [vmem:[#allocation2 + $0x68] sm:$0xff] %vm1510_vm11, %v3055_v16 }
 0x2aa   : > { %1514 = vst.msk [vmem:[#allocation2 + $0x18] sm:$0xff] %vm1510_vm11, %v3030_v35 }
 0x2ab   : > { %1513 = vst.msk [vmem:[#allocation2 + $0x10] sm:$0xff] %vm1510_vm11, %v3029_v3  ;;  %v3048_v59 = vpop.permute.xlu2 %3047  ;;  %v3043_v17 = vpop.permute.xlu0 %3042 }
 0x2ac   : > { %v3050_v13 = vunpack.i.h.bf16 %v3048_v59  ;;  %v3049_v58 = vunpack.i.l.bf16 %v3048_v59  ;;  %v3045_v12 = vunpack.i.h.bf16 %v3043_v17  ;;  %v3044_v57 = vunpack.i.l.bf16 %v3043_v17 }
 0x2ad   : > { %v4254_v38 = vld [vmem:[#allocation2 + $0x20] sm:$0xff] }
 0x2ae   : > { %1521 = vst.msk [vmem:[#allocation2 + $0x50] sm:$0xff] %vm1510_vm11, %v3049_v58  ;;  %1613 = vperm.xlu1 %3062, %v4254_v38   ;;  %v4272_v1 = vld [vmem:[#allocation2 + $0x28] sm:$0xff] }
 0x2af   : > { %1522 = vst.msk [vmem:[#allocation2 + $0x58] sm:$0xff] %vm1510_vm11, %v3050_v13  ;;  %v4287_v39 = vld [vmem:[#allocation2 + $0x60] sm:$0xff] }
 0x2b0   : > { %1520 = vst.msk [vmem:[#allocation2 + $0x48] sm:$0xff] %vm1510_vm11, %v3045_v12  ;;  %v4293_v60 = vld [vmem:[#allocation2 + $0x68] sm:$0xff] }
 0x2b1   : > { %1519 = vst.msk [vmem:[#allocation2 + $0x40] sm:$0xff] %vm1510_vm11, %v3044_v57  ;;  %v4261_v45 = vld [vmem:[#allocation2 + $0x18] sm:$0xff] }
 0x2b2   : > { %1608 = vperm.xlu2 %3061, %v4261_v45   ;;  %v4264_v56 = vld [vmem:[#allocation2 + $0x10] sm:$0xff] }
 0x2b3   : > { %1603 = vperm.xlu0 %3063, %v4264_v56   ;;  %v3058_v0 = vpop.permute.xlu0 %3057 }
 0x2b4   : > { %v3060_v34 = vunpack.i.h.bf16 %v3058_v0  ;;  %v3059_v36 = vunpack.i.l.bf16 %v3058_v0 }
 0x2b5   : > { %v4284_v37 = vld [vmem:[#allocation2 + $0x50] sm:$0xff] }
 0x2b6   : > { %1526 = vst.msk [vmem:[#allocation2 + $0x78] sm:$0xff] %vm1510_vm11, %v3060_v34  ;;  %1623 = vperm.xlu1 %3062, %v4267_v47   ;;  %v4290_v26 = vld [vmem:[#allocation2 + $0x58] sm:$0xff] }
 0x2b7   : > { %1525 = vst.msk [vmem:[#allocation2 + $0x70] sm:$0xff] %vm1510_vm11, %v3059_v36  ;;  %v4278_v30 = vld [vmem:[#allocation2 + $0x48] sm:$0xff] }
 0x2b8   : > { %v4281_v23 = vld [vmem:[#allocation2 + $0x40] sm:$0xff] }
 0x2ba   : > { %1618 = vperm.xlu2 %3061, %v4272_v1  }
 0x2bb   : > { %1628 = vperm.xlu0 %3063, %v4275_v7  }
 0x2bd   : > { %v4296_v14 = vld [vmem:[#allocation2 + $0x78] sm:$0xff] }
 0x2be   : > { %1638 = vperm.xlu1 %3062, %v4278_v30   ;;  %v4299_v29 = vld [vmem:[#allocation2 + $0x70] sm:$0xff] }
 0x2c2   : > { %1633 = vperm.xlu2 %3061, %v4281_v23  }
 0x2c3   : > { %1643 = vperm.xlu0 %3063, %v4284_v37  }
 0x2c6   : > { %1653 = vperm.xlu1 %3062, %v4287_v39  }
 0x2ca   : > { %1648 = vperm.xlu2 %3061, %v4290_v26  }
 0x2cb   : > { %1658 = vperm.xlu0 %3063, %v4293_v60  }
 0x2ce   : > { %1668 = vperm.xlu1 %3062, %v4296_v14  }
 0x2d2   : > { %1663 = vperm.xlu2 %3061, %v4299_v29  }
 0x2d3   : > { %3064 = vset.pattern.permute.xlu0 %v3245_v9 }
 0x2d4   : > { %1689 = vperm.xlu0 %3064, %v4239_v10  }
 0x2d6   : > { %3066 = vset.pattern.permute.xlu1 %v3245_v9 }
 0x2d7   : > { %1697 = vperm.xlu1 %3066, %v4264_v56  }
 0x2da   : > { %3065 = vset.pattern.permute.xlu2 %v3245_v9 }
 0x2db   : > { %1693 = vperm.xlu2 %3065, %v4242_v25  }
 0x2dc   : > { %1709 = vperm.xlu0 %3064, %v4272_v1  }
 0x2df   : > { %1705 = vperm.xlu1 %3066, %v4254_v38  }
 0x2e3   : > { %1701 = vperm.xlu2 %3065, %v4261_v45  }
 0x2e4   : > { %1721 = vperm.xlu0 %3064, %v4281_v23  }
 0x2e7   : > { %1717 = vperm.xlu1 %3066, %v4275_v7  }
 0x2eb   : > { %1713 = vperm.xlu2 %3065, %v4267_v47  }
 0x2ec   : > { %1733 = vperm.xlu0 %3064, %v4290_v26  }
 0x2ef   : > { %1729 = vperm.xlu1 %3066, %v4284_v37  }
 0x2f3   : > { %1725 = vperm.xlu2 %3065, %v4278_v30  }
 0x2f4   : > { %1745 = vperm.xlu0 %3064, %v4299_v29  }
 0x2f7   : > { %1741 = vperm.xlu1 %3066, %v4293_v60  }
 0x2f9   : > { %v4326_v40 = vpop.permute.xlu2 %1593 }
 0x2fb   : > { %1737 = vperm.xlu2 %3065, %v4287_v39  }
 0x2fc   : > { %3069 = vset.pattern.permute.xlu0 %v5145_v15 }
 0x2fd   : > { %1883 = vperm.xlu0 %3069, %v4239_v10  }
 0x2ff   : > { %3067 = vset.pattern.permute.xlu1 %v5144_v48 }
 0x300   : > { %1802 = vperm.xlu1 %3067, %v4239_v10  }
 0x303   : > { %1749 = vperm.xlu2 %3065, %v4296_v14  }
 0x305   : > { %3070 = vset.pattern.permute.xlu0 %v5144_v48 }
 0x306   : > { %1806 = vperm.xlu0 %3070, %v4242_v25  }
 0x308   : > { %1814 = vperm.xlu1 %3067, %v4261_v45  }
 0x30b   : > { %3068 = vset.pattern.permute.xlu2 %v5144_v48 }
 0x30c   : > { %v4332_v44 = vpop.permute.xlu2 %1608  ;;  %1810 = vperm.xlu2 %3068, %v4264_v56  }
 0x30d   : > { %v1675_v34 = vmin.f32 %v4332_v44, %v4384_v41  ;;  %v2014_v36 = vmax.f32 %v4332_v44, %v4384_v41 }
 0x30e   : > { %1826 = vperm.xlu0 %3070, %v4267_v47  }
 0x310   : > { %1822 = vperm.xlu1 %3067, %v4272_v1  }
 0x312   : > { %v1599_v2 = vpop.permute.xlu1 %1598 }
 0x313   : > { %v1673_v35 = vmin.f32 %v1599_v2, %v4384_v41  ;;  %v2012_v3 = vmax.f32 %v1599_v2, %v4384_v41 }
 0x314   : > { %v4337_v62 = vpop.permute.xlu2 %1618  ;;  %1818 = vperm.xlu2 %3068, %v4254_v38  }
 0x316   : > { %1838 = vperm.xlu0 %3070, %v4278_v30  }
 0x318   : > { %1834 = vperm.xlu1 %3067, %v4281_v23  }
 0x31c   : > { %v4342_v53 = vpop.permute.xlu2 %1633  ;;  %1830 = vperm.xlu2 %3068, %v4275_v7  }
 0x31e   : > { %1850 = vperm.xlu0 %3070, %v4287_v39  }
 0x320   : > { %v4351_v32 = vpop.permute.xlu1 %1613  ;;  %1846 = vperm.xlu1 %3067, %v4290_v26  }
 0x324   : > { %v4355_v50 = vpop.permute.xlu2 %1648  ;;  %1842 = vperm.xlu2 %3068, %v4284_v37  }
 0x325   : > { %v4358_v6 = vpop.permute.xlu0 %1603 }
 0x326   : > { %3077 = vset.pattern.permute.xlu0 %v5142_v49  ;;  %v1674_v46 = vmin.f32 %v4358_v6, %v4384_v41 }
 0x327   : > { %2128 = vperm.xlu0 %3077, %v4242_v25  }
 0x328   : > { %v1624_v33 = vpop.permute.xlu1 %1623  ;;  %3072 = vset.pattern.permute.xlu1 %v5145_v15 }
 0x329   : > { %1887 = vperm.xlu1 %3072, %v4242_v25   ;;  %v1678_v2 = vmin.f32 %v1624_v33, %v4384_v41  ;;  %v2017_v61 = vmax.f32 %v1624_v33, %v4384_v41  ;;  %v2013_v33 = vmax.f32 %v4358_v6, %v4384_v41 }
 0x32c   : > { %v4367_v52 = vpop.permute.xlu2 %1663  ;;  %3071 = vset.pattern.permute.xlu2 %v5142_v49 }
 0x32d   : > { %v4370_v19 = vpop.permute.xlu0 %1628  ;;  %2124 = vperm.xlu2 %3071, %v4239_v10  }
 0x32f   : > { %2148 = vperm.xlu0 %3077, %v4267_v47  }
 0x330   : > { %v4377_v28 = vpop.permute.xlu1 %1638 }
 0x331   : > { %1915 = vperm.xlu1 %3072, %v4281_v23  }
 0x335   : > { %v4386_v16 = vpop.permute.xlu0 %1643  ;;  %v1694_v24 = vpop.permute.xlu2 %1693  ;;  %3073 = vset.pattern.permute.xlu2 %v5145_v15 }
 0x336   : > { %v1754_v59 = vmax.f32 %v1694_v24, %v4381_v27  ;;  %v2028_v17 = vmin.f32 %v1694_v24, %v4381_v27  ;;  %1899 = vperm.xlu2 %3073, %v4254_v38  }
 0x337   : > { %3086 = vset.pattern.permute.xlu0 %v5145_v15 }
 0x338   : > { %v4395_v13 = vsub.f32 %v1673_v35, %v1754_v59  ;;  %v4397_v58 = vsub.f32 %v2012_v3, %v2028_v17  ;;  %1895 = vperm.xlu0 %3086, %v4261_v45   ;;  %v4400_v12 = vpop.permute.xlu1 %1653  ;;  %v1681_v17 = vmin.f32 %v4377_v28, %v4384_v41 }
 0x339   : > { %1891 = vperm.xlu1 %3072, %v4264_v56  }
 0x33d   : > { %v4403_v57 = vpop.permute.xlu0 %1658  ;;  %v1702_v0 = vpop.permute.xlu2 %1701 }
 0x33e   : > { %v1756_v9 = vmax.f32 %v1702_v0, %v4381_v27  ;;  %v2030_v20 = vmin.f32 %v1702_v0, %v4381_v27  ;;  %3074 = vset.pattern.permute.xlu2 %v5142_v49  ;;  %v2020_v0 = vmax.f32 %v4377_v28, %v4384_v41 }
 0x33f   : > { %2140 = vperm.xlu2 %3074, %v4254_v38  }
 0x340   : > { %v4413_v42 = vsub.f32 %v1675_v34, %v1756_v9  ;;  %v4415_v4 = vsub.f32 %v2014_v36, %v2030_v20  ;;  %1923 = vperm.xlu0 %3086, %v4284_v37   ;;  %v4418_v54 = vpop.permute.xlu1 %1668  ;;  %v1677_v9 = vmin.f32 %v4337_v62, %v4384_v41  ;;  %v2016_v20 = vmax.f32 %v4337_v62, %v4384_v41 }
 0x341   : > { %3076 = vset.pattern.permute.xlu1 %v5142_v49  ;;  %v1676_v62 = vmin.f32 %v4351_v32, %v4384_v41 }
 0x342   : > { %2156 = vperm.xlu1 %3076, %v4281_v23  }
 0x345   : > { %v1714_v44 = vpop.permute.xlu2 %1713 }
 0x346   : > { %v1759_v22 = vmax.f32 %v1714_v44, %v4381_v27  ;;  %v2033_v31 = vmin.f32 %v1714_v44, %v4381_v27  ;;  %v4426_v8 = vpop.permute.xlu0 %1689 }
 0x347   : > { %3075 = vset.pattern.permute.xlu2 %v5145_v15 }
 0x348   : > { %v4429_v55 = vsub.f32 %v1678_v2, %v1759_v22  ;;  %v4431_v18 = vsub.f32 %v2017_v61, %v2033_v31  ;;  %1927 = vperm.xlu0 %3086, %v4290_v26   ;;  %1903 = vperm.xlu2 %3075, %v4272_v1  }
 0x349   : > { %v1698_v5 = vpop.permute.xlu1 %1697 }
 0x34a   : > { %5229 = vst [vmem:[#allocation4_spill] sm:$0xff] %v4431_v18  ;;  %v1755_v43 = vmax.f32 %v1698_v5, %v4381_v27  ;;  %v2029_v24 = vmin.f32 %v1698_v5, %v4381_v27  ;;  %3078 = vset.pattern.permute.xlu1 %v5145_v15 }
 0x34b   : > { %1931 = vperm.xlu1 %3078, %v4287_v39  }
 0x34c   : > { %v4443_v35 = vsub.f32 %v1674_v46, %v1755_v43  ;;  %v4445_v3 = vsub.f32 %v2013_v33, %v2029_v24  ;;  %v2015_v46 = vmax.f32 %v4351_v32, %v4384_v41 }
 0x34d   : > { %v1726_v59 = vpop.permute.xlu2 %1725 }
 0x34e   : > { %v1762_v6 = vmax.f32 %v1726_v59, %v4381_v27  ;;  %v2036_v34 = vmin.f32 %v1726_v59, %v4381_v27  ;;  %v1710_v36 = vpop.permute.xlu0 %1709 }
 0x34f   : > { %v1758_v44 = vmax.f32 %v1710_v36, %v4381_v27  ;;  %v2032_v2 = vmin.f32 %v1710_v36, %v4381_v27 }
 0x350   : > { %v4459_v61 = vsub.f32 %v1681_v17, %v1762_v6  ;;  %v4461_v22 = vsub.f32 %v2020_v0, %v2036_v34  ;;  %3092 = vset.pattern.permute.xlu0 %v5144_v48  ;;  %1919 = vperm.xlu2 %3075, %v4278_v30   ;;  %v1684_v0 = vmin.f32 %v4400_v12, %v4384_v41 }
 0x351   : > { %v4465_v28 = vsub.f32 %v1677_v9, %v1758_v44  ;;  %v4467_v31 = vsub.f32 %v2016_v20, %v2032_v2  ;;  %1862 = vperm.xlu0 %3092, %v4296_v14   ;;  %v1706_v5 = vpop.permute.xlu1 %1705  ;;  %v2023_v6 = vmax.f32 %v4400_v12, %v4384_v41  ;;  %v1680_v9 = vmin.f32 %v4342_v53, %v4384_v41 }
 0x352   : > { %v1757_v33 = vmax.f32 %v1706_v5, %v4381_v27  ;;  %v2031_v43 = vmin.f32 %v1706_v5, %v4381_v27  ;;  %v2019_v20 = vmax.f32 %v4342_v53, %v4384_v41 }
 0x353   : > { %3080 = vset.pattern.permute.xlu1 %v5142_v49 }
 0x354   : > { %v4477_v24 = vsub.f32 %v1676_v62, %v1757_v33  ;;  %v4479_v59 = vsub.f32 %v2015_v46, %v2031_v43  ;;  %2144 = vperm.xlu1 %3080, %v4272_v1   ;;  %v2662_v33 = vsel %vm1510_vm11, %v4242_v25, 0.0  ;;  %v2661_v43 = vsel %vm1510_vm11, %v4239_v10, 0.0 }
 0x355   : > { %v1738_v17 = vpop.permute.xlu2 %1737  ;;  %v2664_v10 = vsel %vm1510_vm11, %v4264_v56, 0.0 }
 0x356   : > { %v1765_v32 = vmax.f32 %v1738_v17, %v4381_v27  ;;  %v2039_v34 = vmin.f32 %v1738_v17, %v4381_v27  ;;  %v1722_v36 = vpop.permute.xlu0 %1721  ;;  %v1679_v17 = vmin.f32 %v4370_v19, %v4384_v41 }
 0x357   : > { %v1761_v44 = vmax.f32 %v1722_v36, %v4381_v27  ;;  %v2035_v2 = vmin.f32 %v1722_v36, %v4381_v27 }
 0x358   : > { %v4494_v5 = vsub.f32 %v1684_v0, %v1765_v32  ;;  %v4496_v62 = vsub.f32 %v2023_v6, %v2039_v34  ;;  %3079 = vset.pattern.permute.xlu2 %v5142_v49  ;;  %v2018_v0 = vmax.f32 %v4370_v19, %v4384_v41  ;;  %v1687_v19 = vmin.f32 %v4418_v54, %v4384_v41 }
 0x359   : > { %v4499_v12 = vsub.f32 %v1680_v9, %v1761_v44  ;;  %v4501_v46 = vsub.f32 %v2019_v20, %v2035_v2  ;;  %2564 = vrot.lane.b32.xlu0 %v4264_v56, %s3249_s13  ;;  %2132 = vperm.xlu2 %3079, %v4264_v56   ;;  %v1718_v53 = vpop.permute.xlu1 %1717  ;;  %v2663_v20 = vadd.f32 %v2662_v33, %v2661_v43 }
 0x35a   : > { %5230 = vst [vmem:[#allocation21_spill] sm:$0xff] %v4494_v5  ;;  %v1760_v6 = vmax.f32 %v1718_v53, %v4381_v27  ;;  %v2034_v32 = vmin.f32 %v1718_v53, %v4381_v27  ;;  %3094 = vset.pattern.permute.xlu0 %v5142_v49  ;;  %v2026_v44 = vmax.f32 %v4418_v54, %v4384_v41 }
 0x35b   : > { %5231 = vst [vmem:[#allocation23_spill] sm:$0xff] %v4496_v62  ;;  %v2665_v54 = vadd.f32 %v2664_v10, %v2663_v20  ;;  %v1789_v62 = vmax.f32 %v4477_v24, 0.0 }
 0x35c   : > { %v4517_v34 = vsub.f32 %v1679_v17, %v1760_v6  ;;  %v4519_v36 = vsub.f32 %v2018_v0, %v2034_v32  ;;  %2160 = vperm.xlu1 %3080, %v4278_v30   ;;  %v1683_v0 = vmin.f32 %v4355_v50, %v4384_v41  ;;  %v2022_v30 = vmax.f32 %v4355_v50, %v4384_v41 }
 0x35d   : > { %v1750_v9 = vpop.permute.xlu2 %1749  ;;  %v1682_v32 = vmin.f32 %v4386_v16, %v4384_v41 }
 0x35e   : > { %5232 = vst [vmem:[#allocation22_spill] sm:$0xff] %v4517_v34  ;;  %v1768_v2 = vmax.f32 %v1750_v9, %v4381_v27  ;;  %v2042_v53 = vmin.f32 %v1750_v9, %v4381_v27  ;;  %v1734_v17 = vpop.permute.xlu0 %1733 }
 0x35f   : > { %5233 = vst [vmem:[#allocation24_spill] sm:$0xff] %v4519_v36  ;;  %v1764_v56 = vmax.f32 %v1734_v17, %v4381_v27  ;;  %v2038_v33 = vmin.f32 %v1734_v17, %v4381_v27 }
 0x360   : > { %v4536_v43 = vsub.f32 %v1687_v19, %v1768_v2  ;;  %v4538_v6 = vsub.f32 %v2026_v44, %v2042_v53  ;;  %v2021_v19 = vmax.f32 %v4386_v16, %v4384_v41  ;;  %v3250_v44 = vmov 1.0  }
 0x361   : > { %v4542_v9 = vsub.f32 %v1683_v0, %v1764_v56  ;;  %v4544_v49 = vsub.f32 %v2022_v30, %v2038_v33  ;;  %2570 = vrot.lane.b32.xlu0 %v4272_v1, %s3249_s13  ;;  %3081 = vset.pattern.permute.xlu2 %v5145_v15  ;;  %v1730_v50 = vpop.permute.xlu1 %1729  ;;  %v2666_v2 = vsel %vm1510_vm11, %v4261_v45, 0.0  ;;  %v2668_v56 = vsel %vm1510_vm11, %v4254_v38, 0.0 }
 0x362   : > { %5234 = vst [vmem:[#allocation26_spill] sm:$0xff] %v4536_v43  ;;  %1907 = vperm.xlu2 %3081, %v4267_v47   ;;  %v1763_v10 = vmax.f32 %v1730_v50, %v4381_v27  ;;  %v2037_v20 = vmin.f32 %v1730_v50, %v4381_v27  ;;  %2415 = vmatpush.msra.mxu0 %v3250_v44 }
 0x363   : > { %5235 = vst [vmem:[#allocation10_spill] sm:$0xff] %v4538_v6  ;;  %2936 = vmatpush.msra.mxu1 %v3250_v44  ;;  %2937 = vmatpush.msra.mxu2 %v3250_v44  ;;  %v2667_v16 = vadd.f32 %v2666_v2, %v2665_v54  ;;  %v1686_v33 = vmin.f32 %v4367_v52, %v4384_v41 }
 0x364   : > { %v4559_v53 = vsub.f32 %v1682_v32, %v1763_v10  ;;  %v4561_v17 = vsub.f32 %v2021_v19, %v2037_v20  ;;  %3083 = vset.pattern.permute.xlu1 %v5144_v48  ;;  %2416 = vmatpush.msra.mxu0 %v3250_v44  ;;  %v2025_v54 = vmax.f32 %v4367_v52, %v4384_v41  ;;  %v5238_v48 = vmov 4  }
 0x365   : > { %1854 = vperm.xlu1 %3083, %v4293_v60   ;;  %2939 = vmatpush.msra.mxu1 %v3250_v44  ;;  %v2669_v19 = vadd.f32 %v2668_v56, %v2667_v16  ;;  %v1685_v10 = vmin.f32 %v4403_v57, %v4384_v41 }
 0x366   : > { %v1746_v0 = vpop.permute.xlu0 %1745  ;;  %v4567_v30 = vpop.permute.xlu2 %1810  ;;  %2417 = vmatpush.msra.mxu0 %v3250_v44  ;;  %2940 = vmatpush.msra.mxu2 %v3250_v44 }
 0x367   : > { %v1767_v32 = vmax.f32 %v1746_v0, %v4381_v27  ;;  %v2041_v50 = vmin.f32 %v1746_v0, %v4381_v27  ;;  %2942 = vmatpush.msra.mxu1 %v3250_v44  ;;  %v2024_v0 = vmax.f32 %v4403_v57, %v4384_v41  ;;  %v2670_v57 = vsel %vm1510_vm11, %v4272_v1, 0.0  ;;  %2938 = vmatpush.msra.mxu3 %v3250_v44 }
 0x368   : > { %2418 = vmatpush.msra.mxu0 %v3250_v44  ;;  %2943 = vmatpush.msra.mxu2 %v3250_v44 }
 0x369   : > { %v4584_v20 = vsub.f32 %v1686_v33, %v1767_v32  ;;  %v4586_v2 = vsub.f32 %v2025_v54, %v2041_v50  ;;  %2576 = vrot.lane.b32.xlu0 %v4281_v23, %s3249_s13  ;;  %v1742_v52 = vpop.permute.xlu1 %1741  ;;  %2945 = vmatpush.msra.mxu1 %v3250_v44 }
 0x36a   : > { %3082 = vset.pattern.permute.xlu2 %v5238_v48  ;;  %v1766_v16 = vmax.f32 %v1742_v52, %v4381_v27  ;;  %v2040_v56 = vmin.f32 %v1742_v52, %v4381_v27  ;;  %2419 = vmatpush.msra.mxu0 %v3250_v44 }
 0x36b   : > { %5236 = vst [vmem:[#allocation25_spill] sm:$0xff] %v4584_v20  ;;  %2172 = vperm.xlu2 %3082, %v4287_v39   ;;  %2948 = vmatpush.msra.mxu1 %v3250_v44  ;;  %v2671_v39 = vadd.f32 %v2670_v57, %v2669_v19  ;;  %v4655_v57 = vperm.slane %v4364_v11, 1 }
 0x36c   : > { %5237 = vst [vmem:[#allocation7_spill] sm:$0xff] %v4586_v2  ;;  %v4599_v33 = vsub.f32 %v1685_v10, %v1766_v16  ;;  %v4601_v54 = vsub.f32 %v2024_v0, %v2040_v56  ;;  %2420 = vmatpush.msra.mxu0 %v3250_v44  ;;  %2946 = vmatpush.msra.mxu2 %v3250_v44  ;;  %v2676_v16 = vsel %vm1510_vm11, %v4281_v23, 0.0  ;;  %v4652_v56 = vperm.slane %v4375_v51, 1 }
 0x36d   : > { %3085 = vset.pattern.permute.xlu1 %v5238_v48  ;;  %2951 = vmatpush.msra.mxu1 %v3250_v44  ;;  %v1672_v2 = vmin.f32 %v4326_v40, %v4384_v41 }
 0x36e   : > { %5239 = vst [vmem:[#allocation31_spill] sm:$0xff] %v4599_v33  ;;  %v4609_v32 = vpop.permute.xlu2 %1818  ;;  %2136 = vperm.xlu1 %3085, %v4261_v45   ;;  %2421 = vmatpush.msra.mxu0 %v3250_v44  ;;  %v2672_v45 = vsel %vm1510_vm11, %v4267_v47, 0.0  ;;  %v2674_v47 = vsel %vm1510_vm11, %v4275_v7, 0.0 }
 0x36f   : > { %5240 = vst [vmem:[#allocation12_spill] sm:$0xff] %v4601_v54  ;;  %v4613_v50 = vpop.permute.xlu0 %1883  ;;  %2954 = vmatpush.msra.mxu1 %v3250_v44  ;;  %2949 = vmatpush.msra.mxu2 %v3250_v44  ;;  %v2673_v19 = vadd.f32 %v2672_v45, %v2671_v39  ;;  %v4661_v45 = vld [vmem:[#allocation2 + $0x48] sm:$0xff] }
 0x370   : > { %2422 = vmatpush.msra.mxu0 %v3250_v44  ;;  %2941 = vmatpush.msra.mxu3 %v3250_v44  ;;  %v2678_v11 = vsel %vm1510_vm11, %v4661_v45, 0.0 }
 0x371   : > { %2582 = vrot.lane.b32.xlu0 %v4290_v26, %s3249_s13  ;;  %2957 = vmatpush.msra.mxu1 %v3250_v44  ;;  %v2675_v52 = vadd.f32 %v2674_v47, %v2673_v19  ;;  %v1572_v19 = vrot.slane %v4349_v21, 1  ;;  %v1753_v47 = vmax.f32 %v4426_v8, %v4381_v27 }
 0x372   : > { %v4624_v1 = vpop.permute.xlu1 %1802  ;;  %2423 = vmatpush.msra.mxu0 %v3250_v44  ;;  %2952 = vmatpush.msra.mxu2 %v3250_v44 }
 0x373   : > { %3084 = vset.pattern.permute.xlu2 %v5145_v15  ;;  %2960 = vmatpush.msra.mxu1 %v3250_v44  ;;  %v2677_v23 = vadd.f32 %v2676_v16, %v2675_v52  ;;  %v1866_v51 = vmin.f32 %v4624_v1, %v4652_v56  ;;  %v1947_v52 = vmax.f32 %v4613_v50, %v4655_v57  ;;  %v5242_v15 = vmov 3  }
 0x374   : > { %1935 = vperm.xlu2 %3084, %v4293_v60   ;;  %2424 = vmatpush.msra.mxu0 %v3250_v44  ;;  %v1574_v43 = vmul.f32 %v1572_v19, %v4349_v21  ;;  %v2059_v21 = vmax.f32 %v4624_v1, %v4652_v56 }
 0x375   : > { %2963 = vmatpush.msra.mxu1 %v3250_v44  ;;  %2955 = vmatpush.msra.mxu2 %v3250_v44  ;;  %v2679_v6 = vadd.f32 %v2678_v11, %v2677_v23  ;;  %v1963_v20 = vsub.f32 %v1866_v51, %v1947_v52  ;;  %v1769_v23 = vsub.f32 %v1672_v2, %v1753_v47 }
 0x376   : > { %v4636_v10 = vpop.permute.xlu2 %1830  ;;  %2164 = vperm.xlu1 %3085, %v4284_v37   ;;  %2425 = vmatpush.msra.mxu0 %v3250_v44  ;;  %v4701_v11 = vperm.slane %v1574_v43, 4  ;;  %v2027_v52 = vmin.f32 %v4426_v8, %v4381_v27  ;;  %v2011_v43 = vmax.f32 %v4326_v40, %v4384_v41  ;;  %v4715_v8 = vld [vmem:[#allocation2 + $0x60] sm:$0xff] }
 0x377   : > { %5241 = vst [vmem:[#allocation32_spill] sm:$0xff] %v4636_v10  ;;  %2966 = vmatpush.msra.mxu1 %v3250_v44  ;;  %2958 = vmatpush.msra.mxu2 %v3250_v44  ;;  %v1979_v33 = vmax.f32 %v1963_v20, 0.0  ;;  %v1785_v2 = vmax.f32 %v1769_v23, 0.0  ;;  %v2684_v40 = vsel %vm1510_vm11, %v4715_v8, 0.0 }
 0x378   : > { %v4642_v0 = vpop.permute.xlu0 %1806  ;;  %2426 = vmatpush.msra.mxu0 %v3250_v44  ;;  %2944 = vmatpush.msra.mxu3 %v3250_v44  ;;  %5243 = vst [vmem:[#allocation13_spill] sm:$0xff] %v4715_v8  ;;  %v2043_v1 = vsub.f32 %v2011_v43, %v2027_v52  ;;  %v1545_v43 = vld [vmem:[%s467_s16] sm:$0x1] }
 0x379   : > { %2588 = vrot.lane.b32.xlu0 %v4299_v29, %s3249_s13  ;;  %2969 = vmatpush.msra.mxu1 %v3250_v44  ;;  %vm1546_vm12 = vcmp.gt.f32.partialorder %v1545_v43, 0.0 }
 0x37a   : > { %v4657_v39 = vpop.permute.xlu1 %1814  ;;  %2427 = vmatpush.msra.mxu0 %v3250_v44  ;;  %2961 = vmatpush.msra.mxu2 %v3250_v44 }
 0x37b   : > { %2972 = vmatpush.msra.mxu1 %v3250_v44  ;;  %2947 = vmatpush.msra.mxu3 %v3250_v44 }
 0x37c   : > { %1911 = vperm.xlu2 %3084, %v4275_v7   ;;  %2428 = vmatpush.msra.mxu0 %v3250_v44 }
 0x37d   : > { %2975 = vmatpush.msra.mxu1 %v3250_v44  ;;  %2964 = vmatpush.msra.mxu2 %v3250_v44 }
 0x37e   : > { %v4678_v16 = vpop.permute.xlu2 %1842  ;;  %3088 = vset.pattern.permute.xlu1 %v5242_v15  ;;  %2429 = vmatpush.msra.mxu0 %v3250_v44  ;;  %v2680_v15 = vsel %vm1510_vm11, %v4284_v37, 0.0  ;;  %v2075_v37 = vmin.f32 %v4613_v50, %v4655_v57 }
 0x37f   : > { %1858 = vperm.xlu1 %3088, %v4299_v29   ;;  %2978 = vmatpush.msra.mxu1 %v3250_v44  ;;  %v2681_v51 = vadd.f32 %v2680_v15, %v2679_v6  ;;  %v2682_v6 = vsel %vm1510_vm11, %v4290_v26, 0.0 }
 0x380   : > { %v4687_v54 = vpop.permute.xlu0 %1826  ;;  %2430 = vmatpush.msra.mxu0 %v3250_v44  ;;  %2967 = vmatpush.msra.mxu2 %v3250_v44  ;;  %v2091_v27 = vsub.f32 %v2059_v21, %v2075_v37 }
 0x381   : > { %2981 = vmatpush.msra.mxu1 %v3250_v44  ;;  %2950 = vmatpush.msra.mxu3 %v3250_v44  ;;  %v2683_v50 = vadd.f32 %v2682_v6, %v2681_v51  ;;  %v4730_v51 = vld [vmem:[#allocation2 + $0x68] sm:$0xff] }
 0x382   : > { %v4697_v19 = vpop.permute.xlu1 %1822  ;;  %2970 = vmatpush.msra.mxu2 %v3250_v44  ;;  %v2107_v41 = vmul.f32 %v2091_v27, %v2043_v1  ;;  %5244 = vst [vmem:[#allocation28_spill] sm:$0xff] %v4730_v51  ;;  %v2686_v37 = vsel %vm1510_vm11, %v4730_v51, 0.0  ;;  %v2688_v27 = vsel %vm1510_vm11, %v4299_v29, 0.0  ;;  %v2063_v1 = vmax.f32 %v4609_v32, %v4652_v56 }
 0x383   : > { %2953 = vmatpush.msra.mxu3 %v3250_v44  ;;  %v2929_v51 = vsel %vm1546_vm12, 1.0, %v5198_v63 }
 0x384   : > { %3087 = vset.pattern.permute.xlu2 %v5238_v48  ;;  %2973 = vmatpush.msra.mxu2 %v3250_v44  ;;  %v4771_v24 = vperm.slane %v2929_v51, 0 }
 0x385   : > { %2176 = vperm.xlu2 %3087, %v4293_v60   ;;  %2956 = vmatpush.msra.mxu3 %v3250_v44  ;;  %v1995_v60 = vmul.f32 %v1979_v33, %v1785_v2  ;;  %v2685_v33 = vadd.f32 %v2684_v40, %v2683_v50  ;;  %v1870_v2 = vmin.f32 %v4609_v32, %v4652_v56 }
 0x386   : > { %2976 = vmatpush.msra.mxu2 %v3250_v44 }
 0x387   : > { %v2125_v20 = vpop.permute.xlu2 %2124  ;;  %3090 = vset.pattern.permute.xlu1 %v5238_v48  ;;  %2959 = vmatpush.msra.mxu3 %v3250_v44  ;;  %v2687_v6 = vadd.f32 %v2686_v37, %v2685_v33  ;;  %v4755_v37 = vld [vmem:[#allocation2 + $0x78] sm:$0xff]  ;;  %v2220_v43 = vmul.f32 %v2107_v41, %v1995_v60 }
 0x388   : > { %v2188_v47 = vadd.f32 %v4701_v11, %v2125_v20  ;;  %v4721_v15 = vpop.permute.xlu0 %1838  ;;  %2152 = vperm.xlu1 %3090, %v4275_v7   ;;  %2979 = vmatpush.msra.mxu2 %v3250_v44  ;;  %v5245_v7 = vmov 1   ;;  %v2690_v32 = vsel %vm1510_vm11, %v4755_v37, 0.0 }
 0x389   : > { %2962 = vmatpush.msra.mxu3 %v3250_v44  ;;  %v2689_v34 = vadd.f32 %v2688_v27, %v2687_v6 }
 0x38a   : > { %v2204_v23 = vsub.f32 %v2188_v47, %v1995_v60  ;;  %v4728_v21 = vpop.permute.xlu1 %1834  ;;  %2982 = vmatpush.msra.mxu2 %v3250_v44 }
 0x38b   : > { %2965 = vmatpush.msra.mxu3 %v3250_v44  ;;  %v2691_v6 = vadd.f32 %v2690_v32, %v2689_v34 }
 0x38c   : > { %v2284_v52 = vmul.f32 %v2204_v23, %v2107_v41  ;;  %v2236_v47 = vsub.f32 %v2107_v41, %v2204_v23 }
 0x38d   : > { %3089 = vset.pattern.permute.xlu2 %v5245_v7  ;;  %2968 = vmatpush.msra.mxu3 %v3250_v44  ;;  %v2692_v34 = vrot.slane %v2691_v6, 4 }
 0x38e   : > { %3161 = vrcp.f32 %v2284_v52  ;;  %1939 = vperm.xlu2 %3089, %v4299_v29   ;;  %v2252_v5 = vmul.f32 %v2236_v47, %v2204_v23 }
 0x38f   : > { %2971 = vmatpush.msra.mxu3 %v3250_v44  ;;  %v4786_v32 = vadd.f32 %v2692_v34, %v2691_v6  ;;  %v2064_v6 = vmax.f32 %v4697_v19, %v4652_v56  ;;  %v1868_v34 = vmin.f32 %v4567_v30, %v4652_v56 }
 0x390   : > { %v4748_v50 = vpop.permute.xlu0 %1850  ;;  %v1900_v20 = vpop.permute.xlu2 %1899  ;;  %2180 = vperm.xlu1 %3090, %v4299_v29   ;;  %v2268_v63 = vsub.f32 %v2220_v43, %v2252_v5 }
 0x391   : > { %v1951_v40 = vmax.f32 %v1900_v20, %v4655_v57  ;;  %v2079_v33 = vmin.f32 %v1900_v20, %v4655_v57  ;;  %2974 = vmatpush.msra.mxu3 %v3250_v44 }
 0x392   : > { %v4758_v36 = vpop.permute.xlu1 %1846 }
 0x393   : > { %v1967_v10 = vsub.f32 %v1870_v2, %v1951_v40  ;;  %v2095_v8 = vsub.f32 %v2063_v1, %v2079_v33  ;;  %2977 = vmatpush.msra.mxu3 %v3250_v44 }
 0x394   : > { %v3162_v29 = vpop.eup %3161 }
 0x395   : > { %v1983_v20 = vmax.f32 %v1967_v10, 0.0  ;;  %v2316_v18 = vmul.f32 %v3162_v29, %v2284_v52  ;;  %v2111_v2 = vmul.f32 %v2095_v8, %v4479_v59  ;;  %2980 = vmatpush.msra.mxu3 %v3250_v44  ;;  %v2060_v8 = vmax.f32 %v4642_v0, %v4652_v56 }
 0x396   : > { %3091 = vset.pattern.permute.xlu2 %v5238_v48 }
 0x397   : > { %2168 = vperm.xlu2 %3091, %v4290_v26   ;;  %v1999_v27 = vmul.f32 %v1983_v20, %v1789_v62  ;;  %v2332_v1 = vsub.f32 2.0, %v2316_v18  ;;  %2983 = vmatpush.msra.mxu3 %v3250_v44  ;;  %v1867_v26 = vmin.f32 %v4642_v0, %v4652_v56  ;;  %v1788_v0 = vmax.f32 %v4413_v42, 0.0 }
 0x398   : > { %2184 = vperm.xlu1 %3090, %v4296_v14  }
 0x399   : > { %v2129_v10 = vpop.permute.xlu0 %2128  ;;  %v2141_v23 = vpop.permute.xlu2 %2140  ;;  %v4773_v52 = vmul.f32 %v2111_v2, %v1999_v27  ;;  %v2348_v48 = vmul.f32 %v3162_v29, %v2332_v1  ;;  %v1786_v29 = vmax.f32 %v4395_v13, 0.0  ;;  %v1790_v13 = vmax.f32 %v4465_v28, 0.0 }
 0x39a   : > { %v2192_v59 = vadd.f32 %v4701_v11, %v2141_v23  ;;  %v2189_v1 = vadd.f32 %v4701_v11, %v2129_v10  ;;  %v1874_v28 = vmin.f32 %v4728_v21, %v4652_v56 }
 0x39b   : > { %v1888_v18 = vpop.permute.xlu1 %1887  ;;  %v2364_v62 = vmul.f32 %v2348_v48, %v2268_v63  ;;  %v2067_v48 = vmax.f32 %v4728_v21, %v4652_v56 }
 0x39c   : > { %v2208_v60 = vsub.f32 %v2192_v59, %v1999_v27  ;;  %v1948_v41 = vmax.f32 %v1888_v18, %v4655_v57  ;;  %v2076_v51 = vmin.f32 %v1888_v18, %v4655_v57 }
 0x39d   : > { %v2383_v5 = vmul.f32 %v4771_v24, %v2364_v62 }
 0x39e   : > { %v2240_v47 = vsub.f32 %v2111_v2, %v2208_v60  ;;  %v2288_v44 = vmul.f32 %v2208_v60, %v2111_v2  ;;  %v1964_v40 = vsub.f32 %v1867_v26, %v1948_v41  ;;  %v2092_v33 = vsub.f32 %v2060_v8, %v2076_v51 }
 0x39f   : > { %3093 = vset.pattern.permute.xlu2 %v5245_v7  ;;  %2431 = vmatmul.f32.vlgmr.msra.gmra.mxu0 %v2383_v5  ;;  %v1787_v2 = vmax.f32 %v4443_v35, 0.0  ;;  %v1871_v7 = vmin.f32 %v4697_v19, %v4652_v56 }
 0x3a0   : > { %v4789_v20 = vmul.f32 %v2240_v47, %v2208_v60  ;;  %3163 = vrcp.f32 %v2288_v44  ;;  %v1980_v43 = vmax.f32 %v1964_v40, 0.0  ;;  %1943 = vperm.xlu2 %3093, %v4296_v14   ;;  %2562 = vrot.lane.b32.xlu1 %v4242_v25, %s3249_s13  ;;  %v2108_v14 = vmul.f32 %v2092_v33, %v4397_v58 }
 0x3a1   : > { %v4800_v27 = vpop.permute.xlu0 %2148  ;;  %v2061_v40 = vmax.f32 %v4567_v30, %v4652_v56  ;;  %v2062_v30 = vmax.f32 %v4657_v39, %v4652_v56 }
 0x3a2   : > { %v1996_v23 = vmul.f32 %v1980_v43, %v1786_v29  ;;  %v1904_v63 = vpop.permute.xlu2 %1903  ;;  %v2272_v25 = vsub.f32 %v4773_v52, %v4789_v20  ;;  %v1793_v52 = vmax.f32 %v4499_v12, 0.0  ;;  %v1869_v12 = vmin.f32 %v4657_v39, %v4652_v56 }
 0x3a3   : > { %v1952_v59 = vmax.f32 %v1904_v63, %v4655_v57  ;;  %v2080_v19 = vmin.f32 %v1904_v63, %v4655_v57  ;;  %v1916_v26 = vpop.permute.xlu1 %1915 }
 0x3a4   : > { %v2205_v18 = vsub.f32 %v2189_v1, %v1996_v23  ;;  %v1955_v10 = vmax.f32 %v1916_v26, %v4655_v57  ;;  %v2083_v58 = vmin.f32 %v1916_v26, %v4655_v57  ;;  %v4814_v62 = vmul.f32 %v2108_v14, %v1996_v23  ;;  %v3209_v1 = vld [vmem:[#allocation2] sm:$0xff] }
 0x3a5   : > { %v1968_v8 = vsub.f32 %v1871_v7, %v1952_v59  ;;  %v2096_v60 = vsub.f32 %v2064_v6, %v2080_v19 }
 0x3a6   : > { %v3164_v21 = vpop.eup %3163  ;;  %v1971_v41 = vsub.f32 %v1874_v28, %v1955_v10  ;;  %v2099_v51 = vsub.f32 %v2067_v48, %v2083_v58  ;;  %v2237_v5 = vsub.f32 %v2108_v14, %v2205_v18  ;;  %v2285_v47 = vmul.f32 %v2205_v18, %v2108_v14 }
 0x3a7   : > { %v1984_v33 = vmax.f32 %v1968_v8, 0.0  ;;  %v4822_v29 = vmul.f32 %v2096_v60, %v4467_v31  ;;  %v2320_v20 = vmul.f32 %v3164_v21, %v2288_v44  ;;  %v1875_v31 = vmin.f32 %v4721_v15, %v4652_v56 }
 0x3a8   : > { %v1987_v43 = vmax.f32 %v1971_v41, 0.0  ;;  %2560 = vrot.lane.b32.xlu2 %v3209_v1, %s3249_s13  ;;  %2568 = vrot.lane.b32.xlu1 %v4254_v38, %s3249_s13  ;;  %v4829_v7 = vmul.f32 %v2237_v5, %v2205_v18  ;;  %3165 = vrcp.f32 %v2285_v47  ;;  %v2068_v44 = vmax.f32 %v4721_v15, %v4652_v56 }
 0x3a9   : > { %v2336_v6 = vsub.f32 2.0, %v2320_v20  ;;  %v4838_v23 = vmul.f32 %v2099_v51, %v4501_v46  ;;  %v4842_v48 = vmul.f32 %v1984_v33, %v1790_v13  ;;  %v1794_v20 = vmax.f32 %v4459_v61, 0.0 }
 0x3aa   : > { %v1896_v14 = vpop.permute.xlu0 %1895  ;;  %v1920_v63 = vpop.permute.xlu2 %1919  ;;  %v2003_v28 = vmul.f32 %v1987_v43, %v1793_v52  ;;  %v2269_v38 = vsub.f32 %v4814_v62, %v4829_v7  ;;  %v2694_v61 = vrot.slane %v4786_v32, 2 }
 0x3ab   : > { %v1950_v39 = vmax.f32 %v1896_v14, %v4655_v57  ;;  %v2078_v59 = vmin.f32 %v1896_v14, %v4655_v57  ;;  %v1956_v19 = vmax.f32 %v1920_v63, %v4655_v57  ;;  %v2084_v15 = vmin.f32 %v1920_v63, %v4655_v57  ;;  %v1892_v26 = vpop.permute.xlu1 %1891 }
 0x3ac   : > { %v1949_v46 = vmax.f32 %v1892_v26, %v4655_v57  ;;  %v2077_v18 = vmin.f32 %v1892_v26, %v4655_v57  ;;  %v2352_v10 = vmul.f32 %v3164_v21, %v2336_v6  ;;  %v4851_v58 = vmul.f32 %v4838_v23, %v2003_v28 }
 0x3ad   : > { %v1966_v62 = vsub.f32 %v1869_v12, %v1950_v39  ;;  %v2094_v13 = vsub.f32 %v2062_v30, %v2078_v59  ;;  %v1972_v52 = vsub.f32 %v1875_v31, %v1956_v19  ;;  %v2100_v8 = vsub.f32 %v2068_v44, %v2084_v15  ;;  %v3210_v30 = vld [vmem:[#allocation2 + $0x18] sm:$0xff] }
 0x3ae   : > { %v3166_v60 = vpop.eup %3165  ;;  %v1965_v41 = vsub.f32 %v1868_v34, %v1949_v46  ;;  %v2093_v51 = vsub.f32 %v2061_v40, %v2077_v18  ;;  %v2368_v5 = vmul.f32 %v2352_v10, %v2272_v25  ;;  %v4855_v33 = vmul.f32 %v4822_v29, %v4842_v48  ;;  %v3211_v25 = vld [vmem:[#allocation2 + $0x38] sm:$0xff] }
 0x3af   : > { %v1982_v43 = vmax.f32 %v1966_v62, 0.0  ;;  %v4859_v21 = vmul.f32 %v2094_v13, %v4415_v4  ;;  %v1988_v1 = vmax.f32 %v1972_v52, 0.0  ;;  %v2317_v40 = vmul.f32 %v3166_v60, %v2285_v47 }
 0x3b0   : > { %v1981_v7 = vmax.f32 %v1965_v41, 0.0  ;;  %v2109_v12 = vmul.f32 %v2093_v51, %v4445_v3  ;;  %2566 = vrot.lane.b32.xlu2 %v3210_v30, %s3249_s13  ;;  %v2387_v34 = vmul.f32 %v4771_v24, %v2368_v5  ;;  %2574 = vrot.lane.b32.xlu1 %v3211_v25, %s3249_s13  ;;  %v4866_v31 = vmul.f32 %v2100_v8, %v4461_v22 }
 0x3b1   : > { %v4869_v4 = vmul.f32 %v1988_v1, %v1794_v20  ;;  %v4873_v44 = vmul.f32 %v1982_v43, %v1788_v0  ;;  %v1876_v3 = vmin.f32 %v4678_v16, %v4652_v56  ;;  %v2069_v6 = vmax.f32 %v4678_v16, %v4652_v56  ;;  %v3212_v20 = vld [vmem:[#allocation2 + $0x30] sm:$0xff] }
 0x3b2   : > { %2443 = vmatmul.f32.vlgmr.msra.gmra.mxu1 %v2387_v34  ;;  %v1924_v14 = vpop.permute.xlu0 %1923  ;;  %v1997_v22 = vmul.f32 %v1981_v7, %v1787_v2  ;;  %v2333_v47 = vsub.f32 2.0, %v2317_v40  ;;  %v4896_v62 = vadd.f32 %v2694_v61, %v4786_v32  ;;  %v1795_v13 = vmax.f32 %v4559_v53, 0.0  ;;  %v3213_v43 = vld [vmem:[#allocation2 + $0x50] sm:$0xff] }
 0x3b3   : > { %v1957_v63 = vmax.f32 %v1924_v14, %v4655_v57  ;;  %v2085_v39 = vmin.f32 %v1924_v14, %v4655_v57  ;;  %v2133_v59 = vpop.permute.xlu2 %2132  ;;  %v4885_v42 = vmul.f32 %v4866_v31, %v4869_v4  ;;  %v4889_v0 = vmul.f32 %v4859_v21, %v4873_v44 }
 0x3b4   : > { %v2190_v16 = vadd.f32 %v4701_v11, %v2133_v59  ;;  %v4892_v19 = vmul.f32 %v2109_v12, %v1997_v22  ;;  %v2157_v35 = vpop.permute.xlu1 %2156  ;;  %v2349_v2 = vmul.f32 %v3166_v60, %v2333_v47  ;;  %v1796_v51 = vmax.f32 %v4542_v9, 0.0 }
 0x3b5   : > { %v1973_v15 = vsub.f32 %v1876_v3, %v1957_v63  ;;  %v2101_v26 = vsub.f32 %v2069_v6, %v2085_v39  ;;  %v2196_v46 = vadd.f32 %v4701_v11, %v2157_v35  ;;  %v1872_v53 = vmin.f32 %v4687_v54, %v4652_v56 }
 0x3b6   : > { %v2206_v18 = vsub.f32 %v2190_v16, %v1997_v22  ;;  %v2365_v10 = vmul.f32 %v2349_v2, %v2269_v38  ;;  %v1877_v9 = vmin.f32 %v4758_v36, %v4652_v56  ;;  %v2070_v1 = vmax.f32 %v4758_v36, %v4652_v56 }
 0x3b7   : > { %v1989_v52 = vmax.f32 %v1973_v15, 0.0  ;;  %v4900_v8 = vmul.f32 %v2101_v26, %v4561_v17  ;;  %v2212_v41 = vsub.f32 %v2196_v46, %v2003_v28  ;;  %v1878_v40 = vmin.f32 %v4748_v50, %v4652_v56 }
 0x3b8   : > { %v2238_v5 = vsub.f32 %v2109_v12, %v2206_v18  ;;  %v2286_v60 = vmul.f32 %v2206_v18, %v2109_v12  ;;  %2572 = vrot.lane.b32.xlu2 %v3212_v20, %s3249_s13  ;;  %2580 = vrot.lane.b32.xlu1 %v3213_v43, %s3249_s13  ;;  %v2384_v32 = vmul.f32 %v4771_v24, %v2365_v10  ;;  %v1791_v46 = vmax.f32 %v4429_v55, 0.0  ;;  %v5246_v10 = vld [vmem:[#allocation28_spill] sm:$0xff]  ;;  %v5248_v20 = vld [vmem:[#allocation21_spill] sm:$0xff] }
 0x3b9   : > { %v2244_v38 = vsub.f32 %v4838_v23, %v2212_v41  ;;  %v2292_v17 = vmul.f32 %v2212_v41, %v4838_v23  ;;  %v4910_v28 = vmul.f32 %v1989_v52, %v1795_v13  ;;  %v2065_v23 = vmax.f32 %v4687_v54, %v4652_v56 }
 0x3ba   : > { %v2254_v7 = vmul.f32 %v2238_v5, %v2206_v18  ;;  %3167 = vrcp.f32 %v2286_v60  ;;  %v1928_v12 = vpop.permute.xlu0 %1927  ;;  %2434 = vmatmul.f32.gmra.mxu0 %v2384_v32  ;;  %v2071_v54 = vmax.f32 %v4748_v50, %v4652_v56  ;;  %v1797_v43 = vmax.f32 %v5248_v20, 0.0 }
 0x3bb   : > { %v2260_v30 = vmul.f32 %v2244_v38, %v2212_v41  ;;  %3169 = vrcp.f32 %v2292_v17  ;;  %v1958_v34 = vmax.f32 %v1928_v12, %v4655_v57  ;;  %v2086_v25 = vmin.f32 %v1928_v12, %v4655_v57 }
 0x3bc   : > { %v1908_v61 = vpop.permute.xlu2 %1907  ;;  %v2270_v3 = vsub.f32 %v4892_v19, %v2254_v7  ;;  %v4925_v36 = vmul.f32 %v4900_v8, %v4910_v28  ;;  %v2696_v55 = vrot.slane %v4896_v62, 1  ;;  %v5249_v7 = vld [vmem:[#allocation23_spill] sm:$0xff] }
 0x3bd   : > { %v1974_v6 = vsub.f32 %v1877_v9, %v1958_v34  ;;  %v2102_v14 = vsub.f32 %v2070_v1, %v2086_v25  ;;  %v1953_v22 = vmax.f32 %v1908_v61, %v4655_v57  ;;  %v2081_v47 = vmin.f32 %v1908_v61, %v4655_v57  ;;  %v1932_v63 = vpop.permute.xlu1 %1931 }
 0x3be   : > { %v1959_v39 = vmax.f32 %v1932_v63, %v4655_v57  ;;  %v2087_v59 = vmin.f32 %v1932_v63, %v4655_v57  ;;  %v2276_v16 = vsub.f32 %v4851_v58, %v2260_v30  ;;  %v5247_v58 = vld [vmem:[#allocation4_spill] sm:$0xff] }
 0x3bf   : > { %v1990_v19 = vmax.f32 %v1974_v6, 0.0  ;;  %v4935_v35 = vmul.f32 %v2102_v14, %v4544_v49  ;;  %v1969_v2 = vsub.f32 %v1872_v53, %v1953_v22  ;;  %v2097_v15 = vsub.f32 %v2065_v23, %v2081_v47 }
 0x3c0   : > { %v3168_v26 = vpop.eup %3167  ;;  %2578 = vrot.lane.b32.xlu2 %v4661_v45, %s3249_s13  ;;  %v1975_v18 = vsub.f32 %v1878_v40, %v1959_v39  ;;  %v2103_v50 = vsub.f32 %v2071_v54, %v2087_v59  ;;  %2586 = vrot.lane.b32.xlu1 %v5246_v10, %s3249_s13  ;;  %v2194_v45 = vadd.f32 %v4701_v11, %v4800_v27  ;;  %v5250_v39 = vld [vmem:[#allocation13_spill] sm:$0xff] }
 0x3c1   : > { %v3170_v13 = vpop.eup %3169  ;;  %v1985_v52 = vmax.f32 %v1969_v2, 0.0  ;;  %v2113_v41 = vmul.f32 %v2097_v15, %v5247_v58  ;;  %v2318_v5 = vmul.f32 %v3168_v26, %v2286_v60  ;;  %v4943_v49 = vmul.f32 %v1990_v19, %v1796_v51 }
 0x3c2   : > { %v1991_v32 = vmax.f32 %v1975_v18, 0.0  ;;  %v2324_v53 = vmul.f32 %v3170_v13, %v2292_v17  ;;  %v2119_v12 = vmul.f32 %v2103_v50, %v5249_v7  ;;  %v2697_v27 = vadd.f32 %v2696_v55, %v4896_v62 }
 0x3c3   : > { %v2001_v38 = vmul.f32 %v1985_v52, %v1791_v46  ;;  %v2334_v9 = vsub.f32 2.0, %v2318_v5  ;;  %v4951_v1 = vmul.f32 %v4935_v35, %v4943_v49 }
 0x3c4   : > { %v2007_v60 = vmul.f32 %v1991_v32, %v1797_v43  ;;  %v2340_v51 = vsub.f32 2.0, %v2324_v53 }
 0x3c5   : > { %v2210_v30 = vsub.f32 %v2194_v45, %v2001_v38  ;;  %v2173_v34 = vpop.permute.xlu2 %2172  ;;  %v2350_v25 = vmul.f32 %v3168_v26, %v2334_v9  ;;  %v2226_v23 = vmul.f32 %v2113_v41, %v2001_v38 }
 0x3c6   : > { %v2200_v40 = vadd.f32 %v4701_v11, %v2173_v34  ;;  %v4955_v17 = vmul.f32 %v2119_v12, %v2007_v60  ;;  %v2145_v61 = vpop.permute.xlu1 %2144  ;;  %v2356_v6 = vmul.f32 %v3170_v13, %v2340_v51 }
 0x3c7   : > { %v2193_v14 = vadd.f32 %v4701_v11, %v2145_v61  ;;  %v2366_v22 = vmul.f32 %v2350_v25, %v2270_v3  ;;  %v2242_v47 = vsub.f32 %v2113_v41, %v2210_v30  ;;  %v2290_v63 = vmul.f32 %v2210_v30, %v2113_v41 }
 0x3c8   : > { %v2216_v54 = vsub.f32 %v2200_v40, %v2007_v60  ;;  %2584 = vrot.lane.b32.xlu2 %v5250_v39, %s3249_s13  ;;  %2701 = vrot.lane.b32.xlu1 %v2697_v27, %s3249_s13  ;;  %v2372_v59 = vmul.f32 %v2356_v6, %v2276_v16 }
 0x3c9   : > { %v2209_v19 = vsub.f32 %v2193_v14, %v4842_v48  ;;  %v2385_v2 = vmul.f32 %v4771_v24, %v2366_v22  ;;  %v2258_v15 = vmul.f32 %v2242_v47, %v2210_v30  ;;  %3171 = vrcp.f32 %v2290_v63 }
 0x3ca   : > { %v2248_v62 = vsub.f32 %v2119_v12, %v2216_v54  ;;  %v2296_v26 = vmul.f32 %v2216_v54, %v2119_v12  ;;  %v2391_v46 = vmul.f32 %v4771_v24, %v2372_v59  ;;  %v5251_v12 = vld [vmem:[#allocation32_spill] sm:$0xff] }
 0x3cb   : > { %v2241_v3 = vsub.f32 %v4822_v29, %v2209_v19  ;;  %v2289_v18 = vmul.f32 %v2209_v19, %v4822_v29  ;;  %2437 = vmatmul.f32.gmra.mxu0 %v2385_v2  ;;  %v2274_v50 = vsub.f32 %v2226_v23, %v2258_v15  ;;  %v1873_v60 = vmin.f32 %v5251_v12, %v4652_v56  ;;  %v5252_v15 = vld [vmem:[#allocation22_spill] sm:$0xff] }
 0x3cc   : > { %v2264_v10 = vmul.f32 %v2248_v62, %v2216_v54  ;;  %3173 = vrcp.f32 %v2296_v26  ;;  %2455 = vmatmul.f32.vlgmr.msra.gmra.mxu2 %v2391_v46  ;;  %v1792_v62 = vmax.f32 %v5252_v15, 0.0  ;;  %v5253_v46 = vld [vmem:[#allocation24_spill] sm:$0xff] }
 0x3cd   : > { %v2257_v16 = vmul.f32 %v2241_v3, %v2209_v19  ;;  %3175 = vrcp.f32 %v2289_v18 }
 0x3ce   : > { %v1936_v48 = vpop.permute.xlu2 %1935  ;;  %v2161_v13 = vpop.permute.xlu1 %2160  ;;  %v2280_v52 = vsub.f32 %v4955_v17, %v2264_v10 }
 0x3cf   : > { %v3172_v58 = vpop.eup %3171  ;;  %v2197_v41 = vadd.f32 %v4701_v11, %v2161_v13  ;;  %v2273_v5 = vsub.f32 %v4855_v33, %v2257_v16  ;;  %v2088_v27 = vmin.f32 %v1936_v48, %v4655_v57 }
 0x3d0   : > { %2590 = vrot.lane.b32.xlu2 %v4755_v37, %s3249_s13  ;;  %v2322_v29 = vmul.f32 %v3172_v58, %v2290_v63  ;;  %v2066_v37 = vmax.f32 %v5251_v12, %v4652_v56 }
 0x3d1   : > { %v2213_v20 = vsub.f32 %v2197_v41, %v4869_v4  ;;  %v1960_v4 = vmax.f32 %v1936_v48, %v4655_v57 }
 0x3d2   : > { %v3174_v43 = vpop.eup %3173  ;;  %v2338_v32 = vsub.f32 2.0, %v2322_v29 }
 0x3d3   : > { %v3176_v55 = vpop.eup %3175  ;;  %v2245_v53 = vsub.f32 %v4866_v31, %v2213_v20  ;;  %v2293_v45 = vmul.f32 %v2213_v20, %v4866_v31  ;;  %v2328_v38 = vmul.f32 %v3174_v43, %v2296_v26 }
 0x3d4   : > { %v2321_v9 = vmul.f32 %v3176_v55, %v2289_v18  ;;  %v2354_v7 = vmul.f32 %v3172_v58, %v2338_v32  ;;  %v5254_v18 = vld [vmem:[#allocation31_spill] sm:$0xff] }
 0x3d5   : > { %v2261_v33 = vmul.f32 %v2245_v53, %v2213_v20  ;;  %3177 = vrcp.f32 %v2293_v45  ;;  %v2344_v51 = vsub.f32 2.0, %v2328_v38 }
 0x3d6   : > { %v1912_v30 = vpop.permute.xlu2 %1911  ;;  %v2337_v34 = vsub.f32 2.0, %v2321_v9  ;;  %v2370_v25 = vmul.f32 %v2354_v7, %v2274_v50  ;;  %v1798_v50 = vmax.f32 %v5254_v18, 0.0 }
 0x3d7   : > { %v1954_v23 = vmax.f32 %v1912_v30, %v4655_v57  ;;  %v2082_v31 = vmin.f32 %v1912_v30, %v4655_v57  ;;  %v1855_v40 = vpop.permute.xlu1 %1854  ;;  %v2360_v17 = vmul.f32 %v3174_v43, %v2344_v51  ;;  %v2277_v61 = vsub.f32 %v4885_v42, %v2261_v33 }
 0x3d8   : > { %v1879_v6 = vmin.f32 %v1855_v40, %v4652_v56  ;;  %v2072_v14 = vmax.f32 %v1855_v40, %v4652_v56  ;;  %v2353_v22 = vmul.f32 %v3176_v55, %v2337_v34  ;;  %v2389_v33 = vmul.f32 %v4771_v24, %v2370_v25 }
 0x3d9   : > { %v1970_v47 = vsub.f32 %v1873_v60, %v1954_v23  ;;  %v2098_v63 = vsub.f32 %v2066_v37, %v2082_v31  ;;  %v2376_v54 = vmul.f32 %v2360_v17, %v2280_v52  ;;  %v5255_v52 = vld [vmem:[#allocation12_spill] sm:$0xff] }
 0x3da   : > { %v1976_v39 = vsub.f32 %v1879_v6, %v1960_v4  ;;  %v2104_v59 = vsub.f32 %v2072_v14, %v2088_v27  ;;  %v2369_v19 = vmul.f32 %v2353_v22, %v2273_v5 }
 0x3db   : > { %v3178_v2 = vpop.eup %3177  ;;  %v1986_v26 = vmax.f32 %v1970_v47, 0.0  ;;  %v4988_v3 = vmul.f32 %v2098_v63, %v5253_v46  ;;  %v2395_v42 = vmul.f32 %v4771_v24, %v2376_v54 }
 0x3dc   : > { %v1992_v10 = vmax.f32 %v1976_v39, 0.0  ;;  %v2388_v16 = vmul.f32 %v4771_v24, %v2369_v19  ;;  %v2325_v48 = vmul.f32 %v3178_v2, %v2293_v45  ;;  %v2120_v58 = vmul.f32 %v2104_v59, %v5255_v52  ;;  %v5256_v52 = vld [vmem:[#allocation25_spill] sm:$0xff] }
 0x3dd   : > { %2467 = vmatmul.f32.vlgmr.msra.gmra.mxu3 %v2395_v42  ;;  %v4993_v13 = vmul.f32 %v1986_v26, %v1792_v62 }
 0x3de   : > { %v2008_v41 = vmul.f32 %v1992_v10, %v1798_v50  ;;  %2446 = vmatmul.f32.gmra.mxu1 %v2388_v16  ;;  %v2341_v5 = vsub.f32 2.0, %v2325_v48 }
 0x3df   : > { %v2177_v29 = vpop.permute.xlu2 %2176  ;;  %v4998_v20 = vmul.f32 %v4988_v3, %v4993_v13 }
 0x3e0   : > { %v2201_v43 = vadd.f32 %v4701_v11, %v2177_v29  ;;  %v2233_v32 = vmul.f32 %v2120_v58, %v2008_v41  ;;  %v2137_v55 = vpop.permute.xlu1 %2136  ;;  %v2357_v53 = vmul.f32 %v3178_v2, %v2341_v5  ;;  %v1863_v29 = vpop.permute.xlu0 %1862 }
 0x3e1   : > { %v2191_v45 = vadd.f32 %v4701_v11, %v2137_v55 }
 0x3e2   : > { %v2217_v38 = vsub.f32 %v2201_v43, %v2008_v41  ;;  %v2373_v9 = vmul.f32 %v2357_v53, %v2277_v61 }
 0x3e3   : > { %v2207_v7 = vsub.f32 %v2191_v45, %v4873_v44 }
 0x3e4   : > { %v2249_v12 = vsub.f32 %v2120_v58, %v2217_v38  ;;  %v2297_v60 = vmul.f32 %v2217_v38, %v2120_v58  ;;  %v2392_v51 = vmul.f32 %v4771_v24, %v2373_v9  ;;  %v1799_v58 = vmax.f32 %v5256_v52, 0.0 }
 0x3e5   : > { %v2239_v37 = vsub.f32 %v4859_v21, %v2207_v7  ;;  %v2287_v4 = vmul.f32 %v2207_v7, %v4859_v21  ;;  %v1881_v9 = vmin.f32 %v1863_v29, %v4652_v56 }
 0x3e6   : > { %v2265_v30 = vmul.f32 %v2249_v12, %v2217_v38  ;;  %3179 = vrcp.f32 %v2297_v60  ;;  %2449 = vmatmul.f32.gmra.mxu1 %v2389_v33  ;;  %2458 = vmatmul.f32.gmra.mxu2 %v2392_v51 }
 0x3e7   : > { %v2255_v34 = vmul.f32 %v2239_v37, %v2207_v7  ;;  %3181 = vrcp.f32 %v2287_v4  ;;  %v2074_v7 = vmax.f32 %v1863_v29, %v4652_v56 }
 0x3e8   : > { %v1940_v23 = vpop.permute.xlu2 %1939  ;;  %v2165_v31 = vpop.permute.xlu1 %2164  ;;  %v2281_v40 = vsub.f32 %v2233_v32, %v2265_v30 }
 0x3e9   : > { %v2198_v44 = vadd.f32 %v4701_v11, %v2165_v31  ;;  %v2271_v17 = vsub.f32 %v4889_v0, %v2255_v34  ;;  %v1961_v39 = vmax.f32 %v1940_v23, %v4655_v57  ;;  %v2089_v59 = vmin.f32 %v1940_v23, %v4655_v57 }
 0x3eb   : > { %v2214_v25 = vsub.f32 %v2198_v44, %v4910_v28 }
 0x3ec   : > { %v3180_v61 = vpop.eup %3179 }
 0x3ed   : > { %v3182_v27 = vpop.eup %3181  ;;  %v2246_v6 = vsub.f32 %v4900_v8, %v2214_v25  ;;  %v2294_v21 = vmul.f32 %v2214_v25, %v4900_v8  ;;  %v2329_v14 = vmul.f32 %v3180_v61, %v2297_v60 }
 0x3ee   : > { %v2319_v22 = vmul.f32 %v3182_v27, %v2287_v4 }
 0x3ef   : > { %v2262_v47 = vmul.f32 %v2246_v6, %v2214_v25  ;;  %3183 = vrcp.f32 %v2294_v21  ;;  %v2345_v63 = vsub.f32 2.0, %v2329_v14 }
 0x3f0   : > { %v2335_v54 = vsub.f32 2.0, %v2319_v22 }
 0x3f1   : > { %v2169_v19 = vpop.permute.xlu2 %2168  ;;  %v1859_v0 = vpop.permute.xlu1 %1858  ;;  %v2361_v2 = vmul.f32 %v3180_v61, %v2345_v63  ;;  %v2278_v28 = vsub.f32 %v4925_v36, %v2262_v47 }
 0x3f2   : > { %v2199_v15 = vadd.f32 %v4701_v11, %v2169_v19  ;;  %v1880_v62 = vmin.f32 %v1859_v0, %v4652_v56  ;;  %v2073_v8 = vmax.f32 %v1859_v0, %v4652_v56  ;;  %v2351_v26 = vmul.f32 %v3182_v27, %v2335_v54 }
 0x3f3   : > { %v2377_v46 = vmul.f32 %v2361_v2, %v2281_v40 }
 0x3f4   : > { %v2215_v42 = vsub.f32 %v2199_v15, %v4943_v49  ;;  %v1977_v18 = vsub.f32 %v1880_v62, %v1961_v39  ;;  %v2105_v50 = vsub.f32 %v2073_v8, %v2089_v59  ;;  %v2367_v10 = vmul.f32 %v2351_v26, %v2271_v17  ;;  %v5257_v49 = vld [vmem:[#allocation7_spill] sm:$0xff]  ;;  %v5258_v17 = vld [vmem:[#allocation26_spill] sm:$0xff] }
 0x3f5   : > { %v3184_v16 = vpop.eup %3183  ;;  %v2396_v48 = vmul.f32 %v4771_v24, %v2377_v46  ;;  %v1800_v56 = vmax.f32 %v5258_v17, 0.0  ;;  %v2401_v17 = vld [vmem:[#allocation3 + $0x10] sm:$0xff] }
 0x3f6   : > { %v2247_v36 = vsub.f32 %v4935_v35, %v2215_v42  ;;  %v2295_v41 = vmul.f32 %v2215_v42, %v4935_v35  ;;  %v1993_v5 = vmax.f32 %v1977_v18, 0.0  ;;  %v2386_v43 = vmul.f32 %v4771_v24, %v2367_v10 }
 0x3f7   : > { %2470 = vmatmul.f32.gmra.mxu3 %v2396_v48  ;;  %v2326_v32 = vmul.f32 %v3184_v16, %v2294_v21  ;;  %v2121_v53 = vmul.f32 %v2105_v50, %v5257_v49 }
 0x3f8   : > { %v2263_v55 = vmul.f32 %v2247_v36, %v2215_v42  ;;  %3185 = vrcp.f32 %v2295_v41  ;;  %v2009_v45 = vmul.f32 %v1993_v5, %v1799_v58  ;;  %2440 = vmatmul.f32.gmra.mxu0 %v2386_v43 }
 0x3f9   : > { %v2342_v38 = vsub.f32 2.0, %v2326_v32 }
 0x3fa   : > { %v1944_v12 = vpop.permute.xlu2 %1943  ;;  %v2153_v60 = vpop.permute.xlu1 %2152  ;;  %v2234_v35 = vmul.f32 %v2121_v53, %v2009_v45  ;;  %v2279_v33 = vsub.f32 %v4951_v1, %v2263_v55 }
 0x3fb   : > { %v1962_v51 = vmax.f32 %v1944_v12, %v4655_v57  ;;  %v2090_v37 = vmin.f32 %v1944_v12, %v4655_v57  ;;  %v2195_v4 = vadd.f32 %v4701_v11, %v2153_v60  ;;  %v2358_v30 = vmul.f32 %v3184_v16, %v2342_v38  ;;  %v5259_v57 = vld [vmem:[#allocation10_spill] sm:$0xff] }
 0x3fd   : > { %v1978_v34 = vsub.f32 %v1881_v9, %v1962_v51  ;;  %v2106_v23 = vsub.f32 %v2074_v7, %v2090_v37  ;;  %v2211_v31 = vsub.f32 %v2195_v4, %v4993_v13  ;;  %v2374_v40 = vmul.f32 %v2358_v30, %v2278_v28  ;;  %v2403_v4 = vld [vmem:[#allocation3 + $0x20] sm:$0xff] }
 0x3fe   : > { %v3186_v44 = vpop.eup %3185 }
 0x3ff   : > { %v1994_v25 = vmax.f32 %v1978_v34, 0.0  ;;  %v2243_v61 = vsub.f32 %v4988_v3, %v2211_v31  ;;  %v2291_v1 = vmul.f32 %v2211_v31, %v4988_v3  ;;  %v2393_v27 = vmul.f32 %v4771_v24, %v2374_v40 }
 0x400   : > { %v2327_v6 = vmul.f32 %v3186_v44, %v2295_v41  ;;  %v2122_v21 = vmul.f32 %v2106_v23, %v5259_v57 }
 0x401   : > { %v2259_v14 = vmul.f32 %v2243_v61, %v2211_v31  ;;  %3187 = vrcp.f32 %v2291_v1  ;;  %v2010_v22 = vmul.f32 %v1994_v25, %v1800_v56  ;;  %2461 = vmatmul.f32.gmra.mxu2 %v2393_v27  ;;  %v2400_v31 = vld [vmem:[#allocation3 + $0x8] sm:$0xff]  ;;  %v2407_v61 = vld [vmem:[#allocation3 + $0x40] sm:$0xff] }
 0x402   : > { %v2181_v47 = vpop.permute.xlu1 %2180  ;;  %v2343_v13 = vsub.f32 2.0, %v2327_v6  ;;  %v2404_v6 = vld [vmem:[#allocation3 + $0x28] sm:$0xff] }
 0x403   : > { %v2202_v63 = vadd.f32 %v4701_v11, %v2181_v47  ;;  %v2235_v54 = vmul.f32 %v2122_v21, %v2010_v22  ;;  %v2275_v39 = vsub.f32 %v4998_v20, %v2259_v14  ;;  %v2411_v14 = vld [vmem:[#allocation3 + $0x60] sm:$0xff] }
 0x404   : > { %v2359_v59 = vmul.f32 %v3186_v44, %v2343_v13  ;;  %v2405_v13 = vld [vmem:[#allocation3 + $0x30] sm:$0xff] }
 0x405   : > { %v2218_v19 = vsub.f32 %v2202_v63, %v2009_v45  ;;  %v2399_v45 = vld [vmem:[#allocation3] sm:$0xff] }
 0x406   : > { %v2375_v0 = vmul.f32 %v2359_v59, %v2279_v33 }
 0x407   : > { %v3188_v3 = vpop.eup %3187  ;;  %v2250_v2 = vsub.f32 %v2121_v53, %v2218_v19  ;;  %v2298_v28 = vmul.f32 %v2218_v19, %v2121_v53 }
 0x408   : > { %v2394_v15 = vmul.f32 %v4771_v24, %v2375_v0  ;;  %v2323_v62 = vmul.f32 %v3188_v3, %v2291_v1  ;;  %v2402_v0 = vld [vmem:[#allocation3 + $0x18] sm:$0xff] }
 0x409   : > { %v2266_v8 = vmul.f32 %v2250_v2, %v2218_v19  ;;  %3189 = vrcp.f32 %v2298_v28 }
 0x40a   : > { %2464 = vmatmul.f32.gmra.mxu2 %v2394_v15  ;;  %v2185_v26 = vpop.permute.xlu1 %2184  ;;  %v2339_v46 = vsub.f32 2.0, %v2323_v62 }
 0x40b   : > { %v2203_v42 = vadd.f32 %v4701_v11, %v2185_v26  ;;  %v2282_v18 = vsub.f32 %v2234_v35, %v2266_v8  ;;  %v2412_v26 = vld [vmem:[#allocation3 + $0x68] sm:$0xff] }
 0x40c   : > { %v2355_v50 = vmul.f32 %v3188_v3, %v2339_v46  ;;  %v2561_v3 = vpop.permute.xlu2 %2560 }
 0x40d   : > { %v2219_v10 = vsub.f32 %v2203_v42, %v2010_v22  ;;  %v2565_v42 = vpop.permute.xlu0 %2564 }
 0x40e   : > { %v2371_v20 = vmul.f32 %v2355_v50, %v2275_v39  ;;  %v2408_v39 = vld [vmem:[#allocation3 + $0x48] sm:$0xff] }
 0x40f   : > { %v3190_v16 = vpop.eup %3189  ;;  %v2251_v48 = vsub.f32 %v2122_v21, %v2219_v10  ;;  %v2299_v52 = vmul.f32 %v2219_v10, %v2122_v21 }
 0x410   : > { %v2390_v58 = vmul.f32 %v4771_v24, %v2371_v20  ;;  %v2330_v36 = vmul.f32 %v3190_v16, %v2298_v28 }
 0x411   : > { %v2267_v41 = vmul.f32 %v2251_v48, %v2219_v10  ;;  %3191 = vrcp.f32 %v2299_v52 }
 0x412   : > { %v5042_v5 = vpop.permute.xlu1 %2562  ;;  %2452 = vmatmul.f32.gmra.mxu1 %v2390_v58  ;;  %v2346_v29 = vsub.f32 2.0, %v2330_v36 }
 0x413   : > { %v2283_v43 = vsub.f32 %v2235_v54, %v2267_v41 }
 0x414   : > { %v2362_v32 = vmul.f32 %v3190_v16, %v2346_v29  ;;  %v2567_v36 = vpop.permute.xlu2 %2566 }
 0x416   : > { %v2378_v55 = vmul.f32 %v2362_v32, %v2282_v18 }
 0x417   : > { %v3192_v11 = vpop.eup %3191 }
 0x418   : > { %v2397_v49 = vmul.f32 %v4771_v24, %v2378_v55  ;;  %v2331_v53 = vmul.f32 %v3192_v11, %v2299_v52 }
 0x41a   : > { %v5045_v38 = vpop.permute.xlu1 %2568  ;;  %2473 = vmatmul.f32.gmra.mxu3 %v2397_v49  ;;  %v2347_v9 = vsub.f32 2.0, %v2331_v53 }
 0x41c   : > { %v2432_v7 = vpop.f32.mrf.mxu0  ;;  %v2363_v12 = vmul.f32 %v3192_v11, %v2347_v9  ;;  %v2409_v11 = vld [vmem:[#allocation3 + $0x50] sm:$0xff] }
 0x41d   : > { %v2480_v60 = vadd.f32 %v2432_v7, %v2399_v45 }
 0x41e   : > { %v2379_v35 = vmul.f32 %v2363_v12, %v2283_v43  ;;  %v2571_v12 = vpop.permute.xlu0 %2570 }
 0x41f   : > { %2496 = vst.msk [vmem:[#allocation3] sm:$0xff] %vm1153_vm1, %v2480_v60  ;;  %v2410_v60 = vld [vmem:[#allocation3 + $0x58] sm:$0xff] }
 0x420   : > { %v2398_v33 = vmul.f32 %v4771_v24, %v2379_v35 }
 0x422   : > { %v5049_v51 = vpop.permute.xlu1 %2574  ;;  %2476 = vmatmul.f32.gmra.mxu3 %v2398_v33  ;;  %v2406_v33 = vld [vmem:[#allocation3 + $0x38] sm:$0xff] }
 0x426   : > { %v2528_v62 = vld [vmem:[#allocation3] sm:$0xff] }
 0x427   : > { %v2608_v50 = vmul.f32 %v2561_v3, %v2528_v62 }
 0x429   : > { %v2624_v52 = vsel %vm1153_vm1, %v2608_v50, 0.0  ;;  %v2414_v50 = vld [vmem:[#allocation3 + $0x78] sm:$0xff] }
 0x42a   : > { %v5051_v37 = vpop.permute.xlu1 %2580 }
 0x42f   : > { %v2444_v30 = vpop.f32.mrf.mxu1 }
 0x430   : > { %v2484_v34 = vadd.f32 %v2444_v30, %v2403_v4  ;;  %v2573_v30 = vpop.permute.xlu2 %2572 }
 0x432   : > { %2500 = vst.msk [vmem:[#allocation3 + $0x20] sm:$0xff] %vm1153_vm1, %v2484_v34  ;;  %v5054_v23 = vpop.permute.xlu1 %2586 }
 0x437   : > { %v2435_v40 = vpop.f32.mrf.mxu0 }
 0x438   : > { %v2481_v44 = vadd.f32 %v2435_v40, %v2400_v31 }
 0x439   : > { %v2532_v48 = vld [vmem:[#allocation3 + $0x20] sm:$0xff] }
 0x43a   : > { %2497 = vst.msk [vmem:[#allocation3 + $0x8] sm:$0xff] %vm1153_vm1, %v2481_v44  ;;  %v2702_v24 = vpop.permute.xlu1 %2701 }
 0x43b   : > { %2704 = vst.msk [vmem:[%s479_s17] sm:$0x1] %vm2698_vm13, %v2702_v24  ;;  %v2577_v24 = vpop.permute.xlu0 %2576 }
 0x441   : > { %v2529_v2 = vld [vmem:[#allocation3 + $0x8] sm:$0xff] }
 0x442   : > { %v2609_v46 = vmul.f32 %v5042_v5, %v2529_v2  ;;  %v2612_v5 = vmul.f32 %v5045_v38, %v2532_v48 }
 0x444   : > { %v2625_v16 = vsel %vm1153_vm1, %v2609_v46, 0.0  ;;  %v2631_v53 = vsel %vm1153_vm1, %v2612_v5, 0.0 }
 0x445   : > { %v2626_v41 = vadd.f32 %v2625_v16, %v2624_v52 }
 0x448   : > { %v2438_v56 = vpop.f32.mrf.mxu0 }
 0x449   : > { %v2482_v25 = vadd.f32 %v2438_v56, %v2401_v17 }
 0x44b   : > { %2498 = vst.msk [vmem:[#allocation3 + $0x10] sm:$0xff] %vm1153_vm1, %v2482_v25 }
 0x44f   : > { %v2456_v1 = vpop.f32.mrf.mxu2 }
 0x450   : > { %v2488_v27 = vadd.f32 %v2456_v1, %v2407_v61  ;;  %v2579_v1 = vpop.permute.xlu2 %2578 }
 0x452   : > { %2504 = vst.msk [vmem:[#allocation3 + $0x40] sm:$0xff] %vm1153_vm1, %v2488_v27  ;;  %v2530_v8 = vld [vmem:[#allocation3 + $0x10] sm:$0xff] }
 0x453   : > { %v2610_v10 = vmul.f32 %v2565_v42, %v2530_v8 }
 0x455   : > { %v2627_v58 = vsel %vm1153_vm1, %v2610_v10, 0.0 }
 0x456   : > { %v2628_v32 = vadd.f32 %v2627_v58, %v2626_v41 }
 0x458   : > { %v2585_v42 = vpop.permute.xlu2 %2584 }
 0x459   : > { %v2536_v25 = vld [vmem:[#allocation3 + $0x40] sm:$0xff] }
 0x45b   : > { %v2447_v57 = vpop.f32.mrf.mxu1 }
 0x45c   : > { %v2485_v21 = vadd.f32 %v2447_v57, %v2404_v6  ;;  %v2616_v57 = vmul.f32 %v2577_v24, %v2536_v25 }
 0x45e   : > { %2501 = vst.msk [vmem:[#allocation3 + $0x28] sm:$0xff] %vm1153_vm1, %v2485_v21 }
 0x460   : > { %v2468_v22 = vpop.f32.mrf.mxu3 }
 0x461   : > { %v2492_v47 = vadd.f32 %v2468_v22, %v2411_v14 }
 0x463   : > { %2508 = vst.msk [vmem:[#allocation3 + $0x60] sm:$0xff] %vm1153_vm1, %v2492_v47  ;;  %v2450_v63 = vpop.f32.mrf.mxu1 }
 0x464   : > { %v2486_v54 = vadd.f32 %v2450_v63, %v2405_v13  ;;  %v2413_v13 = vld [vmem:[#allocation3 + $0x70] sm:$0xff] }
 0x465   : > { %v2533_v38 = vld [vmem:[#allocation3 + $0x28] sm:$0xff] }
 0x466   : > { %2502 = vst.msk [vmem:[#allocation3 + $0x30] sm:$0xff] %vm1153_vm1, %v2486_v54  ;;  %v2613_v40 = vmul.f32 %v2571_v12, %v2533_v38 }
 0x468   : > { %v2633_v17 = vsel %vm1153_vm1, %v2613_v40, 0.0 }
 0x469   : > { %v2459_v59 = vpop.f32.mrf.mxu2 }
 0x46a   : > { %v2489_v19 = vadd.f32 %v2459_v59, %v2408_v39 }
 0x46c   : > { %2505 = vst.msk [vmem:[#allocation3 + $0x48] sm:$0xff] %vm1153_vm1, %v2489_v19 }
 0x46d   : > { %v2534_v44 = vld [vmem:[#allocation3 + $0x30] sm:$0xff] }
 0x46e   : > { %v2614_v56 = vmul.f32 %v2573_v30, %v2534_v44 }
 0x470   : > { %v2635_v21 = vsel %vm1153_vm1, %v2614_v56, 0.0 }
 0x473   : > { %v2537_v27 = vld [vmem:[#allocation3 + $0x48] sm:$0xff] }
 0x474   : > { %v2617_v63 = vmul.f32 %v2579_v1, %v2537_v27 }
 0x475   : > { %v2441_v28 = vpop.f32.mrf.mxu0 }
 0x476   : > { %v2483_v15 = vadd.f32 %v2441_v28, %v2402_v0  ;;  %v2639_v0 = vsel %vm1153_vm1, %v2616_v57, 0.0  ;;  %v2583_v28 = vpop.permute.xlu0 %2582  ;;  %v2641_v62 = vsel %vm1153_vm1, %v2617_v63, 0.0 }
 0x478   : > { %2499 = vst.msk [vmem:[#allocation3 + $0x18] sm:$0xff] %vm1153_vm1, %v2483_v15 }
 0x47a   : > { %v2471_v18 = vpop.f32.mrf.mxu3 }
 0x47b   : > { %v2493_v20 = vadd.f32 %v2471_v18, %v2412_v26 }
 0x47d   : > { %2509 = vst.msk [vmem:[#allocation3 + $0x68] sm:$0xff] %vm1153_vm1, %v2493_v20 }
 0x47f   : > { %v2531_v29 = vld [vmem:[#allocation3 + $0x18] sm:$0xff] }
 0x480   : > { %v2611_v43 = vmul.f32 %v2567_v36, %v2531_v29  ;;  %v2589_v29 = vpop.permute.xlu0 %2588 }
 0x482   : > { %v2629_v55 = vsel %vm1153_vm1, %v2611_v43, 0.0 }
 0x483   : > { %v2630_v49 = vadd.f32 %v2629_v55, %v2628_v32 }
 0x484   : > { %v2462_v45 = vpop.f32.mrf.mxu2  ;;  %v2541_v16 = vld [vmem:[#allocation3 + $0x68] sm:$0xff] }
 0x485   : > { %v2632_v9 = vadd.f32 %v2631_v53, %v2630_v49  ;;  %v2490_v7 = vadd.f32 %v2462_v45, %v2409_v11  ;;  %v2621_v41 = vmul.f32 %v5054_v23, %v2541_v16  ;;  %v2591_v49 = vpop.permute.xlu2 %2590 }
 0x487   : > { %2506 = vst.msk [vmem:[#allocation3 + $0x50] sm:$0xff] %vm1153_vm1, %v2490_v7  ;;  %v2634_v61 = vadd.f32 %v2633_v17, %v2632_v9  ;;  %v2649_v32 = vsel %vm1153_vm1, %v2621_v41, 0.0 }
 0x489   : > { %v2636_v47 = vadd.f32 %v2635_v21, %v2634_v61 }
 0x48d   : > { %v2465_v35 = vpop.f32.mrf.mxu2 }
 0x48e   : > { %v2491_v4 = vadd.f32 %v2465_v35, %v2410_v60  ;;  %v2538_v22 = vld [vmem:[#allocation3 + $0x50] sm:$0xff] }
 0x48f   : > { %v2453_v34 = vpop.f32.mrf.mxu1  ;;  %v2618_v3 = vmul.f32 %v5051_v37, %v2538_v22 }
 0x490   : > { %2507 = vst.msk [vmem:[#allocation3 + $0x58] sm:$0xff] %vm1153_vm1, %v2491_v4  ;;  %v2487_v31 = vadd.f32 %v2453_v34, %v2406_v33 }
 0x491   : > { %v2643_v46 = vsel %vm1153_vm1, %v2618_v3, 0.0 }
 0x492   : > { %2503 = vst.msk [vmem:[#allocation3 + $0x38] sm:$0xff] %vm1153_vm1, %v2487_v31 }
 0x497   : > { %v2539_v39 = vld [vmem:[#allocation3 + $0x58] sm:$0xff] }
 0x498   : > { %v2619_v8 = vmul.f32 %v2583_v28, %v2539_v39 }
 0x499   : > { %v2535_v6 = vld [vmem:[#allocation3 + $0x38] sm:$0xff] }
 0x49a   : > { %v2615_v14 = vmul.f32 %v5049_v51, %v2535_v6  ;;  %v2540_v51 = vld [vmem:[#allocation3 + $0x60] sm:$0xff]  ;;  %v2645_v20 = vsel %vm1153_vm1, %v2619_v8, 0.0 }
 0x49b   : > { %v2620_v10 = vmul.f32 %v2585_v42, %v2540_v51 }
 0x49c   : > { %v2637_v54 = vsel %vm1153_vm1, %v2615_v14, 0.0 }
 0x49d   : > { %v2638_v59 = vadd.f32 %v2637_v54, %v2636_v47  ;;  %v2474_v19 = vpop.f32.mrf.mxu3  ;;  %v2647_v36 = vsel %vm1153_vm1, %v2620_v10, 0.0 }
 0x49e   : > { %v2494_v2 = vadd.f32 %v2474_v19, %v2413_v13 }
 0x49f   : > { %v2640_v15 = vadd.f32 %v2639_v0, %v2638_v59 }
 0x4a0   : > { %2510 = vst.msk [vmem:[#allocation3 + $0x70] sm:$0xff] %vm1153_vm1, %v2494_v2 }
 0x4a1   : > { %v2642_v26 = vadd.f32 %v2641_v62, %v2640_v15 }
 0x4a3   : > { %v2644_v18 = vadd.f32 %v2643_v46, %v2642_v26 }
 0x4a5   : > { %v2646_v37 = vadd.f32 %v2645_v20, %v2644_v18  ;;  %v2477_v48 = vpop.f32.mrf.mxu3 }
 0x4a6   : > { %v2495_v52 = vadd.f32 %v2477_v48, %v2414_v50 }
 0x4a7   : > { %v2542_v58 = vld [vmem:[#allocation3 + $0x70] sm:$0xff]  ;;  %v2648_v5 = vadd.f32 %v2647_v36, %v2646_v37 }
 0x4a8   : > { %2511 = vst.msk [vmem:[#allocation3 + $0x78] sm:$0xff] %vm1153_vm1, %v2495_v52  ;;  %v2622_v43 = vmul.f32 %v2589_v29, %v2542_v58 }
 0x4a9   : > { %v2650_v55 = vadd.f32 %v2649_v32, %v2648_v5 }
 0x4aa   : > { %v2651_v11 = vsel %vm1153_vm1, %v2622_v43, 0.0 }
 0x4ab   : > { %v2652_v9 = vadd.f32 %v2651_v11, %v2650_v55 }
 0x4af   : > { %v2543_v53 = vld [vmem:[#allocation3 + $0x78] sm:$0xff] }
 0x4b0   : > { %v2623_v45 = vmul.f32 %v2591_v49, %v2543_v53 }
 0x4b2   : > { %v2653_v7 = vsel %vm1153_vm1, %v2623_v45, 0.0 }
 0x4b3   : > { %v2654_v12 = vadd.f32 %v2653_v7, %v2652_v9 }
 0x4b5   : > { %v2655_v60 = vrot.slane %v2654_v12, 4 }
 0x4b7   : > { %v2656_v23 = vadd.f32 %v2655_v60, %v2654_v12 }
 0x4b9   : > { %v2657_v35 = vrot.slane %v2656_v23, 2 }
 0x4bb   : > { %v2658_v33 = vadd.f32 %v2657_v35, %v2656_v23 }
 0x4bd   : > { %v2659_v4 = vrot.slane %v2658_v33, 1 }
 0x4bf   : > { %v2660_v30 = vadd.f32 %v2659_v4, %v2658_v33 }
 0x4c1   : > { %2699 = vst.msk [vmem:[%s473_s22] sm:$0x1] %vm2698_vm13, %v2660_v30 }
 0x4c2 PF: > { %s19_s29 = sadd.s32 1, %s3236_s29   ;;  %s5260_s27 = smov %s3232_s28 }
 0x4c3   : > { %p16_p5 = scmp.ge.s32.totalorder %s19_s29, 4   ;;  %s5261_s28 = smov %s5263_s30 }
 0x4c5   :  { %18 = sbr.rel (!%p16_p5) target bundleno = 2 (0x2), region = 105 }

</bundles_post_ra>
